<compile_context>
chip_gen: v7x
topology: tpu7x:2x2x1
jax: 0.10.0
libtpu: 0.0.40
codegen_flags: <defaults>
</compile_context>

<pallas_src>
import math
import jax
import jax.numpy as jnp
from jax.experimental import pallas as pl
from jax.experimental.pallas import tpu as pltpu

# ---------------- config (scaled down; real vit_small uses D=384, depth=12) -------
B = 2
IMG = 16
PATCH = 4
C_IN = 1
PPC = PATCH * PATCH * C_IN        # 16 features per patch
NP = (IMG // PATCH) ** 2          # 16 patch tokens
N_REG = 4                         # register tokens (dinov2 reg4)
T = 1 + N_REG + NP                # cls + reg + patches = 21 real tokens
T_PAD = 24                        # padded to a multiple of 8 (sublane alignment)
D = 32                            # hidden dim
NH = 4                            # attention heads
DH = D // NH
MLP = 4 * D
DEPTH = 2
NUM_CLASSES = 6
NT = 4                            # towers: spec, eeg, raw_50s, raw_10s

F32 = jnp.float32

# TODO(synk): for the real-scale model (D=384, depth=12) weights should be bf16
# (f32 accumulation) and per-block weights streamed over a depth grid axis with
# pl.Buffered(2) — mandatory on v7x's 64 MiB VMEM. At this benchmark scale
# everything fits, so weights stay f32-resident.


# ---------------- in-kernel helpers ------------------------------------------------
def _ln(x, g, b, eps=1e-6):
    mu = jnp.mean(x, axis=-1, keepdims=True)
    var = jnp.mean((x - mu) ** 2, axis=-1, keepdims=True)
    return (x - mu) * jax.lax.rsqrt(var + eps) * g + b


def _gelu(x):
    # TODO(synk): timm ViT uses exact erf-GELU; tanh approximation used here.
    return 0.5 * x * (1.0 + jnp.tanh(0.7978845608028654 * (x + 0.044715 * x * x * x)))


# ---------------- fused per-tower ViT kernel (grid axis = tower) --------------------
def _tower_kernel(patches_ref, patch_w_ref, tok_bias_ref, norm_g_ref, norm_b_ref,
                  ln1g_ref, ln1b_ref, wqkv_ref, bqkv_ref, wproj_ref, bproj_ref,
                  ln2g_ref, ln2b_ref, wfc1_ref, bfc1_ref, wfc2_ref, bfc2_ref,
                  feat_ref):
    # Patch embedding + token assembly.  `patches_ref` already has one row per
    # token slot (cls/reg/pad rows are zero), so the matmul result lands directly
    # at the right token positions; cls/reg/pos/patch-bias come in via tok_bias.
    x = jnp.dot(patches_ref[0], patch_w_ref[0],
                preferred_element_type=jnp.float32)            # (B*T_PAD, D)
    x = x.reshape(B, T_PAD, D) + tok_bias_ref[0]               # (B, T_PAD, D)

    # Mask so padded key slots never contribute to softmax.
    key_idx = jax.lax.broadcasted_iota(jnp.int32, (1, 1, T_PAD), 2)
    key_mask = jnp.where(key_idx < T, 0.0, -1e30).astype(jnp.float32)

    scale = 1.0 / math.sqrt(DH)
    for d in range(DEPTH):                                     # static unroll
        # ---- attention ----
        h = _ln(x, ln1g_ref[0, d], ln1b_ref[0, d])
        qkv = (jnp.dot(h.reshape(B * T_PAD, D), wqkv_ref[0, d],
                       preferred_element_type=jnp.float32) + bqkv_ref[0, d])
        qkv = qkv.reshape(B, T_PAD, 3 * D)

        ctx_heads = []
        for hh in range(NH):                                   # static unroll over heads
            # NOTE: at real scale (DH=64) these are half-lane-group aligned slices.
            qh = qkv[:, :, hh * DH:(hh + 1) * DH]              # (B, T_PAD, DH)
            kh = qkv[:, :, D + hh * DH:D + (hh + 1) * DH]
            vh = qkv[:, :, 2 * D + hh * DH:2 * D + (hh + 1) * DH]
            s = jnp.einsum('bqd,bkd->bqk', qh, kh,
                           preferred_element_type=jnp.float32) * scale
            s = s + key_mask
            s = s - jnp.max(s, axis=-1, keepdims=True)
            e = jnp.exp(s)
            p = e * pl.reciprocal(jnp.sum(e, axis=-1, keepdims=True), approx=True)
            ctx_heads.append(jnp.einsum('bqk,bkd->bqd', p, vh,
                                        preferred_element_type=jnp.float32))
        ctx = jnp.concatenate(ctx_heads, axis=-1).reshape(B * T_PAD, D)

        attn_out = (jnp.dot(ctx, wproj_ref[0, d],
                            preferred_element_type=jnp.float32) + bproj_ref[0, d])
        x = x + attn_out.reshape(B, T_PAD, D)

        # ---- MLP ----
        h2 = _ln(x, ln2g_ref[0, d], ln2b_ref[0, d]).reshape(B * T_PAD, D)
        m = _gelu(jnp.dot(h2, wfc1_ref[0, d],
                          preferred_element_type=jnp.float32) + bfc1_ref[0, d])
        m = jnp.dot(m, wfc2_ref[0, d],
                    preferred_element_type=jnp.float32) + bfc2_ref[0, d]
        x = x + m.reshape(B, T_PAD, D)

    # forward_features(...)[:, 0] : final LayerNorm of the CLS token only.
    cls_tok = x[:, 0, :]                                       # (B, D)
    feat_ref[0] = _ln(cls_tok, norm_g_ref[0], norm_b_ref[0])


def _tower_spec(arr):
    rest = arr.shape[1:]
    return pl.BlockSpec((1,) + rest, lambda t, n=len(rest): (t,) + (0,) * n)


def vit_towers(patch_tokens, tok_bias, tw):
    inputs = [patch_tokens, tw['patch_w'], tok_bias, tw['norm_g'], tw['norm_b'],
              tw['ln1_g'], tw['ln1_b'], tw['wqkv'], tw['bqkv'],
              tw['wproj'], tw['bproj'], tw['ln2_g'], tw['ln2_b'],
              tw['wfc1'], tw['bfc1'], tw['wfc2'], tw['bfc2']]
    return pl.pallas_call(
        _tower_kernel,
        out_shape=jax.ShapeDtypeStruct((NT, B, D), F32),
        grid=(NT,),
        in_specs=[_tower_spec(x) for x in inputs],
        out_specs=pl.BlockSpec((1, B, D), lambda t: (t, 0, 0)),
        compiler_params=pltpu.CompilerParams(dimension_semantics=("parallel",)),
    )(*inputs)


# ---------------- heads kernel: all 5 heads in one matmul ---------------------------
def _heads_kernel(f_ref, w_ref, b_ref, o_ref):
    o_ref[...] = (jnp.dot(f_ref[...], w_ref[...],
                          preferred_element_type=jnp.float32) + b_ref[...])


def pallas_heads(feat128, w_all, b_all):
    return pl.pallas_call(
        _heads_kernel,
        out_shape=jax.ShapeDtypeStruct((B, 5 * NUM_CLASSES), F32),
    )(feat128, w_all, b_all)


# ---------------- SelfAttentionPooling (squeezeformer path), batched ----------------
def _sap_kernel(x_ref, w_ref, b_ref, o_ref):
    n, tt, hdim = x_ref.shape
    x = x_ref[...]                                              # (N, T, H)
    s = (jnp.dot(x.reshape(n * tt, hdim), w_ref[...],
                 preferred_element_type=jnp.float32) + b_ref[...])
    s = s.reshape(n, tt, 1)
    s = s - jnp.max(s, axis=1, keepdims=True)
    e = jnp.exp(s)
    att = e * pl.reciprocal(jnp.sum(e, axis=1, keepdims=True), approx=True)
    o_ref[...] = jnp.sum(x * att, axis=1)                       # (N, H)


def self_attention_pooling(x, w, b):
    return pl.pallas_call(
        _sap_kernel,
        out_shape=jax.ShapeDtypeStruct((x.shape[0], x.shape[2]), F32),
    )(x, w, b)


# ---------------- parameter init (deterministic, synthetic) -------------------------
def init_params(key):
    def nrm(k, shape, std=0.02):
        return jax.random.normal(k, shape, F32) * std

    keys = iter(jax.random.split(key, 16))
    towers = {
        'patch_w': nrm(next(keys), (NT, PPC, D)),
        'patch_b': jnp.zeros((NT, 1, D), F32),
        'cls': nrm(next(keys), (NT, 1, D)),
        'reg': nrm(next(keys), (NT, N_REG, D)),
        'pos': nrm(next(keys), (NT, T, D)),
        'norm_g': jnp.ones((NT, 1, D), F32),
        'norm_b': jnp.zeros((NT, 1, D), F32),
        'ln1_g': jnp.ones((NT, DEPTH, 1, D), F32),
        'ln1_b': jnp.zeros((NT, DEPTH, 1, D), F32),
        'wqkv': nrm(next(keys), (NT, DEPTH, D, 3 * D)),
        'bqkv': jnp.zeros((NT, DEPTH, 1, 3 * D), F32),
        'wproj': nrm(next(keys), (NT, DEPTH, D, D)),
        'bproj': jnp.zeros((NT, DEPTH, 1, D), F32),
        'ln2_g': jnp.ones((NT, DEPTH, 1, D), F32),
        'ln2_b': jnp.zeros((NT, DEPTH, 1, D), F32),
        'wfc1': nrm(next(keys), (NT, DEPTH, D, MLP)),
        'bfc1': jnp.zeros((NT, DEPTH, 1, MLP), F32),
        'wfc2': nrm(next(keys), (NT, DEPTH, MLP, D)),
        'bfc2': jnp.zeros((NT, DEPTH, 1, D), F32),
    }
    # Pack head (kl) + head1..head4 into a single (4D, 30) weight:
    #   cols [0:6]   = nn.Linear(4D, 6)  on cat(spec, eeg, raw50, raw10)
    #   cols [6:30]  = block-diagonal head1..head4 (each (D, 6))
    nc = NUM_CLASSES
    wk = nrm(next(keys), (NT * D, nc))
    w_all = jnp.zeros((NT * D, 5 * nc), F32)
    w_all = w_all.at[:, 0:nc].set(wk)
    for t in range(NT):
        w_all = w_all.at[t * D:(t + 1) * D,
                         (t + 1) * nc:(t + 2) * nc].set(nrm(next(keys), (D, nc)))
    b_all = jnp.zeros((1, 5 * nc), F32)

    return {
        'towers': towers,
        'w_all': w_all,
        'b_all': b_all,
        'sap_w': nrm(next(keys), (D, 1)),
        'sap_b': jnp.zeros((1, 1), F32),
    }


# ---------------- wrapper-side layout plumbing (XLA, cheap) --------------------------
def _patch_tokens(imgs):
    # (NT, B, IMG, IMG, C) NHWC -> (NT, B*T_PAD, PPC), one row per token slot.
    g = IMG // PATCH
    x = imgs.reshape(NT, B, g, PATCH, g, PATCH, C_IN)
    x = x.transpose(0, 1, 2, 4, 3, 5, 6).reshape(NT, B, NP, PPC)
    pre = jnp.zeros((NT, B, 1 + N_REG, PPC), F32)
    post = jnp.zeros((NT, B, T_PAD - T, PPC), F32)
    return jnp.concatenate([pre, x, post], axis=2).reshape(NT, B * T_PAD, PPC)


def _token_bias(tw):
    # cls / reg tokens, positional embedding and patch-embed bias as one
    # (NT, T_PAD, D) additive slab (padded rows are zero).
    patch_rows = jnp.broadcast_to(tw['patch_b'], (NT, NP, D))
    base = jnp.concatenate([tw['cls'], tw['reg'], patch_rows], axis=1) + tw['pos']
    pad = jnp.zeros((NT, T_PAD - T, D), F32)
    return jnp.concatenate([base, pad], axis=1)


# ---------------- model forward -----------------------------------------------------
def vitnet_forward(spec_imgs, eeg_imgs, raw_50s_imgs, raw_10s_imgs, params):
    # raw_model == 'vit', backbone == 'vit_small*' path of the original module.
    imgs = jnp.stack([spec_imgs, eeg_imgs, raw_50s_imgs, raw_10s_imgs], axis=0)
    patch_tokens = _patch_tokens(imgs)
    tok_bias = _token_bias(params['towers'])

    feats = vit_towers(patch_tokens, tok_bias, params['towers'])      # (NT, B, D)

    # torch.cat((spec, eeg, raw50, raw10), 1) -> lane-dense (B, 4D=128) slab.
    feat128 = jnp.transpose(feats, (1, 0, 2)).reshape(B, NT * D)
    logits = pallas_heads(feat128, params['w_all'], params['b_all'])  # (B, 30)

    nc = NUM_CLASSES
    logits_kl = logits[:, 0:nc]
    logits_1 = logits[:, nc:2 * nc]
    logits_2 = logits[:, 2 * nc:3 * nc]
    logits_3 = logits[:, 3 * nc:4 * nc]
    logits_4 = logits[:, 4 * nc:5 * nc]
    return logits_kl, logits_1, logits_2, logits_3, logits_4


# ---------------- main ---------------------------------------------------------------
if __name__ == "__main__":
    key = jax.random.PRNGKey(0)
    k_par, k_in = jax.random.split(key)
    params = init_params(k_par)

    kins = jax.random.split(k_in, 5)
    spec_imgs = jax.random.normal(kins[0], (B, IMG, IMG, C_IN), F32)
    eeg_imgs = jax.random.normal(kins[1], (B, IMG, IMG, C_IN), F32)
    raw_50s_imgs = jax.random.normal(kins[2], (B, IMG, IMG, C_IN), F32)
    raw_10s_imgs = jax.random.normal(kins[3], (B, IMG, IMG, C_IN), F32)

    fwd = jax.jit(vitnet_forward)
    outs = jax.block_until_ready(
        fwd(spec_imgs, eeg_imgs, raw_50s_imgs, raw_10s_imgs, params))
    assert all(o.shape == (B, NUM_CLASSES) for o in outs)

    # Exercise the SelfAttentionPooling kernel (used only in the squeezeformer path).
    sap_x = jax.random.normal(kins[4], (B, 8, D), F32)
    sap_out = jax.block_until_ready(
        self_attention_pooling(sap_x, params['sap_w'], params['sap_b']))
    assert sap_out.shape == (B, D)

    print("KERNEL_OK")
</pallas_src>

<mosaic_0001>
module attributes {stable_mosaic.version = 11 : i64} {
  func.func @_tower_kernel(%arg0: i32, %arg1: memref<1x48x16xf32, #tpu.memory_space<vmem>>, %arg2: memref<1x16x32xf32, #tpu.memory_space<vmem>>, %arg3: memref<1x24x32xf32, #tpu.memory_space<vmem>>, %arg4: memref<1x1x32xf32, #tpu.memory_space<vmem>>, %arg5: memref<1x1x32xf32, #tpu.memory_space<vmem>>, %arg6: memref<1x2x1x32xf32, #tpu.memory_space<vmem>>, %arg7: memref<1x2x1x32xf32, #tpu.memory_space<vmem>>, %arg8: memref<1x2x32x96xf32, #tpu.memory_space<vmem>>, %arg9: memref<1x2x1x96xf32, #tpu.memory_space<vmem>>, %arg10: memref<1x2x32x32xf32, #tpu.memory_space<vmem>>, %arg11: memref<1x2x1x32xf32, #tpu.memory_space<vmem>>, %arg12: memref<1x2x1x32xf32, #tpu.memory_space<vmem>>, %arg13: memref<1x2x1x32xf32, #tpu.memory_space<vmem>>, %arg14: memref<1x2x32x128xf32, #tpu.memory_space<vmem>>, %arg15: memref<1x2x1x128xf32, #tpu.memory_space<vmem>>, %arg16: memref<1x2x128x32xf32, #tpu.memory_space<vmem>>, %arg17: memref<1x2x1x32xf32, #tpu.memory_space<vmem>>, %arg18: memref<1x2x32xf32, #tpu.memory_space<vmem>>) attributes {dimension_semantics = [#tpu.dimension_semantics<parallel>], iteration_bounds = array<i64: 4>, scalar_prefetch = 0 : i64, scratch_operands = 0 : i64, tpu.core_type = #tpu.core_type<tc>, window_params = [{transform_indices = @transform_0, window_bounds = array<i64: 1, 48, 16>}, {transform_indices = @transform_1, window_bounds = array<i64: 1, 16, 32>}, {transform_indices = @transform_2, window_bounds = array<i64: 1, 24, 32>}, {transform_indices = @transform_3, window_bounds = array<i64: 1, 1, 32>}, {transform_indices = @transform_4, window_bounds = array<i64: 1, 1, 32>}, {transform_indices = @transform_5, window_bounds = array<i64: 1, 2, 1, 32>}, {transform_indices = @transform_6, window_bounds = array<i64: 1, 2, 1, 32>}, {transform_indices = @transform_7, window_bounds = array<i64: 1, 2, 32, 96>}, {transform_indices = @transform_8, window_bounds = array<i64: 1, 2, 1, 96>}, {transform_indices = @transform_9, window_bounds = array<i64: 1, 2, 32, 32>}, {transform_indices = @transform_10, window_bounds = array<i64: 1, 2, 1, 32>}, {transform_indices = @transform_11, window_bounds = array<i64: 1, 2, 1, 32>}, {transform_indices = @transform_12, window_bounds = array<i64: 1, 2, 1, 32>}, {transform_indices = @transform_13, window_bounds = array<i64: 1, 2, 32, 128>}, {transform_indices = @transform_14, window_bounds = array<i64: 1, 2, 1, 128>}, {transform_indices = @transform_15, window_bounds = array<i64: 1, 2, 128, 32>}, {transform_indices = @transform_16, window_bounds = array<i64: 1, 2, 1, 32>}, {transform_indices = @transform_17, window_bounds = array<i64: 1, 2, 32>}]} {
    %c0 = arith.constant 0 : index
    %c0_0 = arith.constant 0 : index
    %c0_1 = arith.constant 0 : index
    %0 = vector.load %arg1[%c0, %c0_0, %c0_1] : memref<1x48x16xf32, #tpu.memory_space<vmem>>, vector<1x48x16xf32>
    %1 = vector.shape_cast %0 : vector<1x48x16xf32> to vector<48x16xf32>
    %c0_2 = arith.constant 0 : index
    %c0_3 = arith.constant 0 : index
    %c0_4 = arith.constant 0 : index
    %2 = vector.load %arg2[%c0_2, %c0_3, %c0_4] : memref<1x16x32xf32, #tpu.memory_space<vmem>>, vector<1x16x32xf32>
    %3 = vector.shape_cast %2 : vector<1x16x32xf32> to vector<16x32xf32>
    %cst = arith.constant dense<0.000000e+00> : vector<48x32xf32>
    %4 = tpu.matmul %1, %3, %cst {dimension_numbers = #tpu.dot_dimension_numbers<[1], [0], [0], [1], [0, 0, 1, 1], [], []>} : vector<48x16xf32>, vector<16x32xf32>, vector<48x32xf32> -> vector<48x32xf32>
    %5 = vector.shape_cast %4 : vector<48x32xf32> to vector<2x24x32xf32>
    %c0_5 = arith.constant 0 : index
    %c0_6 = arith.constant 0 : index
    %c0_7 = arith.constant 0 : index
    %6 = vector.load %arg3[%c0_5, %c0_6, %c0_7] : memref<1x24x32xf32, #tpu.memory_space<vmem>>, vector<1x24x32xf32>
    %7 = vector.shape_cast %6 : vector<1x24x32xf32> to vector<24x32xf32>
    %8 = vector.shape_cast %7 : vector<24x32xf32> to vector<1x24x32xf32>
    %9 = vector.broadcast %8 : vector<1x24x32xf32> to vector<2x24x32xf32>
    %10 = arith.addf %5, %9 : vector<2x24x32xf32>
    %11 = tpu.iota {dimensions = array<i32: 2>} : vector<1x1x24xi32>
    %c21_i32 = arith.constant 21 : i32
    %12 = vector.broadcast %c21_i32 : i32 to vector<1x1x24xi32>
    %13 = arith.cmpi slt, %11, %12 : vector<1x1x24xi32>
    %cst_8 = arith.constant 0.000000e+00 : f32
    %cst_9 = arith.constant -1.000000e+30 : f32
    %14 = vector.broadcast %cst_8 : f32 to vector<1x1x24xf32>
    %15 = vector.broadcast %cst_9 : f32 to vector<1x1x24xf32>
    %16 = arith.select %13, %14, %15 : vector<1x1x24xi1>, vector<1x1x24xf32>
    %c0_10 = arith.constant 0 : index
    %c0_11 = arith.constant 0 : index
    %c0_12 = arith.constant 0 : index
    %c0_13 = arith.constant 0 : index
    %17 = vector.load %arg6[%c0_10, %c0_11, %c0_12, %c0_13] : memref<1x2x1x32xf32, #tpu.memory_space<vmem>>, vector<1x1x1x32xf32>
    %18 = vector.shape_cast %17 : vector<1x1x1x32xf32> to vector<1x32xf32>
    %c0_14 = arith.constant 0 : index
    %c0_15 = arith.constant 0 : index
    %c0_16 = arith.constant 0 : index
    %c0_17 = arith.constant 0 : index
    %19 = vector.load %arg7[%c0_14, %c0_15, %c0_16, %c0_17] : memref<1x2x1x32xf32, #tpu.memory_space<vmem>>, vector<1x1x1x32xf32>
    %20 = vector.shape_cast %19 : vector<1x1x1x32xf32> to vector<1x32xf32>
    %cst_18 = arith.constant dense<0.000000e+00> : vector<2x24xf32>
    %21 = vector.multi_reduction <add>, %10, %cst_18 [2] : vector<2x24x32xf32> to vector<2x24xf32>
    %22 = vector.shape_cast %21 : vector<2x24xf32> to vector<2x24x1xf32>
    %cst_19 = arith.constant 3.200000e+01 : f32
    %23 = vector.broadcast %cst_19 : f32 to vector<2x24x1xf32>
    %24 = arith.divf %22, %23 : vector<2x24x1xf32>
    %25 = vector.broadcast %24 : vector<2x24x1xf32> to vector<2x24x32xf32>
    %26 = arith.subf %10, %25 : vector<2x24x32xf32>
    %27 = arith.mulf %26, %26 : vector<2x24x32xf32>
    %cst_20 = arith.constant dense<0.000000e+00> : vector<2x24xf32>
    %28 = vector.multi_reduction <add>, %27, %cst_20 [2] : vector<2x24x32xf32> to vector<2x24xf32>
    %29 = vector.shape_cast %28 : vector<2x24xf32> to vector<2x24x1xf32>
    %cst_21 = arith.constant 3.200000e+01 : f32
    %30 = vector.broadcast %cst_21 : f32 to vector<2x24x1xf32>
    %31 = arith.divf %29, %30 : vector<2x24x1xf32>
    %32 = vector.broadcast %24 : vector<2x24x1xf32> to vector<2x24x32xf32>
    %33 = arith.subf %10, %32 : vector<2x24x32xf32>
    %cst_22 = arith.constant 9.99999997E-7 : f32
    %34 = vector.broadcast %cst_22 : f32 to vector<2x24x1xf32>
    %35 = arith.addf %31, %34 : vector<2x24x1xf32>
    %36 = math.rsqrt %35 : vector<2x24x1xf32>
    %37 = vector.broadcast %36 : vector<2x24x1xf32> to vector<2x24x32xf32>
    %38 = arith.mulf %33, %37 : vector<2x24x32xf32>
    %39 = vector.shape_cast %18 : vector<1x32xf32> to vector<1x1x32xf32>
    %40 = vector.broadcast %39 : vector<1x1x32xf32> to vector<2x24x32xf32>
    %41 = arith.mulf %38, %40 : vector<2x24x32xf32>
    %42 = vector.shape_cast %20 : vector<1x32xf32> to vector<1x1x32xf32>
    %43 = vector.broadcast %42 : vector<1x1x32xf32> to vector<2x24x32xf32>
    %44 = arith.addf %41, %43 : vector<2x24x32xf32>
    %45 = vector.shape_cast %44 : vector<2x24x32xf32> to vector<48x32xf32>
    %c0_23 = arith.constant 0 : index
    %c0_24 = arith.constant 0 : index
    %c0_25 = arith.constant 0 : index
    %c0_26 = arith.constant 0 : index
    %46 = vector.load %arg8[%c0_23, %c0_24, %c0_25, %c0_26] : memref<1x2x32x96xf32, #tpu.memory_space<vmem>>, vector<1x1x32x96xf32>
    %47 = vector.shape_cast %46 : vector<1x1x32x96xf32> to vector<32x96xf32>
    %cst_27 = arith.constant dense<0.000000e+00> : vector<48x96xf32>
    %48 = tpu.matmul %45, %47, %cst_27 {dimension_numbers = #tpu.dot_dimension_numbers<[1], [0], [0], [1], [0, 0, 1, 1], [], []>} : vector<48x32xf32>, vector<32x96xf32>, vector<48x96xf32> -> vector<48x96xf32>
    %c0_28 = arith.constant 0 : index
    %c0_29 = arith.constant 0 : index
    %c0_30 = arith.constant 0 : index
    %c0_31 = arith.constant 0 : index
    %49 = vector.load %arg9[%c0_28, %c0_29, %c0_30, %c0_31] : memref<1x2x1x96xf32, #tpu.memory_space<vmem>>, vector<1x1x1x96xf32>
    %50 = vector.shape_cast %49 : vector<1x1x1x96xf32> to vector<1x96xf32>
    %51 = vector.broadcast %50 : vector<1x96xf32> to vector<48x96xf32>
    %52 = arith.addf %48, %51 : vector<48x96xf32>
    %53 = vector.shape_cast %52 : vector<48x96xf32> to vector<2x24x96xf32>
    %54 = vector.extract_strided_slice %53 {offsets = [0, 0, 0], sizes = [2, 24, 8], strides = [1, 1, 1]} : vector<2x24x96xf32> to vector<2x24x8xf32>
    %55 = vector.extract_strided_slice %53 {offsets = [0, 0, 32], sizes = [2, 24, 8], strides = [1, 1, 1]} : vector<2x24x96xf32> to vector<2x24x8xf32>
    %56 = vector.extract_strided_slice %53 {offsets = [0, 0, 64], sizes = [2, 24, 8], strides = [1, 1, 1]} : vector<2x24x96xf32> to vector<2x24x8xf32>
    "tpu.trace_start"() <{level = 10 : i32, message = "bqd,bkd->bqk"}> : () -> ()
    %cst_32 = arith.constant dense<0.000000e+00> : vector<2x24x24xf32>
    %57 = tpu.matmul %54, %55, %cst_32 {dimension_numbers = #tpu.dot_dimension_numbers<[2], [2], [1], [1], [0, 0, 0, 1, 1, 1], [0], [0]>} : vector<2x24x8xf32>, vector<2x24x8xf32>, vector<2x24x24xf32> -> vector<2x24x24xf32>
    "tpu.trace_stop"() : () -> ()
    %cst_33 = arith.constant 0.353553385 : f32
    %58 = vector.broadcast %cst_33 : f32 to vector<2x24x24xf32>
    %59 = arith.mulf %57, %58 : vector<2x24x24xf32>
    %60 = vector.broadcast %16 : vector<1x1x24xf32> to vector<2x24x24xf32>
    %61 = arith.addf %59, %60 : vector<2x24x24xf32>
    %cst_34 = arith.constant dense<0xFF800000> : vector<2x24xf32>
    %62 = vector.multi_reduction <maximumf>, %61, %cst_34 [2] : vector<2x24x24xf32> to vector<2x24xf32>
    %63 = vector.shape_cast %62 : vector<2x24xf32> to vector<2x24x1xf32>
    %64 = vector.broadcast %63 : vector<2x24x1xf32> to vector<2x24x24xf32>
    %65 = arith.subf %61, %64 : vector<2x24x24xf32>
    %66 = math.exp %65 : vector<2x24x24xf32>
    %cst_35 = arith.constant dense<0.000000e+00> : vector<2x24xf32>
    %67 = vector.multi_reduction <add>, %66, %cst_35 [2] : vector<2x24x24xf32> to vector<2x24xf32>
    %68 = vector.shape_cast %67 : vector<2x24xf32> to vector<2x24x1xf32>
    %69 = tpu.reciprocal %68 {approx = true} : vector<2x24x1xf32> -> vector<2x24x1xf32>
    %70 = vector.broadcast %69 : vector<2x24x1xf32> to vector<2x24x24xf32>
    %71 = arith.mulf %66, %70 : vector<2x24x24xf32>
    "tpu.trace_start"() <{level = 10 : i32, message = "bqk,bkd->bqd"}> : () -> ()
    %cst_36 = arith.constant dense<0.000000e+00> : vector<2x24x8xf32>
    %72 = tpu.matmul %71, %56, %cst_36 {dimension_numbers = #tpu.dot_dimension_numbers<[2], [1], [1], [2], [0, 0, 0, 1, 1, 2], [0], [0]>} : vector<2x24x24xf32>, vector<2x24x8xf32>, vector<2x24x8xf32> -> vector<2x24x8xf32>
    "tpu.trace_stop"() : () -> ()
    %73 = vector.extract_strided_slice %53 {offsets = [0, 0, 8], sizes = [2, 24, 8], strides = [1, 1, 1]} : vector<2x24x96xf32> to vector<2x24x8xf32>
    %74 = vector.extract_strided_slice %53 {offsets = [0, 0, 40], sizes = [2, 24, 8], strides = [1, 1, 1]} : vector<2x24x96xf32> to vector<2x24x8xf32>
    %75 = vector.extract_strided_slice %53 {offsets = [0, 0, 72], sizes = [2, 24, 8], strides = [1, 1, 1]} : vector<2x24x96xf32> to vector<2x24x8xf32>
    "tpu.trace_start"() <{level = 10 : i32, message = "bqd,bkd->bqk"}> : () -> ()
    %cst_37 = arith.constant dense<0.000000e+00> : vector<2x24x24xf32>
    %76 = tpu.matmul %73, %74, %cst_37 {dimension_numbers = #tpu.dot_dimension_numbers<[2], [2], [1], [1], [0, 0, 0, 1, 1, 1], [0], [0]>} : vector<2x24x8xf32>, vector<2x24x8xf32>, vector<2x24x24xf32> -> vector<2x24x24xf32>
    "tpu.trace_stop"() : () -> ()
    %cst_38 = arith.constant 0.353553385 : f32
    %77 = vector.broadcast %cst_38 : f32 to vector<2x24x24xf32>
    %78 = arith.mulf %76, %77 : vector<2x24x24xf32>
    %79 = vector.broadcast %16 : vector<1x1x24xf32> to vector<2x24x24xf32>
    %80 = arith.addf %78, %79 : vector<2x24x24xf32>
    %cst_39 = arith.constant dense<0xFF800000> : vector<2x24xf32>
    %81 = vector.multi_reduction <maximumf>, %80, %cst_39 [2] : vector<2x24x24xf32> to vector<2x24xf32>
    %82 = vector.shape_cast %81 : vector<2x24xf32> to vector<2x24x1xf32>
    %83 = vector.broadcast %82 : vector<2x24x1xf32> to vector<2x24x24xf32>
    %84 = arith.subf %80, %83 : vector<2x24x24xf32>
    %85 = math.exp %84 : vector<2x24x24xf32>
    %cst_40 = arith.constant dense<0.000000e+00> : vector<2x24xf32>
    %86 = vector.multi_reduction <add>, %85, %cst_40 [2] : vector<2x24x24xf32> to vector<2x24xf32>
    %87 = vector.shape_cast %86 : vector<2x24xf32> to vector<2x24x1xf32>
    %88 = tpu.reciprocal %87 {approx = true} : vector<2x24x1xf32> -> vector<2x24x1xf32>
    %89 = vector.broadcast %88 : vector<2x24x1xf32> to vector<2x24x24xf32>
    %90 = arith.mulf %85, %89 : vector<2x24x24xf32>
    "tpu.trace_start"() <{level = 10 : i32, message = "bqk,bkd->bqd"}> : () -> ()
    %cst_41 = arith.constant dense<0.000000e+00> : vector<2x24x8xf32>
    %91 = tpu.matmul %90, %75, %cst_41 {dimension_numbers = #tpu.dot_dimension_numbers<[2], [1], [1], [2], [0, 0, 0, 1, 1, 2], [0], [0]>} : vector<2x24x24xf32>, vector<2x24x8xf32>, vector<2x24x8xf32> -> vector<2x24x8xf32>
    "tpu.trace_stop"() : () -> ()
    %92 = vector.extract_strided_slice %53 {offsets = [0, 0, 16], sizes = [2, 24, 8], strides = [1, 1, 1]} : vector<2x24x96xf32> to vector<2x24x8xf32>
    %93 = vector.extract_strided_slice %53 {offsets = [0, 0, 48], sizes = [2, 24, 8], strides = [1, 1, 1]} : vector<2x24x96xf32> to vector<2x24x8xf32>
    %94 = vector.extract_strided_slice %53 {offsets = [0, 0, 80], sizes = [2, 24, 8], strides = [1, 1, 1]} : vector<2x24x96xf32> to vector<2x24x8xf32>
    "tpu.trace_start"() <{level = 10 : i32, message = "bqd,bkd->bqk"}> : () -> ()
    %cst_42 = arith.constant dense<0.000000e+00> : vector<2x24x24xf32>
    %95 = tpu.matmul %92, %93, %cst_42 {dimension_numbers = #tpu.dot_dimension_numbers<[2], [2], [1], [1], [0, 0, 0, 1, 1, 1], [0], [0]>} : vector<2x24x8xf32>, vector<2x24x8xf32>, vector<2x24x24xf32> -> vector<2x24x24xf32>
    "tpu.trace_stop"() : () -> ()
    %cst_43 = arith.constant 0.353553385 : f32
    %96 = vector.broadcast %cst_43 : f32 to vector<2x24x24xf32>
    %97 = arith.mulf %95, %96 : vector<2x24x24xf32>
    %98 = vector.broadcast %16 : vector<1x1x24xf32> to vector<2x24x24xf32>
    %99 = arith.addf %97, %98 : vector<2x24x24xf32>
    %cst_44 = arith.constant dense<0xFF800000> : vector<2x24xf32>
    %100 = vector.multi_reduction <maximumf>, %99, %cst_44 [2] : vector<2x24x24xf32> to vector<2x24xf32>
    %101 = vector.shape_cast %100 : vector<2x24xf32> to vector<2x24x1xf32>
    %102 = vector.broadcast %101 : vector<2x24x1xf32> to vector<2x24x24xf32>
    %103 = arith.subf %99, %102 : vector<2x24x24xf32>
    %104 = math.exp %103 : vector<2x24x24xf32>
    %cst_45 = arith.constant dense<0.000000e+00> : vector<2x24xf32>
    %105 = vector.multi_reduction <add>, %104, %cst_45 [2] : vector<2x24x24xf32> to vector<2x24xf32>
    %106 = vector.shape_cast %105 : vector<2x24xf32> to vector<2x24x1xf32>
    %107 = tpu.reciprocal %106 {approx = true} : vector<2x24x1xf32> -> vector<2x24x1xf32>
    %108 = vector.broadcast %107 : vector<2x24x1xf32> to vector<2x24x24xf32>
    %109 = arith.mulf %104, %108 : vector<2x24x24xf32>
    "tpu.trace_start"() <{level = 10 : i32, message = "bqk,bkd->bqd"}> : () -> ()
    %cst_46 = arith.constant dense<0.000000e+00> : vector<2x24x8xf32>
    %110 = tpu.matmul %109, %94, %cst_46 {dimension_numbers = #tpu.dot_dimension_numbers<[2], [1], [1], [2], [0, 0, 0, 1, 1, 2], [0], [0]>} : vector<2x24x24xf32>, vector<2x24x8xf32>, vector<2x24x8xf32> -> vector<2x24x8xf32>
    "tpu.trace_stop"() : () -> ()
    %111 = vector.extract_strided_slice %53 {offsets = [0, 0, 24], sizes = [2, 24, 8], strides = [1, 1, 1]} : vector<2x24x96xf32> to vector<2x24x8xf32>
    %112 = vector.extract_strided_slice %53 {offsets = [0, 0, 56], sizes = [2, 24, 8], strides = [1, 1, 1]} : vector<2x24x96xf32> to vector<2x24x8xf32>
    %113 = vector.extract_strided_slice %53 {offsets = [0, 0, 88], sizes = [2, 24, 8], strides = [1, 1, 1]} : vector<2x24x96xf32> to vector<2x24x8xf32>
    "tpu.trace_start"() <{level = 10 : i32, message = "bqd,bkd->bqk"}> : () -> ()
    %cst_47 = arith.constant dense<0.000000e+00> : vector<2x24x24xf32>
    %114 = tpu.matmul %111, %112, %cst_47 {dimension_numbers = #tpu.dot_dimension_numbers<[2], [2], [1], [1], [0, 0, 0, 1, 1, 1], [0], [0]>} : vector<2x24x8xf32>, vector<2x24x8xf32>, vector<2x24x24xf32> -> vector<2x24x24xf32>
    "tpu.trace_stop"() : () -> ()
    %cst_48 = arith.constant 0.353553385 : f32
    %115 = vector.broadcast %cst_48 : f32 to vector<2x24x24xf32>
    %116 = arith.mulf %114, %115 : vector<2x24x24xf32>
    %117 = vector.broadcast %16 : vector<1x1x24xf32> to vector<2x24x24xf32>
    %118 = arith.addf %116, %117 : vector<2x24x24xf32>
    %cst_49 = arith.constant dense<0xFF800000> : vector<2x24xf32>
    %119 = vector.multi_reduction <maximumf>, %118, %cst_49 [2] : vector<2x24x24xf32> to vector<2x24xf32>
    %120 = vector.shape_cast %119 : vector<2x24xf32> to vector<2x24x1xf32>
    %121 = vector.broadcast %120 : vector<2x24x1xf32> to vector<2x24x24xf32>
    %122 = arith.subf %118, %121 : vector<2x24x24xf32>
    %123 = math.exp %122 : vector<2x24x24xf32>
    %cst_50 = arith.constant dense<0.000000e+00> : vector<2x24xf32>
    %124 = vector.multi_reduction <add>, %123, %cst_50 [2] : vector<2x24x24xf32> to vector<2x24xf32>
    %125 = vector.shape_cast %124 : vector<2x24xf32> to vector<2x24x1xf32>
    %126 = tpu.reciprocal %125 {approx = true} : vector<2x24x1xf32> -> vector<2x24x1xf32>
    %127 = vector.broadcast %126 : vector<2x24x1xf32> to vector<2x24x24xf32>
    %128 = arith.mulf %123, %127 : vector<2x24x24xf32>
    "tpu.trace_start"() <{level = 10 : i32, message = "bqk,bkd->bqd"}> : () -> ()
    %cst_51 = arith.constant dense<0.000000e+00> : vector<2x24x8xf32>
    %129 = tpu.matmul %128, %113, %cst_51 {dimension_numbers = #tpu.dot_dimension_numbers<[2], [1], [1], [2], [0, 0, 0, 1, 1, 2], [0], [0]>} : vector<2x24x24xf32>, vector<2x24x8xf32>, vector<2x24x8xf32> -> vector<2x24x8xf32>
    "tpu.trace_stop"() : () -> ()
    %130 = tpu.concatenate %72, %91, %110, %129 in 2 : vector<2x24x8xf32>, vector<2x24x8xf32>, vector<2x24x8xf32>, vector<2x24x8xf32> -> vector<2x24x32xf32>
    %131 = vector.shape_cast %130 : vector<2x24x32xf32> to vector<48x32xf32>
    %c0_52 = arith.constant 0 : index
    %c0_53 = arith.constant 0 : index
    %c0_54 = arith.constant 0 : index
    %c0_55 = arith.constant 0 : index
    %132 = vector.load %arg10[%c0_52, %c0_53, %c0_54, %c0_55] : memref<1x2x32x32xf32, #tpu.memory_space<vmem>>, vector<1x1x32x32xf32>
    %133 = vector.shape_cast %132 : vector<1x1x32x32xf32> to vector<32x32xf32>
    %cst_56 = arith.constant dense<0.000000e+00> : vector<48x32xf32>
    %134 = tpu.matmul %131, %133, %cst_56 {dimension_numbers = #tpu.dot_dimension_numbers<[1], [0], [0], [1], [0, 0, 1, 1], [], []>} : vector<48x32xf32>, vector<32x32xf32>, vector<48x32xf32> -> vector<48x32xf32>
    %c0_57 = arith.constant 0 : index
    %c0_58 = arith.constant 0 : index
    %c0_59 = arith.constant 0 : index
    %c0_60 = arith.constant 0 : index
    %135 = vector.load %arg11[%c0_57, %c0_58, %c0_59, %c0_60] : memref<1x2x1x32xf32, #tpu.memory_space<vmem>>, vector<1x1x1x32xf32>
    %136 = vector.shape_cast %135 : vector<1x1x1x32xf32> to vector<1x32xf32>
    %137 = vector.broadcast %136 : vector<1x32xf32> to vector<48x32xf32>
    %138 = arith.addf %134, %137 : vector<48x32xf32>
    %139 = vector.shape_cast %138 : vector<48x32xf32> to vector<2x24x32xf32>
    %140 = arith.addf %10, %139 : vector<2x24x32xf32>
    %c0_61 = arith.constant 0 : index
    %c0_62 = arith.constant 0 : index
    %c0_63 = arith.constant 0 : index
    %c0_64 = arith.constant 0 : index
    %141 = vector.load %arg12[%c0_61, %c0_62, %c0_63, %c0_64] : memref<1x2x1x32xf32, #tpu.memory_space<vmem>>, vector<1x1x1x32xf32>
    %142 = vector.shape_cast %141 : vector<1x1x1x32xf32> to vector<1x32xf32>
    %c0_65 = arith.constant 0 : index
    %c0_66 = arith.constant 0 : index
    %c0_67 = arith.constant 0 : index
    %c0_68 = arith.constant 0 : index
    %143 = vector.load %arg13[%c0_65, %c0_66, %c0_67, %c0_68] : memref<1x2x1x32xf32, #tpu.memory_space<vmem>>, vector<1x1x1x32xf32>
    %144 = vector.shape_cast %143 : vector<1x1x1x32xf32> to vector<1x32xf32>
    %cst_69 = arith.constant dense<0.000000e+00> : vector<2x24xf32>
    %145 = vector.multi_reduction <add>, %140, %cst_69 [2] : vector<2x24x32xf32> to vector<2x24xf32>
    %146 = vector.shape_cast %145 : vector<2x24xf32> to vector<2x24x1xf32>
    %cst_70 = arith.constant 3.200000e+01 : f32
    %147 = vector.broadcast %cst_70 : f32 to vector<2x24x1xf32>
    %148 = arith.divf %146, %147 : vector<2x24x1xf32>
    %149 = vector.broadcast %148 : vector<2x24x1xf32> to vector<2x24x32xf32>
    %150 = arith.subf %140, %149 : vector<2x24x32xf32>
    %151 = arith.mulf %150, %150 : vector<2x24x32xf32>
    %cst_71 = arith.constant dense<0.000000e+00> : vector<2x24xf32>
    %152 = vector.multi_reduction <add>, %151, %cst_71 [2] : vector<2x24x32xf32> to vector<2x24xf32>
    %153 = vector.shape_cast %152 : vector<2x24xf32> to vector<2x24x1xf32>
    %cst_72 = arith.constant 3.200000e+01 : f32
    %154 = vector.broadcast %cst_72 : f32 to vector<2x24x1xf32>
    %155 = arith.divf %153, %154 : vector<2x24x1xf32>
    %156 = vector.broadcast %148 : vector<2x24x1xf32> to vector<2x24x32xf32>
    %157 = arith.subf %140, %156 : vector<2x24x32xf32>
    %cst_73 = arith.constant 9.99999997E-7 : f32
    %158 = vector.broadcast %cst_73 : f32 to vector<2x24x1xf32>
    %159 = arith.addf %155, %158 : vector<2x24x1xf32>
    %160 = math.rsqrt %159 : vector<2x24x1xf32>
    %161 = vector.broadcast %160 : vector<2x24x1xf32> to vector<2x24x32xf32>
    %162 = arith.mulf %157, %161 : vector<2x24x32xf32>
    %163 = vector.shape_cast %142 : vector<1x32xf32> to vector<1x1x32xf32>
    %164 = vector.broadcast %163 : vector<1x1x32xf32> to vector<2x24x32xf32>
    %165 = arith.mulf %162, %164 : vector<2x24x32xf32>
    %166 = vector.shape_cast %144 : vector<1x32xf32> to vector<1x1x32xf32>
    %167 = vector.broadcast %166 : vector<1x1x32xf32> to vector<2x24x32xf32>
    %168 = arith.addf %165, %167 : vector<2x24x32xf32>
    %169 = vector.shape_cast %168 : vector<2x24x32xf32> to vector<48x32xf32>
    %c0_74 = arith.constant 0 : index
    %c0_75 = arith.constant 0 : index
    %c0_76 = arith.constant 0 : index
    %c0_77 = arith.constant 0 : index
    %170 = vector.load %arg14[%c0_74, %c0_75, %c0_76, %c0_77] : memref<1x2x32x128xf32, #tpu.memory_space<vmem>>, vector<1x1x32x128xf32>
    %171 = vector.shape_cast %170 : vector<1x1x32x128xf32> to vector<32x128xf32>
    %cst_78 = arith.constant dense<0.000000e+00> : vector<48x128xf32>
    %172 = tpu.matmul %169, %171, %cst_78 {dimension_numbers = #tpu.dot_dimension_numbers<[1], [0], [0], [1], [0, 0, 1, 1], [], []>} : vector<48x32xf32>, vector<32x128xf32>, vector<48x128xf32> -> vector<48x128xf32>
    %c0_79 = arith.constant 0 : index
    %c0_80 = arith.constant 0 : index
    %c0_81 = arith.constant 0 : index
    %c0_82 = arith.constant 0 : index
    %173 = vector.load %arg15[%c0_79, %c0_80, %c0_81, %c0_82] : memref<1x2x1x128xf32, #tpu.memory_space<vmem>>, vector<1x1x1x128xf32>
    %174 = vector.shape_cast %173 : vector<1x1x1x128xf32> to vector<1x128xf32>
    %175 = vector.broadcast %174 : vector<1x128xf32> to vector<48x128xf32>
    %176 = arith.addf %172, %175 : vector<48x128xf32>
    %cst_83 = arith.constant 5.000000e-01 : f32
    %177 = vector.broadcast %cst_83 : f32 to vector<48x128xf32>
    %178 = arith.mulf %177, %176 : vector<48x128xf32>
    %cst_84 = arith.constant 4.471500e-02 : f32
    %179 = vector.broadcast %cst_84 : f32 to vector<48x128xf32>
    %180 = arith.mulf %179, %176 : vector<48x128xf32>
    %181 = arith.mulf %180, %176 : vector<48x128xf32>
    %182 = arith.mulf %181, %176 : vector<48x128xf32>
    %183 = arith.addf %176, %182 : vector<48x128xf32>
    %cst_85 = arith.constant 0.797884583 : f32
    %184 = vector.broadcast %cst_85 : f32 to vector<48x128xf32>
    %185 = arith.mulf %184, %183 : vector<48x128xf32>
    %186 = math.tanh %185 : vector<48x128xf32>
    %cst_86 = arith.constant 1.000000e+00 : f32
    %187 = vector.broadcast %cst_86 : f32 to vector<48x128xf32>
    %188 = arith.addf %187, %186 : vector<48x128xf32>
    %189 = arith.mulf %178, %188 : vector<48x128xf32>
    %c0_87 = arith.constant 0 : index
    %c0_88 = arith.constant 0 : index
    %c0_89 = arith.constant 0 : index
    %c0_90 = arith.constant 0 : index
    %190 = vector.load %arg16[%c0_87, %c0_88, %c0_89, %c0_90] : memref<1x2x128x32xf32, #tpu.memory_space<vmem>>, vector<1x1x128x32xf32>
    %191 = vector.shape_cast %190 : vector<1x1x128x32xf32> to vector<128x32xf32>
    %cst_91 = arith.constant dense<0.000000e+00> : vector<48x32xf32>
    %192 = tpu.matmul %189, %191, %cst_91 {dimension_numbers = #tpu.dot_dimension_numbers<[1], [0], [0], [1], [0, 0, 1, 1], [], []>} : vector<48x128xf32>, vector<128x32xf32>, vector<48x32xf32> -> vector<48x32xf32>
    %c0_92 = arith.constant 0 : index
    %c0_93 = arith.constant 0 : index
    %c0_94 = arith.constant 0 : index
    %c0_95 = arith.constant 0 : index
    %193 = vector.load %arg17[%c0_92, %c0_93, %c0_94, %c0_95] : memref<1x2x1x32xf32, #tpu.memory_space<vmem>>, vector<1x1x1x32xf32>
    %194 = vector.shape_cast %193 : vector<1x1x1x32xf32> to vector<1x32xf32>
    %195 = vector.broadcast %194 : vector<1x32xf32> to vector<48x32xf32>
    %196 = arith.addf %192, %195 : vector<48x32xf32>
    %197 = vector.shape_cast %196 : vector<48x32xf32> to vector<2x24x32xf32>
    %198 = arith.addf %140, %197 : vector<2x24x32xf32>
    %c0_96 = arith.constant 0 : index
    %c1 = arith.constant 1 : index
    %c0_97 = arith.constant 0 : index
    %c0_98 = arith.constant 0 : index
    %199 = vector.load %arg6[%c0_96, %c1, %c0_97, %c0_98] : memref<1x2x1x32xf32, #tpu.memory_space<vmem>>, vector<1x1x1x32xf32>
    %200 = vector.shape_cast %199 : vector<1x1x1x32xf32> to vector<1x32xf32>
    %c0_99 = arith.constant 0 : index
    %c1_100 = arith.constant 1 : index
    %c0_101 = arith.constant 0 : index
    %c0_102 = arith.constant 0 : index
    %201 = vector.load %arg7[%c0_99, %c1_100, %c0_101, %c0_102] : memref<1x2x1x32xf32, #tpu.memory_space<vmem>>, vector<1x1x1x32xf32>
    %202 = vector.shape_cast %201 : vector<1x1x1x32xf32> to vector<1x32xf32>
    %cst_103 = arith.constant dense<0.000000e+00> : vector<2x24xf32>
    %203 = vector.multi_reduction <add>, %198, %cst_103 [2] : vector<2x24x32xf32> to vector<2x24xf32>
    %204 = vector.shape_cast %203 : vector<2x24xf32> to vector<2x24x1xf32>
    %cst_104 = arith.constant 3.200000e+01 : f32
    %205 = vector.broadcast %cst_104 : f32 to vector<2x24x1xf32>
    %206 = arith.divf %204, %205 : vector<2x24x1xf32>
    %207 = vector.broadcast %206 : vector<2x24x1xf32> to vector<2x24x32xf32>
    %208 = arith.subf %198, %207 : vector<2x24x32xf32>
    %209 = arith.mulf %208, %208 : vector<2x24x32xf32>
    %cst_105 = arith.constant dense<0.000000e+00> : vector<2x24xf32>
    %210 = vector.multi_reduction <add>, %209, %cst_105 [2] : vector<2x24x32xf32> to vector<2x24xf32>
    %211 = vector.shape_cast %210 : vector<2x24xf32> to vector<2x24x1xf32>
    %cst_106 = arith.constant 3.200000e+01 : f32
    %212 = vector.broadcast %cst_106 : f32 to vector<2x24x1xf32>
    %213 = arith.divf %211, %212 : vector<2x24x1xf32>
    %214 = vector.broadcast %206 : vector<2x24x1xf32> to vector<2x24x32xf32>
    %215 = arith.subf %198, %214 : vector<2x24x32xf32>
    %cst_107 = arith.constant 9.99999997E-7 : f32
    %216 = vector.broadcast %cst_107 : f32 to vector<2x24x1xf32>
    %217 = arith.addf %213, %216 : vector<2x24x1xf32>
    %218 = math.rsqrt %217 : vector<2x24x1xf32>
    %219 = vector.broadcast %218 : vector<2x24x1xf32> to vector<2x24x32xf32>
    %220 = arith.mulf %215, %219 : vector<2x24x32xf32>
    %221 = vector.shape_cast %200 : vector<1x32xf32> to vector<1x1x32xf32>
    %222 = vector.broadcast %221 : vector<1x1x32xf32> to vector<2x24x32xf32>
    %223 = arith.mulf %220, %222 : vector<2x24x32xf32>
    %224 = vector.shape_cast %202 : vector<1x32xf32> to vector<1x1x32xf32>
    %225 = vector.broadcast %224 : vector<1x1x32xf32> to vector<2x24x32xf32>
    %226 = arith.addf %223, %225 : vector<2x24x32xf32>
    %227 = vector.shape_cast %226 : vector<2x24x32xf32> to vector<48x32xf32>
    %c0_108 = arith.constant 0 : index
    %c1_109 = arith.constant 1 : index
    %c0_110 = arith.constant 0 : index
    %c0_111 = arith.constant 0 : index
    %228 = vector.load %arg8[%c0_108, %c1_109, %c0_110, %c0_111] : memref<1x2x32x96xf32, #tpu.memory_space<vmem>>, vector<1x1x32x96xf32>
    %229 = vector.shape_cast %228 : vector<1x1x32x96xf32> to vector<32x96xf32>
    %cst_112 = arith.constant dense<0.000000e+00> : vector<48x96xf32>
    %230 = tpu.matmul %227, %229, %cst_112 {dimension_numbers = #tpu.dot_dimension_numbers<[1], [0], [0], [1], [0, 0, 1, 1], [], []>} : vector<48x32xf32>, vector<32x96xf32>, vector<48x96xf32> -> vector<48x96xf32>
    %c0_113 = arith.constant 0 : index
    %c1_114 = arith.constant 1 : index
    %c0_115 = arith.constant 0 : index
    %c0_116 = arith.constant 0 : index
    %231 = vector.load %arg9[%c0_113, %c1_114, %c0_115, %c0_116] : memref<1x2x1x96xf32, #tpu.memory_space<vmem>>, vector<1x1x1x96xf32>
    %232 = vector.shape_cast %231 : vector<1x1x1x96xf32> to vector<1x96xf32>
    %233 = vector.broadcast %232 : vector<1x96xf32> to vector<48x96xf32>
    %234 = arith.addf %230, %233 : vector<48x96xf32>
    %235 = vector.shape_cast %234 : vector<48x96xf32> to vector<2x24x96xf32>
    %236 = vector.extract_strided_slice %235 {offsets = [0, 0, 0], sizes = [2, 24, 8], strides = [1, 1, 1]} : vector<2x24x96xf32> to vector<2x24x8xf32>
    %237 = vector.extract_strided_slice %235 {offsets = [0, 0, 32], sizes = [2, 24, 8], strides = [1, 1, 1]} : vector<2x24x96xf32> to vector<2x24x8xf32>
    %238 = vector.extract_strided_slice %235 {offsets = [0, 0, 64], sizes = [2, 24, 8], strides = [1, 1, 1]} : vector<2x24x96xf32> to vector<2x24x8xf32>
    "tpu.trace_start"() <{level = 10 : i32, message = "bqd,bkd->bqk"}> : () -> ()
    %cst_117 = arith.constant dense<0.000000e+00> : vector<2x24x24xf32>
    %239 = tpu.matmul %236, %237, %cst_117 {dimension_numbers = #tpu.dot_dimension_numbers<[2], [2], [1], [1], [0, 0, 0, 1, 1, 1], [0], [0]>} : vector<2x24x8xf32>, vector<2x24x8xf32>, vector<2x24x24xf32> -> vector<2x24x24xf32>
    "tpu.trace_stop"() : () -> ()
    %cst_118 = arith.constant 0.353553385 : f32
    %240 = vector.broadcast %cst_118 : f32 to vector<2x24x24xf32>
    %241 = arith.mulf %239, %240 : vector<2x24x24xf32>
    %242 = vector.broadcast %16 : vector<1x1x24xf32> to vector<2x24x24xf32>
    %243 = arith.addf %241, %242 : vector<2x24x24xf32>
    %cst_119 = arith.constant dense<0xFF800000> : vector<2x24xf32>
    %244 = vector.multi_reduction <maximumf>, %243, %cst_119 [2] : vector<2x24x24xf32> to vector<2x24xf32>
    %245 = vector.shape_cast %244 : vector<2x24xf32> to vector<2x24x1xf32>
    %246 = vector.broadcast %245 : vector<2x24x1xf32> to vector<2x24x24xf32>
    %247 = arith.subf %243, %246 : vector<2x24x24xf32>
    %248 = math.exp %247 : vector<2x24x24xf32>
    %cst_120 = arith.constant dense<0.000000e+00> : vector<2x24xf32>
    %249 = vector.multi_reduction <add>, %248, %cst_120 [2] : vector<2x24x24xf32> to vector<2x24xf32>
    %250 = vector.shape_cast %249 : vector<2x24xf32> to vector<2x24x1xf32>
    %251 = tpu.reciprocal %250 {approx = true} : vector<2x24x1xf32> -> vector<2x24x1xf32>
    %252 = vector.broadcast %251 : vector<2x24x1xf32> to vector<2x24x24xf32>
    %253 = arith.mulf %248, %252 : vector<2x24x24xf32>
    "tpu.trace_start"() <{level = 10 : i32, message = "bqk,bkd->bqd"}> : () -> ()
    %cst_121 = arith.constant dense<0.000000e+00> : vector<2x24x8xf32>
    %254 = tpu.matmul %253, %238, %cst_121 {dimension_numbers = #tpu.dot_dimension_numbers<[2], [1], [1], [2], [0, 0, 0, 1, 1, 2], [0], [0]>} : vector<2x24x24xf32>, vector<2x24x8xf32>, vector<2x24x8xf32> -> vector<2x24x8xf32>
    "tpu.trace_stop"() : () -> ()
    %255 = vector.extract_strided_slice %235 {offsets = [0, 0, 8], sizes = [2, 24, 8], strides = [1, 1, 1]} : vector<2x24x96xf32> to vector<2x24x8xf32>
    %256 = vector.extract_strided_slice %235 {offsets = [0, 0, 40], sizes = [2, 24, 8], strides = [1, 1, 1]} : vector<2x24x96xf32> to vector<2x24x8xf32>
    %257 = vector.extract_strided_slice %235 {offsets = [0, 0, 72], sizes = [2, 24, 8], strides = [1, 1, 1]} : vector<2x24x96xf32> to vector<2x24x8xf32>
    "tpu.trace_start"() <{level = 10 : i32, message = "bqd,bkd->bqk"}> : () -> ()
    %cst_122 = arith.constant dense<0.000000e+00> : vector<2x24x24xf32>
    %258 = tpu.matmul %255, %256, %cst_122 {dimension_numbers = #tpu.dot_dimension_numbers<[2], [2], [1], [1], [0, 0, 0, 1, 1, 1], [0], [0]>} : vector<2x24x8xf32>, vector<2x24x8xf32>, vector<2x24x24xf32> -> vector<2x24x24xf32>
    "tpu.trace_stop"() : () -> ()
    %cst_123 = arith.constant 0.353553385 : f32
    %259 = vector.broadcast %cst_123 : f32 to vector<2x24x24xf32>
    %260 = arith.mulf %258, %259 : vector<2x24x24xf32>
    %261 = vector.broadcast %16 : vector<1x1x24xf32> to vector<2x24x24xf32>
    %262 = arith.addf %260, %261 : vector<2x24x24xf32>
    %cst_124 = arith.constant dense<0xFF800000> : vector<2x24xf32>
    %263 = vector.multi_reduction <maximumf>, %262, %cst_124 [2] : vector<2x24x24xf32> to vector<2x24xf32>
    %264 = vector.shape_cast %263 : vector<2x24xf32> to vector<2x24x1xf32>
    %265 = vector.broadcast %264 : vector<2x24x1xf32> to vector<2x24x24xf32>
    %266 = arith.subf %262, %265 : vector<2x24x24xf32>
    %267 = math.exp %266 : vector<2x24x24xf32>
    %cst_125 = arith.constant dense<0.000000e+00> : vector<2x24xf32>
    %268 = vector.multi_reduction <add>, %267, %cst_125 [2] : vector<2x24x24xf32> to vector<2x24xf32>
    %269 = vector.shape_cast %268 : vector<2x24xf32> to vector<2x24x1xf32>
    %270 = tpu.reciprocal %269 {approx = true} : vector<2x24x1xf32> -> vector<2x24x1xf32>
    %271 = vector.broadcast %270 : vector<2x24x1xf32> to vector<2x24x24xf32>
    %272 = arith.mulf %267, %271 : vector<2x24x24xf32>
    "tpu.trace_start"() <{level = 10 : i32, message = "bqk,bkd->bqd"}> : () -> ()
    %cst_126 = arith.constant dense<0.000000e+00> : vector<2x24x8xf32>
    %273 = tpu.matmul %272, %257, %cst_126 {dimension_numbers = #tpu.dot_dimension_numbers<[2], [1], [1], [2], [0, 0, 0, 1, 1, 2], [0], [0]>} : vector<2x24x24xf32>, vector<2x24x8xf32>, vector<2x24x8xf32> -> vector<2x24x8xf32>
    "tpu.trace_stop"() : () -> ()
    %274 = vector.extract_strided_slice %235 {offsets = [0, 0, 16], sizes = [2, 24, 8], strides = [1, 1, 1]} : vector<2x24x96xf32> to vector<2x24x8xf32>
    %275 = vector.extract_strided_slice %235 {offsets = [0, 0, 48], sizes = [2, 24, 8], strides = [1, 1, 1]} : vector<2x24x96xf32> to vector<2x24x8xf32>
    %276 = vector.extract_strided_slice %235 {offsets = [0, 0, 80], sizes = [2, 24, 8], strides = [1, 1, 1]} : vector<2x24x96xf32> to vector<2x24x8xf32>
    "tpu.trace_start"() <{level = 10 : i32, message = "bqd,bkd->bqk"}> : () -> ()
    %cst_127 = arith.constant dense<0.000000e+00> : vector<2x24x24xf32>
    %277 = tpu.matmul %274, %275, %cst_127 {dimension_numbers = #tpu.dot_dimension_numbers<[2], [2], [1], [1], [0, 0, 0, 1, 1, 1], [0], [0]>} : vector<2x24x8xf32>, vector<2x24x8xf32>, vector<2x24x24xf32> -> vector<2x24x24xf32>
    "tpu.trace_stop"() : () -> ()
    %cst_128 = arith.constant 0.353553385 : f32
    %278 = vector.broadcast %cst_128 : f32 to vector<2x24x24xf32>
    %279 = arith.mulf %277, %278 : vector<2x24x24xf32>
    %280 = vector.broadcast %16 : vector<1x1x24xf32> to vector<2x24x24xf32>
    %281 = arith.addf %279, %280 : vector<2x24x24xf32>
    %cst_129 = arith.constant dense<0xFF800000> : vector<2x24xf32>
    %282 = vector.multi_reduction <maximumf>, %281, %cst_129 [2] : vector<2x24x24xf32> to vector<2x24xf32>
    %283 = vector.shape_cast %282 : vector<2x24xf32> to vector<2x24x1xf32>
    %284 = vector.broadcast %283 : vector<2x24x1xf32> to vector<2x24x24xf32>
    %285 = arith.subf %281, %284 : vector<2x24x24xf32>
    %286 = math.exp %285 : vector<2x24x24xf32>
    %cst_130 = arith.constant dense<0.000000e+00> : vector<2x24xf32>
    %287 = vector.multi_reduction <add>, %286, %cst_130 [2] : vector<2x24x24xf32> to vector<2x24xf32>
    %288 = vector.shape_cast %287 : vector<2x24xf32> to vector<2x24x1xf32>
    %289 = tpu.reciprocal %288 {approx = true} : vector<2x24x1xf32> -> vector<2x24x1xf32>
    %290 = vector.broadcast %289 : vector<2x24x1xf32> to vector<2x24x24xf32>
    %291 = arith.mulf %286, %290 : vector<2x24x24xf32>
    "tpu.trace_start"() <{level = 10 : i32, message = "bqk,bkd->bqd"}> : () -> ()
    %cst_131 = arith.constant dense<0.000000e+00> : vector<2x24x8xf32>
    %292 = tpu.matmul %291, %276, %cst_131 {dimension_numbers = #tpu.dot_dimension_numbers<[2], [1], [1], [2], [0, 0, 0, 1, 1, 2], [0], [0]>} : vector<2x24x24xf32>, vector<2x24x8xf32>, vector<2x24x8xf32> -> vector<2x24x8xf32>
    "tpu.trace_stop"() : () -> ()
    %293 = vector.extract_strided_slice %235 {offsets = [0, 0, 24], sizes = [2, 24, 8], strides = [1, 1, 1]} : vector<2x24x96xf32> to vector<2x24x8xf32>
    %294 = vector.extract_strided_slice %235 {offsets = [0, 0, 56], sizes = [2, 24, 8], strides = [1, 1, 1]} : vector<2x24x96xf32> to vector<2x24x8xf32>
    %295 = vector.extract_strided_slice %235 {offsets = [0, 0, 88], sizes = [2, 24, 8], strides = [1, 1, 1]} : vector<2x24x96xf32> to vector<2x24x8xf32>
    "tpu.trace_start"() <{level = 10 : i32, message = "bqd,bkd->bqk"}> : () -> ()
    %cst_132 = arith.constant dense<0.000000e+00> : vector<2x24x24xf32>
    %296 = tpu.matmul %293, %294, %cst_132 {dimension_numbers = #tpu.dot_dimension_numbers<[2], [2], [1], [1], [0, 0, 0, 1, 1, 1], [0], [0]>} : vector<2x24x8xf32>, vector<2x24x8xf32>, vector<2x24x24xf32> -> vector<2x24x24xf32>
    "tpu.trace_stop"() : () -> ()
    %cst_133 = arith.constant 0.353553385 : f32
    %297 = vector.broadcast %cst_133 : f32 to vector<2x24x24xf32>
    %298 = arith.mulf %296, %297 : vector<2x24x24xf32>
    %299 = vector.broadcast %16 : vector<1x1x24xf32> to vector<2x24x24xf32>
    %300 = arith.addf %298, %299 : vector<2x24x24xf32>
    %cst_134 = arith.constant dense<0xFF800000> : vector<2x24xf32>
    %301 = vector.multi_reduction <maximumf>, %300, %cst_134 [2] : vector<2x24x24xf32> to vector<2x24xf32>
    %302 = vector.shape_cast %301 : vector<2x24xf32> to vector<2x24x1xf32>
    %303 = vector.broadcast %302 : vector<2x24x1xf32> to vector<2x24x24xf32>
    %304 = arith.subf %300, %303 : vector<2x24x24xf32>
    %305 = math.exp %304 : vector<2x24x24xf32>
    %cst_135 = arith.constant dense<0.000000e+00> : vector<2x24xf32>
    %306 = vector.multi_reduction <add>, %305, %cst_135 [2] : vector<2x24x24xf32> to vector<2x24xf32>
    %307 = vector.shape_cast %306 : vector<2x24xf32> to vector<2x24x1xf32>
    %308 = tpu.reciprocal %307 {approx = true} : vector<2x24x1xf32> -> vector<2x24x1xf32>
    %309 = vector.broadcast %308 : vector<2x24x1xf32> to vector<2x24x24xf32>
    %310 = arith.mulf %305, %309 : vector<2x24x24xf32>
    "tpu.trace_start"() <{level = 10 : i32, message = "bqk,bkd->bqd"}> : () -> ()
    %cst_136 = arith.constant dense<0.000000e+00> : vector<2x24x8xf32>
    %311 = tpu.matmul %310, %295, %cst_136 {dimension_numbers = #tpu.dot_dimension_numbers<[2], [1], [1], [2], [0, 0, 0, 1, 1, 2], [0], [0]>} : vector<2x24x24xf32>, vector<2x24x8xf32>, vector<2x24x8xf32> -> vector<2x24x8xf32>
    "tpu.trace_stop"() : () -> ()
    %312 = tpu.concatenate %254, %273, %292, %311 in 2 : vector<2x24x8xf32>, vector<2x24x8xf32>, vector<2x24x8xf32>, vector<2x24x8xf32> -> vector<2x24x32xf32>
    %313 = vector.shape_cast %312 : vector<2x24x32xf32> to vector<48x32xf32>
    %c0_137 = arith.constant 0 : index
    %c1_138 = arith.constant 1 : index
    %c0_139 = arith.constant 0 : index
    %c0_140 = arith.constant 0 : index
    %314 = vector.load %arg10[%c0_137, %c1_138, %c0_139, %c0_140] : memref<1x2x32x32xf32, #tpu.memory_space<vmem>>, vector<1x1x32x32xf32>
    %315 = vector.shape_cast %314 : vector<1x1x32x32xf32> to vector<32x32xf32>
    %cst_141 = arith.constant dense<0.000000e+00> : vector<48x32xf32>
    %316 = tpu.matmul %313, %315, %cst_141 {dimension_numbers = #tpu.dot_dimension_numbers<[1], [0], [0], [1], [0, 0, 1, 1], [], []>} : vector<48x32xf32>, vector<32x32xf32>, vector<48x32xf32> -> vector<48x32xf32>
    %c0_142 = arith.constant 0 : index
    %c1_143 = arith.constant 1 : index
    %c0_144 = arith.constant 0 : index
    %c0_145 = arith.constant 0 : index
    %317 = vector.load %arg11[%c0_142, %c1_143, %c0_144, %c0_145] : memref<1x2x1x32xf32, #tpu.memory_space<vmem>>, vector<1x1x1x32xf32>
    %318 = vector.shape_cast %317 : vector<1x1x1x32xf32> to vector<1x32xf32>
    %319 = vector.broadcast %318 : vector<1x32xf32> to vector<48x32xf32>
    %320 = arith.addf %316, %319 : vector<48x32xf32>
    %321 = vector.shape_cast %320 : vector<48x32xf32> to vector<2x24x32xf32>
    %322 = arith.addf %198, %321 : vector<2x24x32xf32>
    %c0_146 = arith.constant 0 : index
    %c1_147 = arith.constant 1 : index
    %c0_148 = arith.constant 0 : index
    %c0_149 = arith.constant 0 : index
    %323 = vector.load %arg12[%c0_146, %c1_147, %c0_148, %c0_149] : memref<1x2x1x32xf32, #tpu.memory_space<vmem>>, vector<1x1x1x32xf32>
    %324 = vector.shape_cast %323 : vector<1x1x1x32xf32> to vector<1x32xf32>
    %c0_150 = arith.constant 0 : index
    %c1_151 = arith.constant 1 : index
    %c0_152 = arith.constant 0 : index
    %c0_153 = arith.constant 0 : index
    %325 = vector.load %arg13[%c0_150, %c1_151, %c0_152, %c0_153] : memref<1x2x1x32xf32, #tpu.memory_space<vmem>>, vector<1x1x1x32xf32>
    %326 = vector.shape_cast %325 : vector<1x1x1x32xf32> to vector<1x32xf32>
    %cst_154 = arith.constant dense<0.000000e+00> : vector<2x24xf32>
    %327 = vector.multi_reduction <add>, %322, %cst_154 [2] : vector<2x24x32xf32> to vector<2x24xf32>
    %328 = vector.shape_cast %327 : vector<2x24xf32> to vector<2x24x1xf32>
    %cst_155 = arith.constant 3.200000e+01 : f32
    %329 = vector.broadcast %cst_155 : f32 to vector<2x24x1xf32>
    %330 = arith.divf %328, %329 : vector<2x24x1xf32>
    %331 = vector.broadcast %330 : vector<2x24x1xf32> to vector<2x24x32xf32>
    %332 = arith.subf %322, %331 : vector<2x24x32xf32>
    %333 = arith.mulf %332, %332 : vector<2x24x32xf32>
    %cst_156 = arith.constant dense<0.000000e+00> : vector<2x24xf32>
    %334 = vector.multi_reduction <add>, %333, %cst_156 [2] : vector<2x24x32xf32> to vector<2x24xf32>
    %335 = vector.shape_cast %334 : vector<2x24xf32> to vector<2x24x1xf32>
    %cst_157 = arith.constant 3.200000e+01 : f32
    %336 = vector.broadcast %cst_157 : f32 to vector<2x24x1xf32>
    %337 = arith.divf %335, %336 : vector<2x24x1xf32>
    %338 = vector.broadcast %330 : vector<2x24x1xf32> to vector<2x24x32xf32>
    %339 = arith.subf %322, %338 : vector<2x24x32xf32>
    %cst_158 = arith.constant 9.99999997E-7 : f32
    %340 = vector.broadcast %cst_158 : f32 to vector<2x24x1xf32>
    %341 = arith.addf %337, %340 : vector<2x24x1xf32>
    %342 = math.rsqrt %341 : vector<2x24x1xf32>
    %343 = vector.broadcast %342 : vector<2x24x1xf32> to vector<2x24x32xf32>
    %344 = arith.mulf %339, %343 : vector<2x24x32xf32>
    %345 = vector.shape_cast %324 : vector<1x32xf32> to vector<1x1x32xf32>
    %346 = vector.broadcast %345 : vector<1x1x32xf32> to vector<2x24x32xf32>
    %347 = arith.mulf %344, %346 : vector<2x24x32xf32>
    %348 = vector.shape_cast %326 : vector<1x32xf32> to vector<1x1x32xf32>
    %349 = vector.broadcast %348 : vector<1x1x32xf32> to vector<2x24x32xf32>
    %350 = arith.addf %347, %349 : vector<2x24x32xf32>
    %351 = vector.shape_cast %350 : vector<2x24x32xf32> to vector<48x32xf32>
    %c0_159 = arith.constant 0 : index
    %c1_160 = arith.constant 1 : index
    %c0_161 = arith.constant 0 : index
    %c0_162 = arith.constant 0 : index
    %352 = vector.load %arg14[%c0_159, %c1_160, %c0_161, %c0_162] : memref<1x2x32x128xf32, #tpu.memory_space<vmem>>, vector<1x1x32x128xf32>
    %353 = vector.shape_cast %352 : vector<1x1x32x128xf32> to vector<32x128xf32>
    %cst_163 = arith.constant dense<0.000000e+00> : vector<48x128xf32>
    %354 = tpu.matmul %351, %353, %cst_163 {dimension_numbers = #tpu.dot_dimension_numbers<[1], [0], [0], [1], [0, 0, 1, 1], [], []>} : vector<48x32xf32>, vector<32x128xf32>, vector<48x128xf32> -> vector<48x128xf32>
    %c0_164 = arith.constant 0 : index
    %c1_165 = arith.constant 1 : index
    %c0_166 = arith.constant 0 : index
    %c0_167 = arith.constant 0 : index
    %355 = vector.load %arg15[%c0_164, %c1_165, %c0_166, %c0_167] : memref<1x2x1x128xf32, #tpu.memory_space<vmem>>, vector<1x1x1x128xf32>
    %356 = vector.shape_cast %355 : vector<1x1x1x128xf32> to vector<1x128xf32>
    %357 = vector.broadcast %356 : vector<1x128xf32> to vector<48x128xf32>
    %358 = arith.addf %354, %357 : vector<48x128xf32>
    %cst_168 = arith.constant 5.000000e-01 : f32
    %359 = vector.broadcast %cst_168 : f32 to vector<48x128xf32>
    %360 = arith.mulf %359, %358 : vector<48x128xf32>
    %cst_169 = arith.constant 4.471500e-02 : f32
    %361 = vector.broadcast %cst_169 : f32 to vector<48x128xf32>
    %362 = arith.mulf %361, %358 : vector<48x128xf32>
    %363 = arith.mulf %362, %358 : vector<48x128xf32>
    %364 = arith.mulf %363, %358 : vector<48x128xf32>
    %365 = arith.addf %358, %364 : vector<48x128xf32>
    %cst_170 = arith.constant 0.797884583 : f32
    %366 = vector.broadcast %cst_170 : f32 to vector<48x128xf32>
    %367 = arith.mulf %366, %365 : vector<48x128xf32>
    %368 = math.tanh %367 : vector<48x128xf32>
    %cst_171 = arith.constant 1.000000e+00 : f32
    %369 = vector.broadcast %cst_171 : f32 to vector<48x128xf32>
    %370 = arith.addf %369, %368 : vector<48x128xf32>
    %371 = arith.mulf %360, %370 : vector<48x128xf32>
    %c0_172 = arith.constant 0 : index
    %c1_173 = arith.constant 1 : index
    %c0_174 = arith.constant 0 : index
    %c0_175 = arith.constant 0 : index
    %372 = vector.load %arg16[%c0_172, %c1_173, %c0_174, %c0_175] : memref<1x2x128x32xf32, #tpu.memory_space<vmem>>, vector<1x1x128x32xf32>
    %373 = vector.shape_cast %372 : vector<1x1x128x32xf32> to vector<128x32xf32>
    %cst_176 = arith.constant dense<0.000000e+00> : vector<48x32xf32>
    %374 = tpu.matmul %371, %373, %cst_176 {dimension_numbers = #tpu.dot_dimension_numbers<[1], [0], [0], [1], [0, 0, 1, 1], [], []>} : vector<48x128xf32>, vector<128x32xf32>, vector<48x32xf32> -> vector<48x32xf32>
    %c0_177 = arith.constant 0 : index
    %c1_178 = arith.constant 1 : index
    %c0_179 = arith.constant 0 : index
    %c0_180 = arith.constant 0 : index
    %375 = vector.load %arg17[%c0_177, %c1_178, %c0_179, %c0_180] : memref<1x2x1x32xf32, #tpu.memory_space<vmem>>, vector<1x1x1x32xf32>
    %376 = vector.shape_cast %375 : vector<1x1x1x32xf32> to vector<1x32xf32>
    %377 = vector.broadcast %376 : vector<1x32xf32> to vector<48x32xf32>
    %378 = arith.addf %374, %377 : vector<48x32xf32>
    %379 = vector.shape_cast %378 : vector<48x32xf32> to vector<2x24x32xf32>
    %380 = arith.addf %322, %379 : vector<2x24x32xf32>
    %381 = vector.extract_strided_slice %380 {offsets = [0, 0, 0], sizes = [2, 1, 32], strides = [1, 1, 1]} : vector<2x24x32xf32> to vector<2x1x32xf32>
    %382 = vector.shape_cast %381 : vector<2x1x32xf32> to vector<2x32xf32>
    %c0_181 = arith.constant 0 : index
    %c0_182 = arith.constant 0 : index
    %c0_183 = arith.constant 0 : index
    %383 = vector.load %arg4[%c0_181, %c0_182, %c0_183] : memref<1x1x32xf32, #tpu.memory_space<vmem>>, vector<1x1x32xf32>
    %384 = vector.shape_cast %383 : vector<1x1x32xf32> to vector<1x32xf32>
    %c0_184 = arith.constant 0 : index
    %c0_185 = arith.constant 0 : index
    %c0_186 = arith.constant 0 : index
    %385 = vector.load %arg5[%c0_184, %c0_185, %c0_186] : memref<1x1x32xf32, #tpu.memory_space<vmem>>, vector<1x1x32xf32>
    %386 = vector.shape_cast %385 : vector<1x1x32xf32> to vector<1x32xf32>
    %cst_187 = arith.constant dense<0.000000e+00> : vector<2xf32>
    %387 = vector.multi_reduction <add>, %382, %cst_187 [1] : vector<2x32xf32> to vector<2xf32>
    %388 = vector.shape_cast %387 : vector<2xf32> to vector<2x1xf32>
    %cst_188 = arith.constant 3.200000e+01 : f32
    %389 = vector.broadcast %cst_188 : f32 to vector<2x1xf32>
    %390 = arith.divf %388, %389 : vector<2x1xf32>
    %391 = vector.broadcast %390 : vector<2x1xf32> to vector<2x32xf32>
    %392 = arith.subf %382, %391 : vector<2x32xf32>
    %393 = arith.mulf %392, %392 : vector<2x32xf32>
    %cst_189 = arith.constant dense<0.000000e+00> : vector<2xf32>
    %394 = vector.multi_reduction <add>, %393, %cst_189 [1] : vector<2x32xf32> to vector<2xf32>
    %395 = vector.shape_cast %394 : vector<2xf32> to vector<2x1xf32>
    %cst_190 = arith.constant 3.200000e+01 : f32
    %396 = vector.broadcast %cst_190 : f32 to vector<2x1xf32>
    %397 = arith.divf %395, %396 : vector<2x1xf32>
    %398 = vector.broadcast %390 : vector<2x1xf32> to vector<2x32xf32>
    %399 = arith.subf %382, %398 : vector<2x32xf32>
    %cst_191 = arith.constant 9.99999997E-7 : f32
    %400 = vector.broadcast %cst_191 : f32 to vector<2x1xf32>
    %401 = arith.addf %397, %400 : vector<2x1xf32>
    %402 = math.rsqrt %401 : vector<2x1xf32>
    %403 = vector.broadcast %402 : vector<2x1xf32> to vector<2x32xf32>
    %404 = arith.mulf %399, %403 : vector<2x32xf32>
    %405 = vector.broadcast %384 : vector<1x32xf32> to vector<2x32xf32>
    %406 = arith.mulf %404, %405 : vector<2x32xf32>
    %407 = vector.broadcast %386 : vector<1x32xf32> to vector<2x32xf32>
    %408 = arith.addf %406, %407 : vector<2x32xf32>
    %c0_192 = arith.constant 0 : index
    %c0_193 = arith.constant 0 : index
    %c0_194 = arith.constant 0 : index
    %409 = vector.load %arg18[%c0_192, %c0_193, %c0_194] : memref<1x2x32xf32, #tpu.memory_space<vmem>>, vector<1x2x32xf32>
    %410 = vector.shape_cast %409 : vector<1x2x32xf32> to vector<2x32xf32>
    %411 = vector.shape_cast %408 : vector<2x32xf32> to vector<1x2x32xf32>
    tpu.vector_store %arg18[%c0_192, %c0_193, %c0_194], %411 {strides = array<i32>} : memref<1x2x32xf32, #tpu.memory_space<vmem>>, vector<1x2x32xf32>,
    return
  }
  func.func @transform_0(%arg0: i32) -> (i32, i32, i32) {
    %c0_i32 = arith.constant 0 : i32
    %c0_i32_0 = arith.constant 0 : i32
    %c0_i32_1 = arith.constant 0 : i32
    return %arg0, %c0_i32, %c0_i32_0 : i32, i32, i32
  }
  func.func @transform_1(%arg0: i32) -> (i32, i32, i32) {
    %c0_i32 = arith.constant 0 : i32
    %c0_i32_0 = arith.constant 0 : i32
    %c0_i32_1 = arith.constant 0 : i32
    return %arg0, %c0_i32, %c0_i32_0 : i32, i32, i32
  }
  func.func @transform_2(%arg0: i32) -> (i32, i32, i32) {
    %c0_i32 = arith.constant 0 : i32
    %c0_i32_0 = arith.constant 0 : i32
    %c0_i32_1 = arith.constant 0 : i32
    return %arg0, %c0_i32, %c0_i32_0 : i32, i32, i32
  }
  func.func @transform_3(%arg0: i32) -> (i32, i32, i32) {
    %c0_i32 = arith.constant 0 : i32
    %c0_i32_0 = arith.constant 0 : i32
    %c0_i32_1 = arith.constant 0 : i32
    return %arg0, %c0_i32, %c0_i32_0 : i32, i32, i32
  }
  func.func @transform_4(%arg0: i32) -> (i32, i32, i32) {
    %c0_i32 = arith.constant 0 : i32
    %c0_i32_0 = arith.constant 0 : i32
    %c0_i32_1 = arith.constant 0 : i32
    return %arg0, %c0_i32, %c0_i32_0 : i32, i32, i32
  }
  func.func @transform_5(%arg0: i32) -> (i32, i32, i32, i32) {
    %c0_i32 = arith.constant 0 : i32
    %c0_i32_0 = arith.constant 0 : i32
    %c0_i32_1 = arith.constant 0 : i32
    %c0_i32_2 = arith.constant 0 : i32
    return %arg0, %c0_i32, %c0_i32_0, %c0_i32_1 : i32, i32, i32, i32
  }
  func.func @transform_6(%arg0: i32) -> (i32, i32, i32, i32) {
    %c0_i32 = arith.constant 0 : i32
    %c0_i32_0 = arith.constant 0 : i32
    %c0_i32_1 = arith.constant 0 : i32
    %c0_i32_2 = arith.constant 0 : i32
    return %arg0, %c0_i32, %c0_i32_0, %c0_i32_1 : i32, i32, i32, i32
  }
  func.func @transform_7(%arg0: i32) -> (i32, i32, i32, i32) {
    %c0_i32 = arith.constant 0 : i32
    %c0_i32_0 = arith.constant 0 : i32
    %c0_i32_1 = arith.constant 0 : i32
    %c0_i32_2 = arith.constant 0 : i32
    return %arg0, %c0_i32, %c0_i32_0, %c0_i32_1 : i32, i32, i32, i32
  }
  func.func @transform_8(%arg0: i32) -> (i32, i32, i32, i32) {
    %c0_i32 = arith.constant 0 : i32
    %c0_i32_0 = arith.constant 0 : i32
    %c0_i32_1 = arith.constant 0 : i32
    %c0_i32_2 = arith.constant 0 : i32
    return %arg0, %c0_i32, %c0_i32_0, %c0_i32_1 : i32, i32, i32, i32
  }
  func.func @transform_9(%arg0: i32) -> (i32, i32, i32, i32) {
    %c0_i32 = arith.constant 0 : i32
    %c0_i32_0 = arith.constant 0 : i32
    %c0_i32_1 = arith.constant 0 : i32
    %c0_i32_2 = arith.constant 0 : i32
    return %arg0, %c0_i32, %c0_i32_0, %c0_i32_1 : i32, i32, i32, i32
  }
  func.func @transform_10(%arg0: i32) -> (i32, i32, i32, i32) {
    %c0_i32 = arith.constant 0 : i32
    %c0_i32_0 = arith.constant 0 : i32
    %c0_i32_1 = arith.constant 0 : i32
    %c0_i32_2 = arith.constant 0 : i32
    return %arg0, %c0_i32, %c0_i32_0, %c0_i32_1 : i32, i32, i32, i32
  }
  func.func @transform_11(%arg0: i32) -> (i32, i32, i32, i32) {
    %c0_i32 = arith.constant 0 : i32
    %c0_i32_0 = arith.constant 0 : i32
    %c0_i32_1 = arith.constant 0 : i32
    %c0_i32_2 = arith.constant 0 : i32
    return %arg0, %c0_i32, %c0_i32_0, %c0_i32_1 : i32, i32, i32, i32
  }
  func.func @transform_12(%arg0: i32) -> (i32, i32, i32, i32) {
    %c0_i32 = arith.constant 0 : i32
    %c0_i32_0 = arith.constant 0 : i32
    %c0_i32_1 = arith.constant 0 : i32
    %c0_i32_2 = arith.constant 0 : i32
    return %arg0, %c0_i32, %c0_i32_0, %c0_i32_1 : i32, i32, i32, i32
  }
  func.func @transform_13(%arg0: i32) -> (i32, i32, i32, i32) {
    %c0_i32 = arith.constant 0 : i32
    %c0_i32_0 = arith.constant 0 : i32
    %c0_i32_1 = arith.constant 0 : i32
    %c0_i32_2 = arith.constant 0 : i32
    return %arg0, %c0_i32, %c0_i32_0, %c0_i32_1 : i32, i32, i32, i32
  }
  func.func @transform_14(%arg0: i32) -> (i32, i32, i32, i32) {
    %c0_i32 = arith.constant 0 : i32
    %c0_i32_0 = arith.constant 0 : i32
    %c0_i32_1 = arith.constant 0 : i32
    %c0_i32_2 = arith.constant 0 : i32
    return %arg0, %c0_i32, %c0_i32_0, %c0_i32_1 : i32, i32, i32, i32
  }
  func.func @transform_15(%arg0: i32) -> (i32, i32, i32, i32) {
    %c0_i32 = arith.constant 0 : i32
    %c0_i32_0 = arith.constant 0 : i32
    %c0_i32_1 = arith.constant 0 : i32
    %c0_i32_2 = arith.constant 0 : i32
    return %arg0, %c0_i32, %c0_i32_0, %c0_i32_1 : i32, i32, i32, i32
  }
  func.func @transform_16(%arg0: i32) -> (i32, i32, i32, i32) {
    %c0_i32 = arith.constant 0 : i32
    %c0_i32_0 = arith.constant 0 : i32
    %c0_i32_1 = arith.constant 0 : i32
    %c0_i32_2 = arith.constant 0 : i32
    return %arg0, %c0_i32, %c0_i32_0, %c0_i32_1 : i32, i32, i32, i32
  }
  func.func @transform_17(%arg0: i32) -> (i32, i32, i32) {
    %c0_i32 = arith.constant 0 : i32
    %c0_i32_0 = arith.constant 0 : i32
    %c0_i32_1 = arith.constant 0 : i32
    return %arg0, %c0_i32, %c0_i32_0 : i32, i32, i32
  }
}

module attributes {stable_mosaic.version = 11 : i64} {
  func.func @_heads_kernel(%arg0: memref<2x128xf32, #tpu.memory_space<vmem>>, %arg1: memref<128x30xf32, #tpu.memory_space<vmem>>, %arg2: memref<1x30xf32, #tpu.memory_space<vmem>>, %arg3: memref<2x30xf32, #tpu.memory_space<vmem>>) attributes {dimension_semantics = [], scalar_prefetch = 0 : i64, scratch_operands = 0 : i64, tpu.core_type = #tpu.core_type<tc>} {
    %c0 = arith.constant 0 : index
    %c0_0 = arith.constant 0 : index
    %0 = vector.load %arg0[%c0, %c0_0] : memref<2x128xf32, #tpu.memory_space<vmem>>, vector<2x128xf32>
    %c0_1 = arith.constant 0 : index
    %c0_2 = arith.constant 0 : index
    %1 = vector.load %arg1[%c0_1, %c0_2] : memref<128x30xf32, #tpu.memory_space<vmem>>, vector<128x30xf32>
    %cst = arith.constant dense<0.000000e+00> : vector<2x30xf32>
    %2 = tpu.matmul %0, %1, %cst {dimension_numbers = #tpu.dot_dimension_numbers<[1], [0], [0], [1], [0, 0, 1, 1], [], []>} : vector<2x128xf32>, vector<128x30xf32>, vector<2x30xf32> -> vector<2x30xf32>
    %c0_3 = arith.constant 0 : index
    %c0_4 = arith.constant 0 : index
    %3 = vector.load %arg2[%c0_3, %c0_4] : memref<1x30xf32, #tpu.memory_space<vmem>>, vector<1x30xf32>
    %4 = vector.broadcast %3 : vector<1x30xf32> to vector<2x30xf32>
    %5 = arith.addf %2, %4 : vector<2x30xf32>
    %c0_5 = arith.constant 0 : index
    %c0_6 = arith.constant 0 : index
    %6 = vector.load %arg3[%c0_5, %c0_6] : memref<2x30xf32, #tpu.memory_space<vmem>>, vector<2x30xf32>
    tpu.vector_store %arg3[%c0_5, %c0_6], %5 {strides = array<i32>} : memref<2x30xf32, #tpu.memory_space<vmem>>, vector<2x30xf32>,
    return
  }
}

</mosaic_0001>

<bundles_post_ra>
// kernel: vitnet_forward.3
= control target key start
LH: loop header
LB: loop body
LE: loop exit
PB: predicated region body
PF: predicated region fallthrough
CT: control target
= control target key end

     0   :  { %v194_v0 = vmov 0.0|0.0   ;;  %vm195_vm0 = vmmov 0   ;;  %v196_v4 = vmov 0.0   ;;  %vm108_vm1 = vcmask 238592   ;;  %s274_s1 = inlined_call_operand.vmem [shape: f32[128,30], index: 1, kind: input, shape index: {}]   ;;  %s275_s0 = inlined_call_operand.vmem [shape: f32[2,128], index: 0, kind: input, shape index: {}]   ;;  %s276_s2 = inlined_call_operand.vmem [shape: f32[1,30], index: 2, kind: input, shape index: {}]   ;;  %s277_s3 = inlined_call_operand.vmem [shape: f32[2,30], index: 3, kind: output, shape index: {}]  }
   0x1   :  { %167 = vmatprep.subr.bf16.mxu0 %v194_v0  ;;  %v15_v1 = vld [vmem:[%s274_s1] sm:$0xff]  ;;  %v16_v2 = vld [vmem:[%s274_s1 + $0x8] sm:$0xff]  ;;  %v17_v3 = vld [vmem:[%s274_s1 + $0x10] sm:$0xff]  ;;  %164 = vmatprep.mubr.msk.f32.mxu0 %vm195_vm0, %v196_v4 }
   0x2   :  { %v168_v5 = vpack.c.bf16 %v16_v2, %v15_v1  ;;  %v18_v6 = vld [vmem:[%s274_s1 + $0x18] sm:$0xff]  ;;  %v19_v8 = vld [vmem:[%s274_s1 + $0x20] sm:$0xff]  ;;  %v20_v9 = vld [vmem:[%s274_s1 + $0x28] sm:$0xff] }
   0x3   :  { %v171_v7 = vpack.c.bf16 %v18_v6, %v17_v3  ;;  %v174_v10 = vpack.c.bf16 %v20_v9, %v19_v8  ;;  %v21_v11 = vld [vmem:[%s274_s1 + $0x30] sm:$0xff]  ;;  %v22_v12 = vld [vmem:[%s274_s1 + $0x38] sm:$0xff]  ;;  %v23_v14 = vld [vmem:[%s274_s1 + $0x40] sm:$0xff] }
   0x4   :  { %169 = vmatpush3.bf16.msra.mxu0 %v168_v5  ;;  %v177_v13 = vpack.c.bf16 %v22_v12, %v21_v11  ;;  %v24_v15 = vld [vmem:[%s274_s1 + $0x48] sm:$0xff]  ;;  %v25_v17 = vld [vmem:[%s274_s1 + $0x50] sm:$0xff]  ;;  %v26_v18 = vld [vmem:[%s274_s1 + $0x58] sm:$0xff] }
   0x5   :  { %170 = vmatprep.subr.bf16.mxu0 %v194_v0  ;;  %v180_v16 = vpack.c.bf16 %v24_v15, %v23_v14  ;;  %v183_v19 = vpack.c.bf16 %v26_v18, %v25_v17  ;;  %v27_v20 = vld [vmem:[%s274_s1 + $0x60] sm:$0xff]  ;;  %v28_v21 = vld [vmem:[%s274_s1 + $0x68] sm:$0xff]  ;;  %v29_v23 = vld [vmem:[%s274_s1 + $0x70] sm:$0xff] }
   0x6   :  { %v186_v22 = vpack.c.bf16 %v28_v21, %v27_v20  ;;  %v30_v24 = vld [vmem:[%s274_s1 + $0x78] sm:$0xff]  ;;  %v14_v26 = vld [vmem:[%s275_s0] sm:$0x3] }
   0x7   :  { %v189_v25 = vpack.c.bf16 %v30_v24, %v29_v23  ;;  %v114_v27 = vld [vmem:[%s276_s2] ss:$0 sm:$0xff] }
   0x8   :  { %172 = vmatpush3.bf16.msra.mxu0 %v171_v7 }
   0x9   :  { %173 = vmatprep.subr.bf16.mxu0 %v194_v0 }
   0xc   :  { %175 = vmatpush3.bf16.msra.mxu0 %v174_v10 }
   0xd   :  { %176 = vmatprep.subr.bf16.mxu0 %v194_v0 }
  0x10   :  { %178 = vmatpush3.bf16.msra.mxu0 %v177_v13 }
  0x11   :  { %179 = vmatprep.subr.bf16.mxu0 %v194_v0 }
  0x14   :  { %181 = vmatpush3.bf16.msra.mxu0 %v180_v16 }
  0x15   :  { %182 = vmatprep.subr.bf16.mxu0 %v194_v0 }
  0x18   :  { %184 = vmatpush3.bf16.msra.mxu0 %v183_v19 }
  0x19   :  { %185 = vmatprep.subr.bf16.mxu0 %v194_v0 }
  0x1c   :  { %187 = vmatpush3.bf16.msra.mxu0 %v186_v22 }
  0x1d   :  { %188 = vmatprep.subr.bf16.mxu0 %v194_v0 }
  0x20   :  { %190 = vmatpush3.bf16.msra.mxu0 %v189_v25 }
  0x23   :  { %165 = vmatmul.mubr.f32.vlgmr.msra.gmra.mrb[0].mxu0 %v14_v26 }
  0xf6   :  { %v104_v28 = vpop.f32.mrb[0].mxu0 }
  0xf7   :  { %v105_v29 = vadd.f32 %v114_v27, %v104_v28  ;;  %v166_v30 = vpop.f32.mrb[1].mxu0 }
  0xf9   :  { %109 = vst.msk [vmem:[%s277_s3] sm:$0x3] %vm108_vm1, %v105_v29 }

// kernel: vitnet_forward.2
= control target key start
LH: loop header
LB: loop body
LE: loop exit
PB: predicated region body
PF: predicated region fallthrough
CT: control target
= control target key end

     0   :  { %s8877_s24 = smov 0   ;;  %s10510_s0 = inlined_call_operand.vmem [shape: f32[4,48,16], index: 0, kind: input, shape index: {}]   ;;  %s10511_s1 = inlined_call_operand.vmem [shape: f32[4,16,32], index: 1, kind: input, shape index: {}]   ;;  %s10512_s2 = inlined_call_operand.vmem [shape: f32[4,24,32], index: 2, kind: input, shape index: {}]   ;;  %s10513_s3 = inlined_call_operand.vmem [shape: f32[4,1,32], index: 3, kind: input, shape index: {}]   ;;  %s10514_s4 = inlined_call_operand.vmem [shape: f32[4,1,32], index: 4, kind: input, shape index: {}]   ;;  %s10515_s5 = inlined_call_operand.vmem [shape: f32[4,2,1,32], index: 5, kind: input, shape index: {}]   ;;  %s10516_s6 = inlined_call_operand.vmem [shape: f32[4,2,1,32], index: 6, kind: input, shape index: {}]   ;;  %s10517_s7 = inlined_call_operand.vmem [shape: f32[4,2,32,96], index: 7, kind: input, shape index: {}]   ;;  %s10518_s8 = inlined_call_operand.vmem [shape: f32[4,2,1,96], index: 8, kind: input, shape index: {}]   ;;  %s10519_s9 = inlined_call_operand.vmem [shape: f32[4,2,32,32], index: 9, kind: input, shape index: {}]   ;;  %s10520_s10 = inlined_call_operand.vmem [shape: f32[4,2,1,32], index: 10, kind: input, shape index: {}]   ;;  %s10521_s11 = inlined_call_operand.vmem [shape: f32[4,2,1,32], index: 11, kind: input, shape index: {}]   ;;  %s10522_s12 = inlined_call_operand.vmem [shape: f32[4,2,1,32], index: 12, kind: input, shape index: {}]   ;;  %s10523_s13 = inlined_call_operand.vmem [shape: f32[4,2,32,128], index: 13, kind: input, shape index: {}]   ;;  %s10524_s14 = inlined_call_operand.vmem [shape: f32[4,2,1,128], index: 14, kind: input, shape index: {}]   ;;  %s10525_s15 = inlined_call_operand.vmem [shape: f32[4,2,128,32], index: 15, kind: input, shape index: {}]   ;;  %s10526_s16 = inlined_call_operand.vmem [shape: f32[4,2,1,32], index: 16, kind: input, shape index: {}]   ;;  %s10527_s17 = inlined_call_operand.vmem [shape: f32[4,2,32], index: 17, kind: output, shape index: {}]  }
   0x1   :  { %10556 = sst [smem:[#allocation2_spill]] %s10510_s0 }
   0x2   :  { %10557 = sst [smem:[#allocation3_spill]] %s10511_s1 }
   0x3   :  { %10558 = sst [smem:[#allocation4_spill]] %s10512_s2 }
   0x4   :  { %10559 = sst [smem:[#allocation5_spill]] %s10515_s5 }
   0x5 LB: > { %s6825_s25 = sadd.s32 4294967295, %s8767_s24   ;;  %p6829_p0 = scmp.ge.s32.totalorder %s8767_s24, 1  ;;  %s8767_s24 = sphi %s8877_s24, %s27_s24  }
   0x6   : > { %p635_p1 = scmp.lt.s32.totalorder %s8767_s24, 5 }
   0x8   : > { %p636_p2 = pnand %p6829_p0, %p635_p1 }
   0x9   : > { %p754_p3 = scmp.lt.s32.totalorder (!%p636_p2), %s6825_s25, 3  ;;  %s10560_s29 = sld [smem:[#allocation3_spill]] (!%p636_p2)  ;;  %vm839_vm0 = vcmask (!%p636_p2), 130048   ;;  %vm968_vm1 = vcmask (!%p636_p2), 261120   ;;  %vm8771_vm2 = vmmov (!%p636_p2), 0   ;;  %vm1205_vm3 = vcmask (!%p636_p2), 64512  }
   0xa   : > { %639 = sbr.rel (%p636_p2) target bundleno = 9221 (0x2405), region = 88  ;;  %s10561_s1 = sld [smem:[#allocation2_spill]] (!%p636_p2)  ;;  %vm9050_vm4 = vmpackc.low (!%p636_p2), %vm1205_vm3, %vm1205_vm3  ;;  %vm1411_vm6 = vcmask (!%p636_p2), 195584   ;;  %vm6531_vm7 = vcmask (!%p636_p2), 1041409   ;;  %vm6534_vm8 = vcmask (!%p636_p2), 254976  }
   0xb   : > { %s10562_s2 = sld [smem:[#allocation4_spill]] (!%p636_p2)  ;;  %s10563_s5 = sld [smem:[#allocation5_spill]] (!%p636_p2) }
   0xc   : > { %s10552_s18 = smov (!%p636_p2), 64   ;;  %s10546_s19 = smov (!%p636_p2), 88  }
   0xd   : > { %s10530_s23 = smov (!%p636_p2), 80  }
  0x11   : > { %s10581_s25 = smov (!%p754_p3, %s6825_s25), 3 }
  0x12   : > { %s7093_s26 = sshll.u32 %s10581_s25, 4  ;;  %s8307_s30 = smul.u32 48, %s10581_s25 }
  0x13   : > { %s763_s0 = scalar_lea.vmem %s10560_s29, %s7093_s26  ;;  %s8308_s21 = smul.u32 24, %s10581_s25 }
  0x14   : > { %v837_v0 = vld [vmem:[%s763_s0] sm:$0xff]  ;;  %v838_v1 = vld [vmem:[%s763_s0 + $0x8] sm:$0xff]  ;;  %s758_s20 = scalar_lea.vmem %s10561_s1, %s8307_s30  ;;  %s8966_s27 = sshll.u32 %s10581_s25, 6 }
  0x15   : > { %v8079_v2 = vpack.c.bf16 %v838_v1, %v837_v0  ;;  %v831_v3 = vld [vmem:[%s758_s20] sm:$0xff]  ;;  %v832_v4 = vld [vmem:[%s758_s20 + $0x8] sm:$0xff]  ;;  %v833_v5 = vld [vmem:[%s758_s20 + $0x10] sm:$0xff]  ;;  %s768_s26 = scalar_lea.vmem %s10562_s2, %s8308_s21  ;;  %s8972_s0 = scalar_lea.vmem %s10517_s7, %s8966_s27 }
  0x16   : > { %7406 = vmatprep.mubr.msk.f32.mxu0 %vm839_vm0, %v831_v3  ;;  %v834_v6 = vld [vmem:[%s758_s20 + $0x18] sm:$0xff]  ;;  %v835_v7 = vld [vmem:[%s758_s20 + $0x20] sm:$0xff]  ;;  %v836_v8 = vld [vmem:[%s758_s20 + $0x28] sm:$0xff]  ;;  %s8979_s30 = sshll.u32 %s10581_s25, 1  ;;  %s10554_s29 = smov 96  }
  0x17   : > { %8080 = vmatprep.subr.bf16.mxu0 %v8079_v2  ;;  %v953_v9 = vld [vmem:[%s768_s26] sm:$0xff]  ;;  %v954_v11 = vld [vmem:[%s768_s26 + $0x8] sm:$0xff]  ;;  %v955_v14 = vld [vmem:[%s768_s26 + $0x10] sm:$0xff]  ;;  %s8985_s1 = scalar_lea.vmem %s10563_s5, %s8979_s30  ;;  %s8991_s22 = scalar_lea.vmem %s10516_s6, %s8979_s30 }
  0x18   : > { %8082 = vmatpush3.bf16.msra.mxu0 %v8079_v2  ;;  %v1072_v60 = vld [vmem:[%s8972_s0] sm:$0xff]  ;;  %v1073_v61 = vld [vmem:[%s8972_s0 + $0x8] sm:$0xff]  ;;  %v1074_v63 = vld [vmem:[%s8972_s0 + $0x10] sm:$0xff]  ;;  %s9011_s28 = scalar_lea.vmem %s10518_s8, %s8979_s30  ;;  %s10544_s20 = smov 120  }
  0x19   : > { %v8083_v62 = vpack.c.bf16 %v1073_v61, %v1072_v60  ;;  %v1075_v0 = vld [vmem:[%s8972_s0 + $0x18] sm:$0xff]  ;;  %s10532_s21 = smov 56   ;;  %s10528_s26 = smov 112  }
  0x1a   : > { %v8087_v1 = vpack.c.bf16 %v1075_v0, %v1074_v63  ;;  %s9720_s5 = scalar_lea.vmem %s10522_s12, %s8979_s30  ;;  %s10571_s2 = smov 80  }
  0x1b   : > { %7407 = vmatmul.mubr.msk.f32.vlgmr.msra.gmra.mrb[0].mxu0 %vm839_vm0, %v832_v4  ;;  %8084 = vmatprep.subr.bf16.mxu1 %v8083_v62 }
  0x1c   : > { %7409 = vmatprep.mubr.msk.f32.mxu0 %vm839_vm0, %v833_v5  ;;  %8086 = vmatpush3.bf16.msra.mxu1 %v8083_v62  ;;  %v8772_v62 = vmov 0.0  }
  0x1d   : > { %8088 = vmatprep.subr.bf16.mxu1 %v8087_v1 }
  0x1f   : > { %7410 = vmatmul.mubr.msk.f32.gmra.mrb[2].mxu0 %vm839_vm0, %v834_v6 }
  0x20   : > { %7412 = vmatprep.mubr.msk.f32.mxu0 %vm839_vm0, %v835_v7  ;;  %8090 = vmatpush3.bf16.msra.mxu1 %v8087_v1 }
  0x23   : > { %7413 = vmatmul.mubr.msk.f32.gmra.mrb[4].mxu0 %vm839_vm0, %v836_v8 }
  0x24   : > { %7468 = vmatprep.mubr.msk.f32.mxu0 %vm8771_vm2, %v8772_v62 }
  0xee   : > { %v7408_v10 = vpop.f32.mrb[0].mxu0 }
  0xef   : > { %v924_v12 = vpop.f32.mrb[1].mxu0  ;;  %v8907_v15 = vadd.f32 %v7408_v10, %v954_v11 }
  0xf0   : > { %v8905_v13 = vadd.f32 %v953_v9, %v924_v12 }
  0xf1   : > { %v972_v22 = vsel %vm968_vm1, %v8907_v15, 0.0 }
  0xf2   : > { %v7411_v16 = vpop.f32.mrb[2].mxu0  ;;  %v969_v17 = vsel %vm968_vm1, %v8905_v13, 0.0 }
  0xf3   : > { %970 = vadd.xlane.f32.xlu0 %v969_v17  ;;  %v934_v18 = vpop.f32.mrb[3].mxu0  ;;  %v8911_v19 = vadd.f32 %v7411_v16, %v953_v9 }
  0xf4   : > { %v8913_v20 = vadd.f32 %v955_v14, %v934_v18 }
  0xf5   : > { %v978_v27 = vsel %vm968_vm1, %v8911_v19, 0.0 }
  0xf6   : > { %v7414_v21 = vpop.f32.mrb[4].mxu0  ;;  %v975_v23 = vsel %vm968_vm1, %v8913_v20, 0.0 }
  0xf7   : > { %973 = vadd.xlane.f32.xlu0 %v972_v22  ;;  %976 = vadd.xlane.f32.xlu1 %v975_v23  ;;  %v944_v24 = vpop.f32.mrb[5].mxu0  ;;  %v8919_v25 = vadd.f32 %v7414_v21, %v955_v14 }
  0xf8   : > { %v8921_v26 = vadd.f32 %v954_v11, %v944_v24 }
  0xf9   : > { %v984_v29 = vsel %vm968_vm1, %v8919_v25, 0.0 }
  0xfa   : > { %v981_v28 = vsel %vm968_vm1, %v8921_v26, 0.0 }
  0xfb   : > { %979 = vadd.xlane.f32.xlu1 %v978_v27  ;;  %982 = vadd.xlane.f32.xlu0 %v981_v28  ;;  %v6857_v27 = vld [vmem:[%s8985_s1] ss:$0 sm:$0xff] }
  0xff   : > { %985 = vadd.xlane.f32.xlu1 %v984_v29  ;;  %v6858_v29 = vld [vmem:[%s8991_s22] ss:$0 sm:$0xff] }
 0x180   : > { %v971_v30 = vpop.xlane.xlu0 %970 }
 0x181   : > { %v988_v31 = vmul.f32 0.03125, %v971_v30 }
 0x183   : > { %v8930_v32 = vsub.f32 %v8905_v13, %v988_v31 }
 0x184   : > { %v974_v33 = vpop.xlane.xlu0 %973  ;;  %v977_v34 = vpop.xlane.xlu1 %976 }
 0x185   : > { %v989_v35 = vmul.f32 0.03125, %v974_v33  ;;  %v990_v36 = vmul.f32 0.03125, %v977_v34  ;;  %v1000_v37 = vmul.f32 %v8930_v32, %v8930_v32 }
 0x187   : > { %v8935_v38 = vsub.f32 %v8907_v15, %v989_v35  ;;  %v8938_v39 = vsub.f32 %v8913_v20, %v990_v36  ;;  %v1006_v40 = vsel %vm968_vm1, %v1000_v37, 0.0 }
 0x188   : > { %v980_v41 = vpop.xlane.xlu1 %979  ;;  %1007 = vadd.xlane.f32.xlu0 %v1006_v40  ;;  %v983_v42 = vpop.xlane.xlu0 %982 }
 0x189   : > { %v991_v43 = vmul.f32 0.03125, %v980_v41  ;;  %v992_v44 = vmul.f32 0.03125, %v983_v42  ;;  %v1001_v45 = vmul.f32 %v8935_v38, %v8935_v38  ;;  %v1002_v46 = vmul.f32 %v8938_v39, %v8938_v39 }
 0x18b   : > { %v8946_v47 = vsub.f32 %v8911_v19, %v991_v43  ;;  %v8949_v48 = vsub.f32 %v8921_v26, %v992_v44  ;;  %v1009_v49 = vsel %vm968_vm1, %v1001_v45, 0.0  ;;  %v1012_v50 = vsel %vm968_vm1, %v1002_v46, 0.0 }
 0x18c   : > { %1010 = vadd.xlane.f32.xlu1 %v1009_v49  ;;  %v986_v51 = vpop.xlane.xlu1 %985  ;;  %1013 = vadd.xlane.f32.xlu0 %v1012_v50 }
 0x18d   : > { %v993_v52 = vmul.f32 0.03125, %v986_v51  ;;  %v1003_v53 = vmul.f32 %v8946_v47, %v8946_v47  ;;  %v1004_v54 = vmul.f32 %v8949_v48, %v8949_v48 }
 0x18f   : > { %v8958_v55 = vsub.f32 %v8919_v25, %v993_v52  ;;  %v1015_v56 = vsel %vm968_vm1, %v1003_v53, 0.0  ;;  %v1018_v57 = vsel %vm968_vm1, %v1004_v54, 0.0  ;;  %v6859_v53 = vld [vmem:[%s9011_s28] ss:$0 sm:$0xff] }
 0x190   : > { %1016 = vadd.xlane.f32.xlu1 %v1015_v56  ;;  %1019 = vadd.xlane.f32.xlu0 %v1018_v57 }
 0x191   : > { %v1005_v58 = vmul.f32 %v8958_v55, %v8958_v55 }
 0x193   : > { %v1021_v59 = vsel %vm968_vm1, %v1005_v58, 0.0 }
 0x194   : > { %1022 = vadd.xlane.f32.xlu1 %v1021_v59 }
 0x215   : > { %v1008_v2 = vpop.xlane.xlu0 %1007 }
 0x216   : > { %v1024_v3 = vmul.f32 0.03125, %v1008_v2 }
 0x218   : > { %v1030_v4 = vadd.f32 1e-06, %v1024_v3 }
 0x219   : > { %v1011_v5 = vpop.xlane.xlu1 %1010  ;;  %v1014_v6 = vpop.xlane.xlu0 %1013 }
 0x21a   : > { %8495 = vrsqrt.f32 %v1030_v4  ;;  %v1025_v7 = vmul.f32 0.03125, %v1011_v5  ;;  %v1026_v8 = vmul.f32 0.03125, %v1014_v6 }
 0x21c   : > { %v1031_v9 = vadd.f32 1e-06, %v1025_v7  ;;  %v1032_v10 = vadd.f32 1e-06, %v1026_v8 }
 0x21d   : > { %v1017_v11 = vpop.xlane.xlu1 %1016  ;;  %v1020_v12 = vpop.xlane.xlu0 %1019 }
 0x21e   : > { %8497 = vrsqrt.f32 %v1031_v9  ;;  %v1027_v14 = vmul.f32 0.03125, %v1017_v11  ;;  %v1028_v16 = vmul.f32 0.03125, %v1020_v12 }
 0x21f   : > { %8499 = vrsqrt.f32 %v1032_v10 }
 0x220   : > { %v1033_v17 = vadd.f32 1e-06, %v1027_v14  ;;  %v1034_v18 = vadd.f32 1e-06, %v1028_v16 }
 0x221   : > { %v1023_v21 = vpop.xlane.xlu1 %1022 }
 0x222   : > { %8501 = vrsqrt.f32 %v1033_v17  ;;  %v1029_v22 = vmul.f32 0.03125, %v1023_v21 }
 0x223   : > { %8503 = vrsqrt.f32 %v1034_v18  ;;  %v962_v18 = vlaneseq }
 0x224   : > { %v8496_v23 = vpop.eup %8495  ;;  %v1035_v24 = vadd.f32 1e-06, %v1029_v22 }
 0x225   : > { %v1042_v28 = vmul.f32 %v8496_v23, %v8930_v32  ;;  %v963_v21 = vand.u32 127, %v962_v18  ;;  %v8773_v23 = vmov -1e+30  }
 0x226   : > { %8505 = vrsqrt.f32 %v1035_v24 }
 0x227   : > { %v1054_v30 = vmul.f32 %v6857_v27, %v1042_v28  ;;  %vm964_vm5 = vcmp.lt.s32.totalorder %v963_v21, 21 }
 0x228   : > { %v8498_v31 = vpop.eup %8497  ;;  %v9088_v24 = vsel %vm964_vm5, 0.0, %v8773_v23 }
 0x229   : > { %v8500_v33 = vpop.eup %8499  ;;  %v1066_v34 = vadd.f32 %v6858_v29, %v1054_v30  ;;  %v1043_v35 = vmul.f32 %v8498_v31, %v8935_v38 }
 0x22a   : > { %v1044_v36 = vmul.f32 %v8500_v33, %v8938_v39 }
 0x22b   : > { %7423 = vmatprep.mubr.msk.f32.mxu1 %vm968_vm1, %v1066_v34  ;;  %v1055_v37 = vmul.f32 %v6857_v27, %v1043_v35 }
 0x22c   : > { %v8502_v40 = vpop.eup %8501  ;;  %v1056_v41 = vmul.f32 %v6857_v27, %v1044_v36 }
 0x22d   : > { %v8504_v42 = vpop.eup %8503  ;;  %v1067_v43 = vadd.f32 %v6858_v29, %v1055_v37  ;;  %v1045_v44 = vmul.f32 %v8502_v40, %v8946_v47 }
 0x22e   : > { %v1068_v32 = vadd.f32 %v6858_v29, %v1056_v41  ;;  %v1046_v45 = vmul.f32 %v8504_v42, %v8949_v48  ;;  %v8769_v48 = vmov 0.0|0.0  }
 0x22f   : > { %7424 = vmatmul.mubr.msk.f32.vlgmr.msra.gmra.mrb[0].mxu1 %vm968_vm1, %v1067_v43  ;;  %v1057_v46 = vmul.f32 %v6857_v27, %v1045_v44  ;;  %8091 = vmatprep.subr.bf16.mxu1 %v8769_v48 }
 0x230   : > { %v8506_v49 = vpop.eup %8505  ;;  %7426 = vmatprep.mubr.msk.f32.mxu1 %vm968_vm1, %v1068_v32  ;;  %v1058_v38 = vmul.f32 %v6857_v27, %v1046_v45  ;;  %8099 = vmatprep.subr.bf16.mxu0 %v8769_v48 }
 0x231   : > { %v1069_v39 = vadd.f32 %v6858_v29, %v1057_v46  ;;  %v1047_v50 = vmul.f32 %v8506_v49, %v8958_v55 }
 0x232   : > { %v1070_v51 = vadd.f32 %v6858_v29, %v1058_v38 }
 0x233   : > { %7427 = vmatmul.mubr.msk.f32.gmra.mrb[2].mxu1 %vm968_vm1, %v1069_v39  ;;  %v1059_v52 = vmul.f32 %v6857_v27, %v1047_v50 }
 0x234   : > { %7429 = vmatprep.mubr.msk.f32.mxu1 %vm968_vm1, %v1070_v51 }
 0x235   : > { %v1071_v47 = vadd.f32 %v6858_v29, %v1059_v52 }
 0x237   : > { %7430 = vmatmul.mubr.msk.f32.gmra.mrb[4].mxu1 %vm968_vm1, %v1071_v47 }
 0x238   : > { %7438 = vmatprep.mubr.msk.f32.mxu1 %vm8771_vm2, %v8772_v62 }
 0x302   : > { %v7425_v54 = vpop.f32.mrb[0].mxu1 }
 0x303   : > { %v9016_v55 = vadd.f32 %v7425_v54, %v6859_v53  ;;  %v1167_v56 = vpop.f32.mrb[1].mxu1 }
 0x304   : > { %v9018_v57 = vadd.f32 %v6859_v53, %v1167_v56 }
 0x306   : > { %v7428_v58 = vpop.f32.mrb[2].mxu1  ;;  %v9022_v59 = vpack.i.bf16 %v9016_v55, %v9018_v57 }
 0x307   : > { %v1177_v60 = vpop.f32.mrb[3].mxu1  ;;  %v9034_v1 = vadd.f32 %v7428_v58, %v6859_v53 }
 0x308   : > { %v9024_v61 = vadd.f32 %v6859_v53, %v1177_v60  ;;  %8336 = vrot.lane.b32.xlu0 %v9022_v59, %s10554_s29 }
 0x30a   : > { %1203 = vrot.lane.b32.xlu1 %v9024_v61, %s10554_s29  ;;  %v7431_v63 = vpop.f32.mrb[4].mxu1 }
 0x30b   : > { %v1187_v0 = vpop.f32.mrb[5].mxu1  ;;  %v9044_v4 = vadd.f32 %v7431_v63, %v6859_v53 }
 0x30c   : > { %v9036_v2 = vadd.f32 %v6859_v53, %v1187_v0 }
 0x30e   : > { %v9040_v3 = vpack.i.bf16 %v9036_v2, %v9034_v1 }
 0x310   : > { %8341 = vrot.lane.b32.xlu1 %v9040_v3, %s10554_s29 }
 0x314   : > { %1305 = vrot.lane.b32.xlu1 %v9044_v4, %s10554_s29  ;;  %s9763_s29 = scalar_lea.vmem %s10526_s16, %s8979_s30 }
 0x37a   : > { %v8337_v5 = vpop.permute.xlu0 %8336 }
 0x37b   : > { %v8339_v6 = vunpack.i.h.bf16 %v8337_v5  ;;  %v8338_v7 = vunpack.i.l.bf16 %v8337_v5 }
 0x37c   : > { %v1204_v10 = vpop.permute.xlu1 %1203 }
 0x37d   : > { %v8092_v9 = vpack.c.bf16 %v8339_v6, %v8338_v7 }
 0x37f   : > { %8094 = vmatpush3.bf16.xpose.msk.msra.mxu1 %vm9050_vm4, %v8092_v9 }
 0x380   : > { %7436 = vmatprep.subr.mxu1 %v8772_v62 }
 0x382   : > { %v8342_v11 = vpop.permute.xlu1 %8341 }
 0x383   : > { %v8344_v12 = vunpack.i.h.bf16 %v8342_v11  ;;  %v8343_v14 = vunpack.i.l.bf16 %v8342_v11 }
 0x385   : > { %v8096_v16 = vpack.c.bf16 %v8344_v12, %v8343_v14 }
 0x386   : > { %v1306_v17 = vpop.permute.xlu1 %1305 }
 0x387   : > { %7437 = vmatpush3.xpose.msk.msra.mxu1 %vm1205_vm3, %v1204_v10 }
 0x388   : > { %8095 = vmatprep.subr.bf16.mxu1 %v8769_v48 }
 0x38a   : > { %7439 = vmatmul.mubr.msk.f32.vlgmr.msra.gmra.mrb[6].mxu1 %vm1205_vm3, %v9018_v57 }
 0x38b   : > { %8098 = vmatpush3.bf16.xpose.msk.msra.mxu1 %vm9050_vm4, %v8096_v16  ;;  %7441 = vmatprep.mubr.msk.f32.mxu1 %vm8771_vm2, %v8772_v62 }
 0x38c   : > { %7451 = vmatprep.subr.mxu1 %v8772_v62 }
 0x38e   : > { %7442 = vmatmul.mubr.msk.f32.gmra.mrb[8].mxu1 %vm1205_vm3, %v9016_v55 }
 0x38f   : > { %7444 = vmatprep.mubr.msk.f32.mxu1 %vm8771_vm2, %v8772_v62 }
 0x392   : > { %7445 = vmatmul.mubr.msk.f32.gmra.mrb[10].mxu1 %vm1205_vm3, %v9024_v61 }
 0x393   : > { %7452 = vmatpush3.xpose.msk.msra.mxu1 %vm1205_vm3, %v1306_v17  ;;  %7453 = vmatprep.mubr.msk.f32.mxu1 %vm8771_vm2, %v8772_v62 }
 0x394   : > { %8102 = vmatprep.subr.bf16.mxu1 %v8769_v48 }
 0x396   : > { %7454 = vmatmul.mubr.msk.f32.vlgmr.msra.gmra.mrb[12].mxu1 %vm1205_vm3, %v9034_v1 }
 0x397   : > { %7456 = vmatprep.mubr.msk.f32.mxu1 %vm8771_vm2, %v8772_v62 }
 0x39a   : > { %7457 = vmatmul.mubr.msk.f32.gmra.mrb[14].mxu1 %vm1205_vm3, %v9036_v2 }
 0x39b   : > { %7459 = vmatprep.mubr.msk.f32.mxu1 %vm8771_vm2, %v8772_v62 }
 0x39e   : > { %7460 = vmatmul.mubr.msk.f32.gmra.mrb[16].mxu1 %vm1205_vm3, %v9044_v4 }
 0x39f   : > { %7483 = vmatprep.mubr.msk.f32.mxu1 %vm8771_vm2, %v8772_v62 }
 0x45d   : > { %v1284_v22 = vpop.f32.mrb[6].mxu1 }
 0x45e   : > { %v1399_v27 = vmul.f32 0.35355338, %v1284_v22  ;;  %v7440_v28 = vpop.f32.mrb[7].mxu1 }
 0x460   : > { %v1405_v29 = vadd.f32 %v1399_v27, %v9088_v24 }
 0x461   : > { %v1289_v30 = vpop.f32.mrb[8].mxu1 }
 0x462   : > { %v1400_v31 = vmul.f32 0.35355338, %v1289_v30  ;;  %v7443_v33 = vpop.f32.mrb[9].mxu1  ;;  %v1412_v34 = vsel %vm1411_vm6, %v1405_v29, -inf }
 0x463   : > { %1413 = vmax.xlane.f32.xlu0 %v1412_v34 }
 0x464   : > { %v1406_v35 = vadd.f32 %v1400_v31, %v9088_v24 }
 0x465   : > { %v1294_v36 = vpop.f32.mrb[10].mxu1 }
 0x466   : > { %v1401_v37 = vmul.f32 0.35355338, %v1294_v36  ;;  %v7446_v40 = vpop.f32.mrb[11].mxu1  ;;  %v1415_v41 = vsel %vm1411_vm6, %v1406_v35, -inf }
 0x467   : > { %1416 = vmax.xlane.f32.xlu1 %v1415_v41 }
 0x468   : > { %v9095_v42 = vadd.f32 %v1401_v37, %v9088_v24 }
 0x469   : > { %v1385_v43 = vpop.f32.mrb[12].mxu1 }
 0x46a   : > { %v1402_v44 = vmul.f32 0.35355338, %v1385_v43  ;;  %v7455_v32 = vpop.f32.mrb[13].mxu1  ;;  %v1418_v45 = vsel %vm1411_vm6, %v9095_v42, -inf }
 0x46b   : > { %1419 = vmax.xlane.f32.xlu0 %v1418_v45 }
 0x46c   : > { %v1408_v46 = vadd.f32 %v1402_v44, %v9088_v24 }
 0x46d   : > { %v1390_v49 = vpop.f32.mrb[14].mxu1 }
 0x46e   : > { %v1403_v38 = vmul.f32 0.35355338, %v1390_v49  ;;  %v7458_v39 = vpop.f32.mrb[15].mxu1  ;;  %v1421_v50 = vsel %vm1411_vm6, %v1408_v46, -inf }
 0x46f   : > { %1422 = vmax.xlane.f32.xlu0 %v1421_v50 }
 0x470   : > { %v9102_v51 = vadd.f32 %v1403_v38, %v9088_v24 }
 0x471   : > { %v1395_v52 = vpop.f32.mrb[16].mxu1 }
 0x472   : > { %v1404_v47 = vmul.f32 0.35355338, %v1395_v52  ;;  %v7461_v53 = vpop.f32.mrb[17].mxu1  ;;  %v1424_v54 = vsel %vm1411_vm6, %v9102_v51, -inf }
 0x473   : > { %1425 = vmax.xlane.f32.xlu0 %v1424_v54 }
 0x474   : > { %v9107_v56 = vadd.f32 %v1404_v47, %v9088_v24 }
 0x476   : > { %v1427_v58 = vsel %vm1411_vm6, %v9107_v56, -inf }
 0x477   : > { %1428 = vmax.xlane.f32.xlu1 %v1427_v58 }
 0x488   : > { %8346 = vrot.lane.b32.xlu1 %v9022_v59, %s10552_s18 }
 0x489   : > { %1482 = vrot.lane.b32.xlu0 %v9024_v61, %s10552_s18 }
 0x48c   : > { %8351 = vrot.lane.b32.xlu1 %v9040_v3, %s10552_s18 }
 0x48d   : > { %1684 = vrot.lane.b32.xlu0 %v9024_v61, %s10546_s19 }
 0x490   : > { %8356 = vrot.lane.b32.xlu1 %v9022_v59, %s10546_s19 }
 0x494   : > { %1580 = vrot.lane.b32.xlu1 %v9044_v4, %s10552_s18 }
 0x498   : > { %8361 = vrot.lane.b32.xlu1 %v9040_v3, %s10546_s19 }
 0x49c   : > { %1674 = vrot.lane.b32.xlu1 %v9018_v57, %s10544_s20 }
 0x4f0   : > { %v1414_v60 = vpop.xlane.xlu0 %1413 }
 0x4f1   : > { %v1430_v63 = vsub.f32 %v1405_v29, %v1414_v60 }
 0x4f3   : > { %v1436_v0 = vmul.f32 1.442695, %v1430_v63 }
 0x4f4   : > { %v1417_v5 = vpop.xlane.xlu1 %1416 }
 0x4f5   : > { %8507 = vpow2.f32 %v1436_v0  ;;  %v1431_v6 = vsub.f32 %v1406_v35, %v1417_v5 }
 0x4f7   : > { %v1438_v7 = vmul.f32 1.442695, %v1431_v6 }
 0x4f8   : > { %v1420_v9 = vpop.xlane.xlu0 %1419 }
 0x4f9   : > { %8509 = vpow2.f32 %v1438_v7  ;;  %v1432_v43 = vsub.f32 %v9095_v42, %v1420_v9 }
 0x4fb   : > { %v1440_v44 = vmul.f32 1.442695, %v1432_v43 }
 0x4fc   : > { %v1423_v10 = vpop.xlane.xlu0 %1422 }
 0x4fd   : > { %v1433_v11 = vsub.f32 %v1408_v46, %v1423_v10 }
 0x4ff   : > { %v9127_v12 = vpop.eup %8507  ;;  %v1442_v14 = vmul.f32 1.442695, %v1433_v11 }
 0x500   : > { %v1448_v16 = vsel %vm1411_vm6, %v9127_v12, 0.0  ;;  %v1426_v28 = vpop.xlane.xlu0 %1425 }
 0x501   : > { %8511 = vpow2.f32 %v1442_v14  ;;  %1449 = vadd.xlane.f32.xlu0 %v1448_v16  ;;  %v1434_v32 = vsub.f32 %v9102_v51, %v1426_v28 }
 0x502   : > { %8513 = vpow2.f32 %v1440_v44 }
 0x503   : > { %v9131_v17 = vpop.eup %8509  ;;  %v1444_v45 = vmul.f32 1.442695, %v1434_v32 }
 0x504   : > { %v1429_v18 = vpop.xlane.xlu1 %1428  ;;  %v1451_v21 = vsel %vm1411_vm6, %v9131_v17, 0.0  ;;  %v1483_v37 = vpop.permute.xlu0 %1482 }
 0x505   : > { %1452 = vadd.xlane.f32.xlu1 %v1451_v21  ;;  %v1435_v46 = vsub.f32 %v9107_v56, %v1429_v18  ;;  %8515 = vpow2.f32 %v1444_v45 }
 0x507   : > { %v1446_v49 = vmul.f32 1.442695, %v1435_v46 }
 0x508   : > { %v8347_v22 = vpop.permute.xlu1 %8346  ;;  %v1685_v53 = vpop.permute.xlu0 %1684 }
 0x509   : > { %v8349_v23 = vunpack.i.h.bf16 %v8347_v22  ;;  %v8348_v27 = vunpack.i.l.bf16 %v8347_v22  ;;  %8517 = vpow2.f32 %v1446_v49 }
 0x50b   : > { %v9135_v29 = vpop.eup %8511  ;;  %v8100_v30 = vpack.c.bf16 %v8349_v23, %v8348_v27 }
 0x50c   : > { %v8352_v31 = vpop.permute.xlu1 %8351  ;;  %v1457_v33 = vsel %vm1411_vm6, %v9135_v29, 0.0  ;;  %v8514_v38 = vpop.eup %8513 }
 0x50d   : > { %v8354_v34 = vunpack.i.h.bf16 %v8352_v31  ;;  %v8353_v35 = vunpack.i.l.bf16 %v8352_v31  ;;  %1458 = vadd.xlane.f32.xlu1 %v1457_v33  ;;  %8101 = vmatpush3.bf16.msra.mxu0 %v8100_v30  ;;  %v1454_v39 = vsel %vm1411_vm6, %v8514_v38, 0.0 }
 0x50e   : > { %7466 = vmatprep.subr.mxu0 %v8772_v62 }
 0x50f   : > { %v8103_v36 = vpack.c.bf16 %v8354_v34, %v8353_v35  ;;  %v8516_v42 = vpop.eup %8515 }
 0x510   : > { %v8357_v40 = vpop.permute.xlu1 %8356  ;;  %v1460_v50 = vsel %vm1411_vm6, %v8516_v42, 0.0 }
 0x511   : > { %7467 = vmatpush3.msra.mxu0 %v1483_v37  ;;  %8104 = vmatpush3.bf16.msra.mxu1 %v8103_v36  ;;  %v8359_v60 = vunpack.i.h.bf16 %v8357_v40  ;;  %v8358_v63 = vunpack.i.l.bf16 %v8357_v40 }
 0x512   : > { %7481 = vmatprep.subr.mxu1 %v8772_v62  ;;  %8105 = vmatprep.subr.bf16.mxu0 %v8769_v48 }
 0x513   : > { %v8518_v52 = vpop.eup %8517  ;;  %v8106_v7 = vpack.c.bf16 %v8359_v60, %v8358_v63 }
 0x514   : > { %v1581_v41 = vpop.permute.xlu1 %1580  ;;  %v1463_v51 = vsel %vm1411_vm6, %v8518_v52, 0.0 }
 0x515   : > { %7482 = vmatpush3.msra.mxu1 %v1581_v41 }
 0x516   : > { %8109 = vmatprep.subr.bf16.mxu1 %v8769_v48 }
 0x517   : > { %1676 = vrot.lane.b32.xlu0 %v9016_v55, %s10544_s20 }
 0x518   : > { %v8362_v47 = vpop.permute.xlu1 %8361 }
 0x519   : > { %v8364_v11 = vunpack.i.h.bf16 %v8362_v47 }
 0x51c   : > { %v1675_v54 = vpop.permute.xlu1 %1674 }
 0x51e   : > { %1788 = vrot.lane.b32.xlu1 %v9044_v4, %s10546_s19  ;;  %s10548_s19 = smov 24  }
 0x522   : > { %1778 = vrot.lane.b32.xlu1 %v9034_v1, %s10544_s20 }
 0x526   : > { %1782 = vrot.lane.b32.xlu1 %v9044_v4, %s10544_s20 }
 0x536   : > { %1455 = vadd.xlane.f32.xlu0 %v1454_v39 }
 0x53a   : > { %1461 = vadd.xlane.f32.xlu0 %v1460_v50 }
 0x53e   : > { %1464 = vadd.xlane.f32.xlu0 %v1463_v51 }
 0x554   : > { %1678 = vrot.lane.b32.xlu0 %v9024_v61, %s10544_s20 }
 0x558   : > { %1780 = vrot.lane.b32.xlu0 %v9036_v2, %s10544_s20  ;;  %s9572_s20 = scalar_lea.vmem %s10519_s9, %s8966_s27 }
 0x58e   : > { %v1450_v56 = vpop.xlane.xlu0 %1449 }
 0x58f   : > { %8519 = vrcp.f32 %v1450_v56 }
 0x592   : > { %v1453_v58 = vpop.xlane.xlu1 %1452  ;;  %v1677_v21 = vpop.permute.xlu0 %1676 }
 0x593   : > { %8521 = vrcp.f32 %v1453_v58 }
 0x599   : > { %v8520_v0 = vpop.eup %8519 }
 0x59a   : > { %v1472_v5 = vmul.f32 %v8520_v0, %v9127_v12  ;;  %v1459_v6 = vpop.xlane.xlu1 %1458  ;;  %v8363_v12 = vunpack.i.l.bf16 %v8362_v47 }
 0x59b   : > { %8523 = vrcp.f32 %v1459_v6 }
 0x59c   : > { %7469 = vmatmul.mubr.msk.f32.vlgmr.msra.gmra.mrb[6].mxu0 %vm1411_vm6, %v1472_v5  ;;  %v8110_v18 = vpack.c.bf16 %v8364_v11, %v8363_v12 }
 0x59d   : > { %v8522_v9 = vpop.eup %8521  ;;  %8108 = vmatpush3.bf16.xpose.msk.msra.mxu0 %vm9050_vm4, %v8106_v7  ;;  %7471 = vmatprep.mubr.msk.f32.mxu0 %vm8771_vm2, %v8772_v62 }
 0x59e   : > { %v1473_v10 = vmul.f32 %v8522_v9, %v9131_v17  ;;  %7496 = vmatprep.subr.mxu0 %v8772_v62  ;;  %v1789_v17 = vpop.permute.xlu1 %1788 }
 0x5a0   : > { %7472 = vmatmul.mubr.msk.f32.gmra.mrb[8].mxu0 %vm1411_vm6, %v1473_v10 }
 0x5a1   : > { %7474 = vmatprep.mubr.msk.f32.mxu0 %vm8771_vm2, %v8772_v62 }
 0x5a2   : > { %v1779_v36 = vpop.permute.xlu1 %1778 }
 0x5a5   : > { %v8524_v14 = vpop.eup %8523  ;;  %7497 = vmatpush3.xpose.msk.msra.mxu0 %vm1205_vm3, %v1685_v53 }
 0x5a6   : > { %v1475_v16 = vmul.f32 %v8524_v14, %v9135_v29  ;;  %8113 = vmatprep.subr.bf16.mxu0 %v8769_v48  ;;  %v1783_v40 = vpop.permute.xlu1 %1782 }
 0x5a8   : > { %7484 = vmatmul.mubr.msk.f32.vlgmr.msra.gmra.mrb[18].mxu1 %vm1411_vm6, %v1475_v16 }
 0x5a9   : > { %8112 = vmatpush3.bf16.xpose.msk.msra.mxu1 %vm9050_vm4, %v8110_v18  ;;  %7486 = vmatprep.mubr.msk.f32.mxu1 %vm8771_vm2, %v8772_v62 }
 0x5aa   : > { %7511 = vmatprep.subr.mxu1 %v8772_v62 }
 0x5b1   : > { %7512 = vmatpush3.xpose.msk.msra.mxu1 %vm1205_vm3, %v1789_v17 }
 0x5b2   : > { %8116 = vmatprep.subr.bf16.mxu1 %v8769_v48 }
 0x5c3   : > { %v1456_v22 = vpop.xlane.xlu0 %1455 }
 0x5c4   : > { %8525 = vrcp.f32 %v1456_v22 }
 0x5c7   : > { %v1462_v23 = vpop.xlane.xlu0 %1461 }
 0x5c8   : > { %8527 = vrcp.f32 %v1462_v23 }
 0x5cb   : > { %v1465_v27 = vpop.xlane.xlu0 %1464 }
 0x5cc   : > { %8529 = vrcp.f32 %v1465_v27 }
 0x5ce   : > { %v8526_v28 = vpop.eup %8525 }
 0x5cf   : > { %v1474_v29 = vmul.f32 %v8526_v28, %v8514_v38  ;;  %v1679_v35 = vpop.permute.xlu0 %1678 }
 0x5d1   : > { %7475 = vmatmul.mubr.msk.f32.gmra.mrb[10].mxu0 %vm1411_vm6, %v1474_v29 }
 0x5d2   : > { %v8528_v30 = vpop.eup %8527  ;;  %7498 = vmatprep.mubr.msk.f32.mxu0 %vm8771_vm2, %v8772_v62 }
 0x5d3   : > { %v1476_v31 = vmul.f32 %v8528_v30, %v8516_v42  ;;  %v1781_v37 = vpop.permute.xlu0 %1780 }
 0x5d5   : > { %7487 = vmatmul.mubr.msk.f32.gmra.mrb[20].mxu1 %vm1411_vm6, %v1476_v31  ;;  %7499 = vmatmul.mubr.msk.f32.vlgmr.msra.gmra.mrb[12].mxu0 %vm1205_vm3, %v1675_v54 }
 0x5d6   : > { %v8530_v33 = vpop.eup %8529  ;;  %7489 = vmatprep.mubr.msk.f32.mxu1 %vm8771_vm2, %v8772_v62  ;;  %7501 = vmatprep.mubr.msk.f32.mxu0 %vm8771_vm2, %v8772_v62 }
 0x5d7   : > { %v1477_v34 = vmul.f32 %v8530_v33, %v8518_v52 }
 0x5d9   : > { %7490 = vmatmul.mubr.msk.f32.gmra.mrb[22].mxu1 %vm1411_vm6, %v1477_v34  ;;  %7502 = vmatmul.mubr.msk.f32.gmra.mrb[14].mxu0 %vm1205_vm3, %v1677_v21 }
 0x5da   : > { %7504 = vmatprep.mubr.msk.f32.mxu0 %vm8771_vm2, %v8772_v62  ;;  %7513 = vmatprep.mubr.msk.f32.mxu1 %vm8771_vm2, %v8772_v62 }
 0x5dd   : > { %7505 = vmatmul.mubr.msk.f32.gmra.mrb[16].mxu0 %vm1205_vm3, %v1679_v35  ;;  %7514 = vmatmul.mubr.msk.f32.vlgmr.msra.gmra.mrb[24].mxu1 %vm1205_vm3, %v1779_v36 }
 0x5de   : > { %7516 = vmatprep.mubr.msk.f32.mxu1 %vm8771_vm2, %v8772_v62  ;;  %7528 = vmatprep.mubr.msk.f32.mxu0 %vm8771_vm2, %v8772_v62 }
 0x5e1   : > { %7517 = vmatmul.mubr.msk.f32.gmra.mrb[26].mxu1 %vm1205_vm3, %v1781_v37 }
 0x5e2   : > { %7519 = vmatprep.mubr.msk.f32.mxu1 %vm8771_vm2, %v8772_v62 }
 0x5e5   : > { %7520 = vmatmul.mubr.msk.f32.gmra.mrb[28].mxu1 %vm1205_vm3, %v1783_v40 }
 0x5e6   : > { %7543 = vmatprep.mubr.msk.f32.mxu1 %vm8771_vm2, %v8772_v62 }
 0x66f   : > { %v9210_v41 = vpop.f32.mrb[6].mxu0 }
 0x670   : > { %v7470_v43 = vpop.f32.mrb[7].mxu0 }
 0x673   : > { %v9212_v44 = vpop.f32.mrb[8].mxu0 }
 0x674   : > { %v7473_v32 = vpop.f32.mrb[9].mxu0 }
 0x67b   : > { %v9214_v45 = vpop.f32.mrb[18].mxu1 }
 0x67c   : > { %v7485_v46 = vpop.f32.mrb[19].mxu1 }
 0x6a4   : > { %v9216_v49 = vpop.f32.mrb[10].mxu0 }
 0x6a5   : > { %v7476_v38 = vpop.f32.mrb[11].mxu0 }
 0x6a8   : > { %v9218_v39 = vpop.f32.mrb[20].mxu1  ;;  %v1764_v42 = vpop.f32.mrb[12].mxu0 }
 0x6a9   : > { %v1882_v50 = vmul.f32 0.35355338, %v1764_v42  ;;  %v7488_v52 = vpop.f32.mrb[21].mxu1  ;;  %v7500_v51 = vpop.f32.mrb[13].mxu0 }
 0x6ab   : > { %v1888_v47 = vadd.f32 %v1882_v50, %v9088_v24 }
 0x6ac   : > { %v9221_v53 = vpop.f32.mrb[22].mxu1  ;;  %v1769_v54 = vpop.f32.mrb[14].mxu0 }
 0x6ad   : > { %v1883_v56 = vmul.f32 0.35355338, %v1769_v54  ;;  %v7491_v58 = vpop.f32.mrb[23].mxu1  ;;  %v7503_v60 = vpop.f32.mrb[15].mxu0  ;;  %v1894_v63 = vsel %vm1411_vm6, %v1888_v47, -inf }
 0x6ae   : > { %1895 = vmax.xlane.f32.xlu0 %v1894_v63 }
 0x6af   : > { %v1889_v0 = vadd.f32 %v1883_v56, %v9088_v24 }
 0x6b0   : > { %v1774_v5 = vpop.f32.mrb[16].mxu0  ;;  %v1868_v6 = vpop.f32.mrb[24].mxu1 }
 0x6b1   : > { %v1884_v7 = vmul.f32 0.35355338, %v1774_v5  ;;  %v1885_v9 = vmul.f32 0.35355338, %v1868_v6  ;;  %v7506_v10 = vpop.f32.mrb[17].mxu0  ;;  %v7515_v11 = vpop.f32.mrb[25].mxu1 }
 0x6b2   : > { %v1897_v12 = vsel %vm1411_vm6, %v1889_v0, -inf }
 0x6b3   : > { %1898 = vmax.xlane.f32.xlu1 %v1897_v12  ;;  %v9227_v14 = vadd.f32 %v1884_v7, %v9088_v24  ;;  %v1891_v22 = vadd.f32 %v1885_v9, %v9088_v24 }
 0x6b4   : > { %v1873_v16 = vpop.f32.mrb[26].mxu1 }
 0x6b5   : > { %v1886_v18 = vmul.f32 0.35355338, %v1873_v16  ;;  %v7518_v17 = vpop.f32.mrb[27].mxu1  ;;  %v1900_v21 = vsel %vm1411_vm6, %v9227_v14, -inf  ;;  %v1903_v29 = vsel %vm1411_vm6, %v1891_v22, -inf }
 0x6b6   : > { %1901 = vmax.xlane.f32.xlu0 %v1900_v21 }
 0x6b7   : > { %v9234_v30 = vadd.f32 %v1886_v18, %v9088_v24 }
 0x6b8   : > { %v1878_v23 = vpop.f32.mrb[28].mxu1 }
 0x6b9   : > { %v1887_v27 = vmul.f32 0.35355338, %v1878_v23  ;;  %v7521_v28 = vpop.f32.mrb[29].mxu1  ;;  %v1906_v33 = vsel %vm1411_vm6, %v9234_v30, -inf }
 0x6ba   : > { %1904 = vmax.xlane.f32.xlu0 %v1903_v29 }
 0x6bb   : > { %v9237_v31 = vadd.f32 %v1887_v27, %v9088_v24 }
 0x6bd   : > { %v1909_v34 = vsel %vm1411_vm6, %v9237_v31, -inf }
 0x6be   : > { %1907 = vmax.xlane.f32.xlu0 %v1906_v33  ;;  %1910 = vmax.xlane.f32.xlu1 %v1909_v34 }
 0x6cf   : > { %8366 = vrot.lane.b32.xlu1 %v9022_v59, %s10532_s21 }
 0x6d3   : > { %8371 = vrot.lane.b32.xlu1 %v9040_v3, %s10532_s21 }
 0x6d4   : > { %1964 = vrot.lane.b32.xlu0 %v9024_v61, %s10532_s21 }
 0x6d7   : > { %8376 = vrot.lane.b32.xlu1 %v9022_v59, %s10530_s23 }
 0x6d8   : > { %2166 = vrot.lane.b32.xlu0 %v9024_v61, %s10530_s23 }
 0x6db   : > { %2062 = vrot.lane.b32.xlu1 %v9044_v4, %s10532_s21  ;;  %s10534_s21 = smov 104  }
 0x6df   : > { %8381 = vrot.lane.b32.xlu1 %v9040_v3, %s10530_s23 }
 0x6e3   : > { %2156 = vrot.lane.b32.xlu1 %v9018_v57, %s10528_s26 }
 0x73b   : > { %v1896_v35 = vpop.xlane.xlu0 %1895 }
 0x73c   : > { %v1912_v36 = vsub.f32 %v1888_v47, %v1896_v35 }
 0x73e   : > { %v1918_v37 = vmul.f32 1.442695, %v1912_v36 }
 0x740   : > { %8531 = vpow2.f32 %v1918_v37  ;;  %v1899_v40 = vpop.xlane.xlu1 %1898 }
 0x741   : > { %v1913_v43 = vsub.f32 %v1889_v0, %v1899_v40 }
 0x743   : > { %v1920_v32 = vmul.f32 1.442695, %v1913_v43  ;;  %v1902_v46 = vpop.xlane.xlu0 %1901 }
 0x744   : > { %v1914_v21 = vsub.f32 %v9227_v14, %v1902_v46 }
 0x745   : > { %8533 = vpow2.f32 %v1920_v32 }
 0x747   : > { %v1905_v38 = vpop.xlane.xlu0 %1904 }
 0x748   : > { %v1915_v42 = vsub.f32 %v1891_v22, %v1905_v38  ;;  %v1922_v22 = vmul.f32 1.442695, %v1914_v21 }
 0x74a   : > { %v9259_v50 = vpop.eup %8531  ;;  %v1924_v52 = vmul.f32 1.442695, %v1915_v42 }
 0x74b   : > { %v1911_v51 = vpop.xlane.xlu1 %1910  ;;  %v1930_v54 = vsel %vm1411_vm6, %v9259_v50, 0.0  ;;  %v1908_v0 = vpop.xlane.xlu0 %1907 }
 0x74c   : > { %8535 = vpow2.f32 %v1924_v52  ;;  %1931 = vadd.xlane.f32.xlu0 %v1930_v54  ;;  %v1916_v23 = vsub.f32 %v9234_v30, %v1908_v0  ;;  %v1917_v28 = vsub.f32 %v9237_v31, %v1911_v51 }
 0x74d   : > { %8537 = vpow2.f32 %v1922_v22 }
 0x74e   : > { %v1926_v27 = vmul.f32 1.442695, %v1916_v23  ;;  %v1928_v29 = vmul.f32 1.442695, %v1917_v28 }
 0x74f   : > { %v9263_v56 = vpop.eup %8533  ;;  %v8367_v47 = vpop.permute.xlu1 %8366 }
 0x750   : > { %v8369_v58 = vunpack.i.h.bf16 %v8367_v47  ;;  %v8368_v60 = vunpack.i.l.bf16 %v8367_v47  ;;  %v1933_v63 = vsel %vm1411_vm6, %v9263_v56, 0.0  ;;  %v1965_v12 = vpop.permute.xlu0 %1964  ;;  %8539 = vpow2.f32 %v1926_v27 }
 0x751   : > { %1934 = vadd.xlane.f32.xlu1 %v1933_v63  ;;  %8541 = vpow2.f32 %v1928_v29 }
 0x752   : > { %v8114_v5 = vpack.c.bf16 %v8369_v58, %v8368_v60 }
 0x753   : > { %v8372_v6 = vpop.permute.xlu1 %8371 }
 0x754   : > { %v8374_v7 = vunpack.i.h.bf16 %v8372_v6  ;;  %v8373_v9 = vunpack.i.l.bf16 %v8372_v6  ;;  %8115 = vmatpush3.bf16.msra.mxu0 %v8114_v5  ;;  %v2167_v37 = vpop.permute.xlu0 %2166 }
 0x755   : > { %7526 = vmatprep.subr.mxu0 %v8772_v62 }
 0x756   : > { %v9268_v10 = vpop.eup %8535  ;;  %v8117_v11 = vpack.c.bf16 %v8374_v7, %v8373_v9 }
 0x757   : > { %v8377_v16 = vpop.permute.xlu1 %8376  ;;  %v1939_v18 = vsel %vm1411_vm6, %v9268_v10, 0.0  ;;  %v8538_v33 = vpop.eup %8537 }
 0x758   : > { %1940 = vadd.xlane.f32.xlu1 %v1939_v18  ;;  %7527 = vmatpush3.msra.mxu0 %v1965_v12  ;;  %v1936_v34 = vsel %vm1411_vm6, %v8538_v33, 0.0  ;;  %v8379_v46 = vunpack.i.h.bf16 %v8377_v16  ;;  %v8378_v38 = vunpack.i.l.bf16 %v8377_v16 }
 0x759   : > { %8118 = vmatpush3.bf16.msra.mxu1 %v8117_v11  ;;  %8119 = vmatprep.subr.bf16.mxu0 %v8769_v48 }
 0x75a   : > { %7541 = vmatprep.subr.mxu1 %v8772_v62  ;;  %v8540_v14 = vpop.eup %8539  ;;  %v8120_v54 = vpack.c.bf16 %v8379_v46, %v8378_v38 }
 0x75b   : > { %v2063_v17 = vpop.permute.xlu1 %2062  ;;  %v1942_v35 = vsel %vm1411_vm6, %v8540_v14, 0.0  ;;  %v8542_v36 = vpop.eup %8541 }
 0x75c   : > { %v1945_v30 = vsel %vm1411_vm6, %v8542_v36, 0.0 }
 0x75d   : > { %7542 = vmatpush3.msra.mxu1 %v2063_v17 }
 0x75e   : > { %8123 = vmatprep.subr.bf16.mxu1 %v8769_v48 }
 0x75f   : > { %v8382_v31 = vpop.permute.xlu1 %8381 }
 0x760   : > { %v8383_v60 = vunpack.i.l.bf16 %v8382_v31 }
 0x762   : > { %2158 = vrot.lane.b32.xlu0 %v9016_v55, %s10528_s26 }
 0x763   : > { %v2157_v43 = vpop.permute.xlu1 %2156 }
 0x769   : > { %2270 = vrot.lane.b32.xlu1 %v9044_v4, %s10530_s23  ;;  %s10536_s23 = smov 72  }
 0x76d   : > { %2260 = vrot.lane.b32.xlu1 %v9034_v1, %s10528_s26 }
 0x771   : > { %2264 = vrot.lane.b32.xlu1 %v9044_v4, %s10528_s26 }
 0x781   : > { %1937 = vadd.xlane.f32.xlu0 %v1936_v34 }
 0x785   : > { %1943 = vadd.xlane.f32.xlu0 %v1942_v35 }
 0x789   : > { %1946 = vadd.xlane.f32.xlu0 %v1945_v30 }
 0x79f   : > { %2160 = vrot.lane.b32.xlu0 %v9024_v61, %s10528_s26 }
 0x7a3   : > { %2262 = vrot.lane.b32.xlu0 %v9036_v2, %s10528_s26  ;;  %s10538_s26 = smov 48  }
 0x7d9   : > { %v1932_v40 = vpop.xlane.xlu0 %1931 }
 0x7da   : > { %8543 = vrcp.f32 %v1932_v40 }
 0x7dd   : > { %v2159_v6 = vpop.permute.xlu0 %2158 }
 0x7de   : > { %v1935_v32 = vpop.xlane.xlu1 %1934 }
 0x7df   : > { %8545 = vrcp.f32 %v1935_v32 }
 0x7e4   : > { %v8544_v42 = vpop.eup %8543 }
 0x7e5   : > { %v1954_v52 = vmul.f32 %v8544_v42, %v9259_v50  ;;  %v1941_v51 = vpop.xlane.xlu1 %1940  ;;  %v8384_v50 = vunpack.i.h.bf16 %v8382_v31 }
 0x7e6   : > { %8547 = vrcp.f32 %v1941_v51 }
 0x7e7   : > { %7529 = vmatmul.mubr.msk.f32.vlgmr.msra.gmra.mrb[18].mxu0 %vm1411_vm6, %v1954_v52  ;;  %v8124_v5 = vpack.c.bf16 %v8384_v50, %v8383_v60 }
 0x7e8   : > { %8122 = vmatpush3.bf16.xpose.msk.msra.mxu0 %vm9050_vm4, %v8120_v54  ;;  %7531 = vmatprep.mubr.msk.f32.mxu0 %vm8771_vm2, %v8772_v62 }
 0x7e9   : > { %v8546_v47 = vpop.eup %8545  ;;  %7556 = vmatprep.subr.mxu0 %v8772_v62 }
 0x7ea   : > { %v1955_v58 = vmul.f32 %v8546_v47, %v9263_v56  ;;  %v2271_v56 = vpop.permute.xlu1 %2270 }
 0x7ec   : > { %7532 = vmatmul.mubr.msk.f32.gmra.mrb[20].mxu0 %vm1411_vm6, %v1955_v58 }
 0x7ed   : > { %7534 = vmatprep.mubr.msk.f32.mxu0 %vm8771_vm2, %v8772_v62 }
 0x7ee   : > { %v2261_v23 = vpop.permute.xlu1 %2260 }
 0x7f0   : > { %v8548_v63 = vpop.eup %8547  ;;  %7557 = vmatpush3.xpose.msk.msra.mxu0 %vm1205_vm3, %v2167_v37 }
 0x7f1   : > { %v1957_v0 = vmul.f32 %v8548_v63, %v9268_v10  ;;  %8127 = vmatprep.subr.bf16.mxu0 %v8769_v48 }
 0x7f2   : > { %v2265_v28 = vpop.permute.xlu1 %2264 }
 0x7f3   : > { %7544 = vmatmul.mubr.msk.f32.vlgmr.msra.gmra.mrb[30].mxu1 %vm1411_vm6, %v1957_v0 }
 0x7f4   : > { %8126 = vmatpush3.bf16.xpose.msk.msra.mxu1 %vm9050_vm4, %v8124_v5  ;;  %7546 = vmatprep.mubr.msk.f32.mxu1 %vm8771_vm2, %v8772_v62 }
 0x7f5   : > { %7571 = vmatprep.subr.mxu1 %v8772_v62 }
 0x7fc   : > { %7572 = vmatpush3.xpose.msk.msra.mxu1 %vm1205_vm3, %v2271_v56 }
 0x7fd   : > { %8130 = vmatprep.subr.bf16.mxu1 %v8769_v48 }
 0x80e   : > { %v1938_v7 = vpop.xlane.xlu0 %1937 }
 0x80f   : > { %8549 = vrcp.f32 %v1938_v7 }
 0x812   : > { %v1944_v9 = vpop.xlane.xlu0 %1943 }
 0x813   : > { %8551 = vrcp.f32 %v1944_v9 }
 0x816   : > { %v1947_v10 = vpop.xlane.xlu0 %1946 }
 0x817   : > { %8553 = vrcp.f32 %v1947_v10 }
 0x819   : > { %v8550_v11 = vpop.eup %8549 }
 0x81a   : > { %v1956_v12 = vmul.f32 %v8550_v11, %v8538_v33  ;;  %v2161_v22 = vpop.permute.xlu0 %2160 }
 0x81c   : > { %7535 = vmatmul.mubr.msk.f32.gmra.mrb[22].mxu0 %vm1411_vm6, %v1956_v12 }
 0x81d   : > { %v8552_v16 = vpop.eup %8551  ;;  %7558 = vmatprep.mubr.msk.f32.mxu0 %vm8771_vm2, %v8772_v62 }
 0x81e   : > { %v1958_v18 = vmul.f32 %v8552_v16, %v8540_v14  ;;  %v2263_v27 = vpop.permute.xlu0 %2262 }
 0x820   : > { %7547 = vmatmul.mubr.msk.f32.gmra.mrb[32].mxu1 %vm1411_vm6, %v1958_v18  ;;  %7559 = vmatmul.mubr.msk.f32.vlgmr.msra.gmra.mrb[24].mxu0 %vm1205_vm3, %v2157_v43 }
 0x821   : > { %v8554_v17 = vpop.eup %8553  ;;  %7549 = vmatprep.mubr.msk.f32.mxu1 %vm8771_vm2, %v8772_v62  ;;  %7561 = vmatprep.mubr.msk.f32.mxu0 %vm8771_vm2, %v8772_v62 }
 0x822   : > { %v1959_v21 = vmul.f32 %v8554_v17, %v8542_v36 }
 0x824   : > { %7550 = vmatmul.mubr.msk.f32.gmra.mrb[34].mxu1 %vm1411_vm6, %v1959_v21  ;;  %7562 = vmatmul.mubr.msk.f32.gmra.mrb[26].mxu0 %vm1205_vm3, %v2159_v6 }
 0x825   : > { %7564 = vmatprep.mubr.msk.f32.mxu0 %vm8771_vm2, %v8772_v62  ;;  %7573 = vmatprep.mubr.msk.f32.mxu1 %vm8771_vm2, %v8772_v62 }
 0x828   : > { %7565 = vmatmul.mubr.msk.f32.gmra.mrb[28].mxu0 %vm1205_vm3, %v2161_v22  ;;  %7574 = vmatmul.mubr.msk.f32.vlgmr.msra.gmra.mrb[36].mxu1 %vm1205_vm3, %v2261_v23 }
 0x829   : > { %7576 = vmatprep.mubr.msk.f32.mxu1 %vm8771_vm2, %v8772_v62  ;;  %7588 = vmatprep.mubr.msk.f32.mxu0 %vm8771_vm2, %v8772_v62 }
 0x82c   : > { %7577 = vmatmul.mubr.msk.f32.gmra.mrb[38].mxu1 %vm1205_vm3, %v2263_v27 }
 0x82d   : > { %7579 = vmatprep.mubr.msk.f32.mxu1 %vm8771_vm2, %v8772_v62 }
 0x830   : > { %7580 = vmatmul.mubr.msk.f32.gmra.mrb[40].mxu1 %vm1205_vm3, %v2265_v28 }
 0x831   : > { %7603 = vmatprep.mubr.msk.f32.mxu1 %vm8771_vm2, %v8772_v62 }
 0x8ba   : > { %v9342_v29 = vpop.f32.mrb[18].mxu0 }
 0x8bb   : > { %v7530_v33 = vpop.f32.mrb[19].mxu0 }
 0x8bf   : > { %v9344_v34 = vpop.f32.mrb[20].mxu0 }
 0x8c0   : > { %v7533_v14 = vpop.f32.mrb[21].mxu0 }
 0x8c6   : > { %v9346_v35 = vpop.f32.mrb[30].mxu1 }
 0x8c7   : > { %v7545_v36 = vpop.f32.mrb[31].mxu1 }
 0x8ef   : > { %v9348_v30 = vpop.f32.mrb[22].mxu0 }
 0x8f0   : > { %v7536_v31 = vpop.f32.mrb[23].mxu0 }
 0x8f3   : > { %v9350_v37 = vpop.f32.mrb[32].mxu1  ;;  %v2246_v40 = vpop.f32.mrb[24].mxu0 }
 0x8f4   : > { %v2364_v43 = vmul.f32 0.35355338, %v2246_v40  ;;  %v7548_v32 = vpop.f32.mrb[33].mxu1  ;;  %v7560_v46 = vpop.f32.mrb[25].mxu0 }
 0x8f6   : > { %v2370_v38 = vadd.f32 %v2364_v43, %v9088_v24 }
 0x8f7   : > { %v9353_v42 = vpop.f32.mrb[34].mxu1  ;;  %v2251_v52 = vpop.f32.mrb[26].mxu0 }
 0x8f8   : > { %v2365_v51 = vmul.f32 0.35355338, %v2251_v52  ;;  %v7551_v54 = vpop.f32.mrb[35].mxu1  ;;  %v7563_v47 = vpop.f32.mrb[27].mxu0  ;;  %v2376_v58 = vsel %vm1411_vm6, %v2370_v38, -inf }
 0x8f9   : > { %2377 = vmax.xlane.f32.xlu0 %v2376_v58 }
 0x8fa   : > { %v2371_v50 = vadd.f32 %v2365_v51, %v9088_v24 }
 0x8fb   : > { %v2256_v60 = vpop.f32.mrb[28].mxu0  ;;  %v2350_v63 = vpop.f32.mrb[36].mxu1 }
 0x8fc   : > { %v2366_v0 = vmul.f32 0.35355338, %v2256_v60  ;;  %v2367_v5 = vmul.f32 0.35355338, %v2350_v63  ;;  %v7566_v56 = vpop.f32.mrb[29].mxu0  ;;  %v7575_v6 = vpop.f32.mrb[37].mxu1 }
 0x8fd   : > { %v2379_v7 = vsel %vm1411_vm6, %v2371_v50, -inf }
 0x8fe   : > { %2380 = vmax.xlane.f32.xlu1 %v2379_v7  ;;  %v9359_v9 = vadd.f32 %v2366_v0, %v9088_v24  ;;  %v2373_v18 = vadd.f32 %v2367_v5, %v9088_v24 }
 0x8ff   : > { %v2355_v10 = vpop.f32.mrb[38].mxu1 }
 0x900   : > { %v2368_v11 = vmul.f32 0.35355338, %v2355_v10  ;;  %v7578_v12 = vpop.f32.mrb[39].mxu1  ;;  %v2382_v16 = vsel %vm1411_vm6, %v9359_v9, -inf  ;;  %v2385_v23 = vsel %vm1411_vm6, %v2373_v18, -inf }
 0x901   : > { %2383 = vmax.xlane.f32.xlu0 %v2382_v16 }
 0x902   : > { %v9366_v27 = vadd.f32 %v2368_v11, %v9088_v24 }
 0x903   : > { %v2360_v17 = vpop.f32.mrb[40].mxu1 }
 0x904   : > { %v2369_v21 = vmul.f32 0.35355338, %v2360_v17  ;;  %v7581_v22 = vpop.f32.mrb[41].mxu1  ;;  %v2388_v33 = vsel %vm1411_vm6, %v9366_v27, -inf }
 0x905   : > { %2386 = vmax.xlane.f32.xlu0 %v2385_v23 }
 0x906   : > { %v9369_v28 = vadd.f32 %v2369_v21, %v9088_v24 }
 0x908   : > { %v2391_v14 = vsel %vm1411_vm6, %v9369_v28, -inf }
 0x909   : > { %2389 = vmax.xlane.f32.xlu0 %v2388_v33  ;;  %2392 = vmax.xlane.f32.xlu1 %v2391_v14 }
 0x91a   : > { %8386 = vrot.lane.b32.xlu1 %v9022_v59, %s10538_s26 }
 0x91e   : > { %8391 = vrot.lane.b32.xlu1 %v9040_v3, %s10538_s26 }
 0x91f   : > { %2446 = vrot.lane.b32.xlu0 %v9024_v61, %s10538_s26 }
 0x922   : > { %8396 = vrot.lane.b32.xlu1 %v9022_v59, %s10536_s23 }
 0x923   : > { %2648 = vrot.lane.b32.xlu0 %v9024_v61, %s10536_s23 }
 0x926   : > { %2544 = vrot.lane.b32.xlu1 %v9044_v4, %s10538_s26  ;;  %s10550_s26 = smov 16  }
 0x92a   : > { %8401 = vrot.lane.b32.xlu1 %v9040_v3, %s10536_s23 }
 0x92e   : > { %2638 = vrot.lane.b32.xlu1 %v9018_v57, %s10534_s21 }
 0x986   : > { %v2378_v36 = vpop.xlane.xlu0 %2377 }
 0x987   : > { %v2394_v31 = vsub.f32 %v2370_v38, %v2378_v36 }
 0x989   : > { %v2400_v40 = vmul.f32 1.442695, %v2394_v31 }
 0x98b   : > { %8555 = vpow2.f32 %v2400_v40  ;;  %v2381_v43 = vpop.xlane.xlu1 %2380 }
 0x98c   : > { %v2395_v32 = vsub.f32 %v2371_v50, %v2381_v43 }
 0x98e   : > { %v2402_v46 = vmul.f32 1.442695, %v2395_v32  ;;  %v2384_v52 = vpop.xlane.xlu0 %2383 }
 0x98f   : > { %v2396_v23 = vsub.f32 %v9359_v9, %v2384_v52 }
 0x990   : > { %8557 = vpow2.f32 %v2402_v46 }
 0x991   : > { %v2404_v33 = vmul.f32 1.442695, %v2396_v23 }
 0x992   : > { %v2387_v51 = vpop.xlane.xlu0 %2386 }
 0x993   : > { %v2397_v54 = vsub.f32 %v2373_v18, %v2387_v51 }
 0x995   : > { %v9391_v47 = vpop.eup %8555  ;;  %v2406_v58 = vmul.f32 1.442695, %v2397_v54 }
 0x996   : > { %v2393_v60 = vpop.xlane.xlu1 %2392  ;;  %v2412_v63 = vsel %vm1411_vm6, %v9391_v47, 0.0  ;;  %v2390_v56 = vpop.xlane.xlu0 %2389 }
 0x997   : > { %8559 = vpow2.f32 %v2406_v58  ;;  %2413 = vadd.xlane.f32.xlu0 %v2412_v63  ;;  %v2398_v14 = vsub.f32 %v9366_v27, %v2390_v56  ;;  %v2399_v31 = vsub.f32 %v9369_v28, %v2393_v60 }
 0x998   : > { %8561 = vpow2.f32 %v2404_v33 }
 0x999   : > { %v2408_v36 = vmul.f32 1.442695, %v2398_v14 }
 0x99a   : > { %v9395_v57 = vpop.eup %8557  ;;  %v8387_v38 = vpop.permute.xlu1 %8386 }
 0x99b   : > { %v8389_v0 = vunpack.i.h.bf16 %v8387_v38  ;;  %v8388_v5 = vunpack.i.l.bf16 %v8387_v38  ;;  %v2415_v50 = vsel %vm1411_vm6, %v9395_v57, 0.0  ;;  %v2447_v18 = vpop.permute.xlu0 %2446  ;;  %8563 = vpow2.f32 %v2408_v36 }
 0x99c   : > { %2416 = vadd.xlane.f32.xlu1 %v2415_v50 }
 0x99d   : > { %v8128_v6 = vpack.c.bf16 %v8389_v0, %v8388_v5 }
 0x99e   : > { %v8392_v7 = vpop.permute.xlu1 %8391 }
 0x99f   : > { %v8394_v10 = vunpack.i.h.bf16 %v8392_v7  ;;  %v8393_v11 = vunpack.i.l.bf16 %v8392_v7  ;;  %8129 = vmatpush3.bf16.msra.mxu0 %v8128_v6  ;;  %v2649_v52 = vpop.permute.xlu0 %2648 }
 0x9a0   : > { %7586 = vmatprep.subr.mxu0 %v8772_v62 }
 0x9a1   : > { %v9400_v12 = vpop.eup %8559  ;;  %v8131_v16 = vpack.c.bf16 %v8394_v10, %v8393_v11 }
 0x9a2   : > { %v8397_v17 = vpop.permute.xlu1 %8396  ;;  %v2421_v21 = vsel %vm1411_vm6, %v9400_v12, 0.0  ;;  %v8562_v40 = vpop.eup %8561 }
 0x9a3   : > { %2422 = vadd.xlane.f32.xlu1 %v2421_v21  ;;  %7587 = vmatpush3.msra.mxu0 %v2447_v18  ;;  %v2418_v43 = vsel %vm1411_vm6, %v8562_v40, 0.0  ;;  %v8399_v60 = vunpack.i.h.bf16 %v8397_v17  ;;  %v8398_v63 = vunpack.i.l.bf16 %v8397_v17 }
 0x9a4   : > { %8132 = vmatpush3.bf16.msra.mxu1 %v8131_v16  ;;  %8133 = vmatprep.subr.bf16.mxu0 %v8769_v48 }
 0x9a5   : > { %7601 = vmatprep.subr.mxu1 %v8772_v62  ;;  %v8564_v9 = vpop.eup %8563  ;;  %v8134_v50 = vpack.c.bf16 %v8399_v60, %v8398_v63 }
 0x9a6   : > { %v2545_v22 = vpop.permute.xlu1 %2544  ;;  %v2424_v32 = vsel %vm1411_vm6, %v8564_v9, 0.0 }
 0x9a8   : > { %7602 = vmatpush3.msra.mxu1 %v2545_v22 }
 0x9a9   : > { %8137 = vmatprep.subr.bf16.mxu1 %v8769_v48 }
 0x9aa   : > { %v8402_v28 = vpop.permute.xlu1 %8401 }
 0x9ab   : > { %v8403_v56 = vunpack.i.l.bf16 %v8402_v28 }
 0x9ad   : > { %2640 = vrot.lane.b32.xlu0 %v9016_v55, %s10534_s21  ;;  %v2410_v55 = vmul.f32 1.442695, %v2399_v31 }
 0x9ae   : > { %v2639_v54 = vpop.permute.xlu1 %2638 }
 0x9af   : > { %8565 = vpow2.f32 %v2410_v55 }
 0x9b4   : > { %2752 = vrot.lane.b32.xlu1 %v9044_v4, %s10536_s23  ;;  %s10540_s23 = smov 8  }
 0x9b8   : > { %2642 = vrot.lane.b32.xlu1 %v9024_v61, %s10534_s21 }
 0x9b9   : > { %v8566_v46 = vpop.eup %8565 }
 0x9ba   : > { %v2427_v27 = vsel %vm1411_vm6, %v8566_v46, 0.0 }
 0x9bc   : > { %2746 = vrot.lane.b32.xlu1 %v9044_v4, %s10534_s21 }
 0x9cc   : > { %2419 = vadd.xlane.f32.xlu0 %v2418_v43 }
 0x9d0   : > { %2425 = vadd.xlane.f32.xlu0 %v2424_v32 }
 0x9d4   : > { %2428 = vadd.xlane.f32.xlu0 %v2427_v27 }
 0x9ea   : > { %2742 = vrot.lane.b32.xlu0 %v9034_v1, %s10534_s21 }
 0x9ee   : > { %2744 = vrot.lane.b32.xlu0 %v9036_v2, %s10534_s21  ;;  %s10542_s21 = smov 40  }
 0xa24   : > { %v2414_v51 = vpop.xlane.xlu0 %2413 }
 0xa25   : > { %8567 = vrcp.f32 %v2414_v51 }
 0xa28   : > { %v2641_v11 = vpop.permute.xlu0 %2640 }
 0xa29   : > { %v2417_v58 = vpop.xlane.xlu1 %2416 }
 0xa2a   : > { %8569 = vrcp.f32 %v2417_v58 }
 0xa2f   : > { %v8568_v38 = vpop.eup %8567 }
 0xa30   : > { %v2436_v0 = vmul.f32 %v8568_v38, %v9391_v47  ;;  %v2423_v5 = vpop.xlane.xlu1 %2422  ;;  %v8404_v47 = vunpack.i.h.bf16 %v8402_v28 }
 0xa31   : > { %8571 = vrcp.f32 %v2423_v5 }
 0xa32   : > { %7589 = vmatmul.mubr.msk.f32.vlgmr.msra.gmra.mrb[30].mxu0 %vm1411_vm6, %v2436_v0  ;;  %v8138_v10 = vpack.c.bf16 %v8404_v47, %v8403_v56 }
 0xa33   : > { %8136 = vmatpush3.bf16.xpose.msk.msra.mxu0 %vm9050_vm4, %v8134_v50  ;;  %7591 = vmatprep.mubr.msk.f32.mxu0 %vm8771_vm2, %v8772_v62 }
 0xa34   : > { %v8570_v1 = vpop.eup %8569  ;;  %7616 = vmatprep.subr.mxu0 %v8772_v62 }
 0xa35   : > { %v2437_v2 = vmul.f32 %v8570_v1, %v9395_v57  ;;  %v2753_v57 = vpop.permute.xlu1 %2752 }
 0xa37   : > { %7592 = vmatmul.mubr.msk.f32.gmra.mrb[32].mxu0 %vm1411_vm6, %v2437_v2 }
 0xa38   : > { %7594 = vmatprep.mubr.msk.f32.mxu0 %vm8771_vm2, %v8772_v62 }
 0xa39   : > { %v2643_v31 = vpop.permute.xlu1 %2642 }
 0xa3b   : > { %v8572_v6 = vpop.eup %8571  ;;  %7617 = vmatpush3.xpose.msk.msra.mxu0 %vm1205_vm3, %v2649_v52 }
 0xa3c   : > { %v2439_v7 = vmul.f32 %v8572_v6, %v9400_v12  ;;  %8141 = vmatprep.subr.bf16.mxu0 %v8769_v48 }
 0xa3e   : > { %7604 = vmatmul.mubr.msk.f32.vlgmr.msra.gmra.mrb[42].mxu1 %vm1411_vm6, %v2439_v7 }
 0xa3f   : > { %8140 = vmatpush3.bf16.xpose.msk.msra.mxu1 %vm9050_vm4, %v8138_v10  ;;  %7606 = vmatprep.mubr.msk.f32.mxu1 %vm8771_vm2, %v8772_v62 }
 0xa40   : > { %7631 = vmatprep.subr.mxu1 %v8772_v62 }
 0xa47   : > { %7632 = vmatpush3.xpose.msk.msra.mxu1 %vm1205_vm3, %v2753_v57 }
 0xa48   : > { %8144 = vmatprep.subr.bf16.mxu1 %v8769_v48 }
 0xa59   : > { %v2420_v12 = vpop.xlane.xlu0 %2419 }
 0xa5a   : > { %8573 = vrcp.f32 %v2420_v12 }
 0xa5d   : > { %v2426_v16 = vpop.xlane.xlu0 %2425 }
 0xa5e   : > { %8575 = vrcp.f32 %v2426_v16 }
 0xa61   : > { %v2429_v18 = vpop.xlane.xlu0 %2428 }
 0xa62   : > { %8577 = vrcp.f32 %v2429_v18 }
 0xa64   : > { %v8574_v17 = vpop.eup %8573 }
 0xa65   : > { %v2438_v21 = vmul.f32 %v8574_v17, %v8562_v40  ;;  %v2743_v36 = vpop.permute.xlu0 %2742  ;;  %v2747_v40 = vpop.permute.xlu1 %2746 }
 0xa67   : > { %7595 = vmatmul.mubr.msk.f32.gmra.mrb[34].mxu0 %vm1411_vm6, %v2438_v21 }
 0xa68   : > { %v8576_v22 = vpop.eup %8575  ;;  %7618 = vmatprep.mubr.msk.f32.mxu0 %vm8771_vm2, %v8772_v62 }
 0xa69   : > { %v2440_v23 = vmul.f32 %v8576_v22, %v8564_v9  ;;  %v2745_v55 = vpop.permute.xlu0 %2744 }
 0xa6b   : > { %7607 = vmatmul.mubr.msk.f32.gmra.mrb[44].mxu1 %vm1411_vm6, %v2440_v23  ;;  %7619 = vmatmul.mubr.msk.f32.vlgmr.msra.gmra.mrb[36].mxu0 %vm1205_vm3, %v2639_v54 }
 0xa6c   : > { %v8578_v33 = vpop.eup %8577  ;;  %7609 = vmatprep.mubr.msk.f32.mxu1 %vm8771_vm2, %v8772_v62  ;;  %7621 = vmatprep.mubr.msk.f32.mxu0 %vm8771_vm2, %v8772_v62 }
 0xa6d   : > { %v2441_v14 = vmul.f32 %v8578_v33, %v8566_v46 }
 0xa6f   : > { %7610 = vmatmul.mubr.msk.f32.gmra.mrb[46].mxu1 %vm1411_vm6, %v2441_v14  ;;  %7622 = vmatmul.mubr.msk.f32.gmra.mrb[38].mxu0 %vm1205_vm3, %v2641_v11 }
 0xa70   : > { %7624 = vmatprep.mubr.msk.f32.mxu0 %vm8771_vm2, %v8772_v62  ;;  %7633 = vmatprep.mubr.msk.f32.mxu1 %vm8771_vm2, %v8772_v62 }
 0xa73   : > { %7625 = vmatmul.mubr.msk.f32.gmra.mrb[40].mxu0 %vm1205_vm3, %v2643_v31  ;;  %7634 = vmatmul.mubr.msk.f32.vlgmr.msra.gmra.mrb[48].mxu1 %vm1205_vm3, %v2743_v36 }
 0xa74   : > { %7636 = vmatprep.mubr.msk.f32.mxu1 %vm8771_vm2, %v8772_v62  ;;  %7648 = vmatprep.mubr.msk.f32.mxu0 %vm8771_vm2, %v8772_v62 }
 0xa77   : > { %7637 = vmatmul.mubr.msk.f32.gmra.mrb[50].mxu1 %vm1205_vm3, %v2745_v55 }
 0xa78   : > { %7639 = vmatprep.mubr.msk.f32.mxu1 %vm8771_vm2, %v8772_v62 }
 0xa7b   : > { %7640 = vmatmul.mubr.msk.f32.gmra.mrb[52].mxu1 %vm1205_vm3, %v2747_v40 }
 0xa7c   : > { %7663 = vmatprep.mubr.msk.f32.mxu1 %vm8771_vm2, %v8772_v62 }
 0xb05   : > { %v9474_v43 = vpop.f32.mrb[30].mxu0 }
 0xb06   : > { %v7590_v9 = vpop.f32.mrb[31].mxu0 }
 0xb0a   : > { %v9476_v32 = vpop.f32.mrb[32].mxu0 }
 0xb0b   : > { %v7593_v46 = vpop.f32.mrb[33].mxu0 }
 0xb11   : > { %v9478_v27 = vpop.f32.mrb[42].mxu1 }
 0xb12   : > { %v7605_v28 = vpop.f32.mrb[43].mxu1 }
 0xb3a   : > { %v9480_v52 = vpop.f32.mrb[34].mxu0 }
 0xb3b   : > { %v7596_v51 = vpop.f32.mrb[35].mxu0 }
 0xb3e   : > { %v9482_v54 = vpop.f32.mrb[44].mxu1  ;;  %v2728_v58 = vpop.f32.mrb[36].mxu0 }
 0xb3f   : > { %v2846_v60 = vmul.f32 0.35355338, %v2728_v58  ;;  %v7608_v63 = vpop.f32.mrb[45].mxu1  ;;  %v7620_v38 = vpop.f32.mrb[37].mxu0 }
 0xb41   : > { %v2852_v0 = vadd.f32 %v2846_v60, %v9088_v24 }
 0xb42   : > { %v9485_v5 = vpop.f32.mrb[46].mxu1  ;;  %v2733_v50 = vpop.f32.mrb[38].mxu0 }
 0xb43   : > { %v2847_v1 = vmul.f32 0.35355338, %v2733_v50  ;;  %v7611_v2 = vpop.f32.mrb[47].mxu1  ;;  %v7623_v47 = vpop.f32.mrb[39].mxu0  ;;  %v2858_v56 = vsel %vm1411_vm6, %v2852_v0, -inf }
 0xb44   : > { %2859 = vmax.xlane.f32.xlu0 %v2858_v56 }
 0xb45   : > { %v2853_v6 = vadd.f32 %v2847_v1, %v9088_v24 }
 0xb46   : > { %v2738_v7 = vpop.f32.mrb[40].mxu0  ;;  %v2832_v10 = vpop.f32.mrb[48].mxu1 }
 0xb47   : > { %v2848_v57 = vmul.f32 0.35355338, %v2738_v7  ;;  %v2849_v11 = vmul.f32 0.35355338, %v2832_v10  ;;  %v7626_v12 = vpop.f32.mrb[41].mxu0  ;;  %v7635_v16 = vpop.f32.mrb[49].mxu1 }
 0xb48   : > { %v2861_v18 = vsel %vm1411_vm6, %v2853_v6, -inf }
 0xb49   : > { %2862 = vmax.xlane.f32.xlu1 %v2861_v18  ;;  %v2854_v17 = vadd.f32 %v2848_v57, %v9088_v24  ;;  %v2855_v14 = vadd.f32 %v2849_v11, %v9088_v24 }
 0xb4a   : > { %v2837_v21 = vpop.f32.mrb[50].mxu1 }
 0xb4b   : > { %v2850_v22 = vmul.f32 0.35355338, %v2837_v21  ;;  %v7638_v23 = vpop.f32.mrb[51].mxu1  ;;  %v2864_v33 = vsel %vm1411_vm6, %v2854_v17, -inf  ;;  %v2867_v9 = vsel %vm1411_vm6, %v2855_v14, -inf }
 0xb4c   : > { %2865 = vmax.xlane.f32.xlu0 %v2864_v33 }
 0xb4d   : > { %v2856_v31 = vadd.f32 %v2850_v22, %v9088_v24 }
 0xb4e   : > { %v2842_v36 = vpop.f32.mrb[52].mxu1 }
 0xb4f   : > { %v2851_v55 = vmul.f32 0.35355338, %v2842_v36  ;;  %v7641_v40 = vpop.f32.mrb[53].mxu1  ;;  %v2870_v28 = vsel %vm1411_vm6, %v2856_v31, -inf }
 0xb50   : > { %2868 = vmax.xlane.f32.xlu0 %v2867_v9 }
 0xb51   : > { %v2857_v46 = vadd.f32 %v2851_v55, %v9088_v24 }
 0xb53   : > { %v2873_v51 = vsel %vm1411_vm6, %v2857_v46, -inf }
 0xb54   : > { %2871 = vmax.xlane.f32.xlu0 %v2870_v28  ;;  %2874 = vmax.xlane.f32.xlu1 %v2873_v51 }
 0xbd1   : > { %v2860_v58 = vpop.xlane.xlu0 %2859 }
 0xbd2   : > { %v2876_v60 = vsub.f32 %v2852_v0, %v2860_v58 }
 0xbd4   : > { %v2882_v63 = vmul.f32 1.442695, %v2876_v60 }
 0xbd6   : > { %8579 = vpow2.f32 %v2882_v63  ;;  %v2863_v38 = vpop.xlane.xlu1 %2862 }
 0xbd7   : > { %v2877_v50 = vsub.f32 %v2853_v6, %v2863_v38 }
 0xbd9   : > { %v2884_v1 = vmul.f32 1.442695, %v2877_v50  ;;  %v2866_v2 = vpop.xlane.xlu0 %2865 }
 0xbda   : > { %v2878_v47 = vsub.f32 %v2854_v17, %v2866_v2 }
 0xbdb   : > { %8581 = vpow2.f32 %v2884_v1 }
 0xbdc   : > { %v2886_v56 = vmul.f32 1.442695, %v2878_v47 }
 0xbdd   : > { %v2869_v7 = vpop.xlane.xlu0 %2868 }
 0xbde   : > { %8583 = vpow2.f32 %v2886_v56  ;;  %v2879_v10 = vsub.f32 %v2855_v14, %v2869_v7 }
 0xbe0   : > { %v9498_v57 = vpop.eup %8579  ;;  %v2888_v11 = vmul.f32 1.442695, %v2879_v10 }
 0xbe1   : > { %v2872_v12 = vpop.xlane.xlu0 %2871  ;;  %v2894_v16 = vsel %vm1411_vm6, %v9498_v57, 0.0 }
 0xbe2   : > { %8585 = vpow2.f32 %v2888_v11  ;;  %v2880_v0 = vsub.f32 %v2856_v31, %v2872_v12  ;;  %2895 = vadd.xlane.f32.xlu0 %v2894_v16  ;;  %v2875_v31 = vpop.xlane.xlu1 %2874  ;;  %v3210_v11 = vld [vmem:[%s9572_s20] sm:$0xff]  ;;  %v3211_v12 = vld [vmem:[%s9572_s20 + $0x8] sm:$0xff] }
 0xbe3   : > { %v2881_v55 = vsub.f32 %v2857_v46, %v2875_v31  ;;  %v8147_v16 = vpack.c.bf16 %v3211_v12, %v3210_v11 }
 0xbe4   : > { %v2890_v18 = vmul.f32 1.442695, %v2880_v0  ;;  %v3212_v0 = vld [vmem:[%s9572_s20 + $0x10] sm:$0xff] }
 0xbe5   : > { %v9502_v6 = vpop.eup %8581  ;;  %v2892_v40 = vmul.f32 1.442695, %v2881_v55 }
 0xbe6   : > { %8587 = vpow2.f32 %v2890_v18  ;;  %v2897_v17 = vsel %vm1411_vm6, %v9502_v6, 0.0  ;;  %v3213_v18 = vld [vmem:[%s9572_s20 + $0x18] sm:$0xff] }
 0xbe7   : > { %2898 = vadd.xlane.f32.xlu1 %v2897_v17  ;;  %8589 = vpow2.f32 %v2892_v40 }
 0xbe8   : > { %v9506_v21 = vpop.eup %8583 }
 0xbe9   : > { %v2900_v22 = vsel %vm1411_vm6, %v9506_v21, 0.0 }
 0xbeb   : > { %2901 = vadd.xlane.f32.xlu1 %v2900_v22 }
 0xbec   : > { %v9510_v23 = vpop.eup %8585 }
 0xbed   : > { %v2903_v33 = vsel %vm1411_vm6, %v9510_v23, 0.0 }
 0xbee   : > { %2904 = vadd.xlane.f32.xlu0 %v2903_v33 }
 0xbf0   : > { %v9514_v14 = vpop.eup %8587 }
 0xbf1   : > { %v2906_v36 = vsel %vm1411_vm6, %v9514_v14, 0.0 }
 0xbf2   : > { %2907 = vadd.xlane.f32.xlu0 %v2906_v36 }
 0xbfc   : > { %2928 = vrot.lane.b32.xlu1 %v9024_v61, %s10542_s21 }
 0xc00   : > { %8411 = vrot.lane.b32.xlu1 %v9040_v3, %s10542_s21 }
 0xc08   : > { %8406 = vrot.lane.b32.xlu0 %v9022_v59, %s10542_s21  ;;  %v8590_v59 = vpop.eup %8589 }
 0xc09   : > { %v2909_v61 = vsel %vm1411_vm6, %v8590_v59, 0.0 }
 0xc0c   : > { %3126 = vrot.lane.b32.xlu0 %v9342_v29, %s10540_s23 }
 0xc10   : > { %3150 = vrot.lane.b32.xlu0 %v9474_v43, %s10550_s26 }
 0xc14   : > { %3130 = vrot.lane.b32.xlu0 %v9348_v30, %s10540_s23 }
 0xc18   : > { %3154 = vrot.lane.b32.xlu0 %v9480_v52, %s10550_s26 }
 0xc1c   : > { %3134 = vrot.lane.b32.xlu0 %v9350_v37, %s10540_s23 }
 0xc24   : > { %2910 = vadd.xlane.f32.xlu1 %v2909_v61 }
 0xc35   : > { %3026 = vrot.lane.b32.xlu1 %v9044_v4, %s10542_s21  ;;  %s9754_s21 = scalar_lea.vmem %s10524_s14, %s8979_s30 }
 0xc39   : > { %3128 = vrot.lane.b32.xlu1 %v9344_v34, %s10540_s23 }
 0xc3d   : > { %3152 = vrot.lane.b32.xlu1 %v9476_v32, %s10550_s26 }
 0xc41   : > { %3132 = vrot.lane.b32.xlu1 %v9346_v35, %s10540_s23 }
 0xc45   : > { %3156 = vrot.lane.b32.xlu1 %v9478_v27, %s10550_s26 }
 0xc49   : > { %3136 = vrot.lane.b32.xlu1 %v9353_v42, %s10540_s23  ;;  %s10570_s23 = smov 56  }
 0xc6f   : > { %v2896_v29 = vpop.xlane.xlu0 %2895 }
 0xc70   : > { %8591 = vrcp.f32 %v2896_v29 }
 0xc74   : > { %v2899_v3 = vpop.xlane.xlu1 %2898 }
 0xc75   : > { %8593 = vrcp.f32 %v2899_v3 }
 0xc78   : > { %v2902_v30 = vpop.xlane.xlu1 %2901 }
 0xc79   : > { %8595 = vrcp.f32 %v2902_v30 }
 0xc7a   : > { %v8592_v42 = vpop.eup %8591 }
 0xc7b   : > { %v2905_v37 = vpop.xlane.xlu0 %2904  ;;  %v2918_v51 = vmul.f32 %v8592_v42, %v9498_v57 }
 0xc7c   : > { %v2929_v4 = vpop.permute.xlu1 %2928  ;;  %8597 = vrcp.f32 %v2905_v37 }
 0xc7f   : > { %v2908_v43 = vpop.xlane.xlu0 %2907  ;;  %v8594_v58 = vpop.eup %8593 }
 0xc80   : > { %v8412_v34 = vpop.permute.xlu1 %8411  ;;  %v2919_v60 = vmul.f32 %v8594_v58, %v9502_v6  ;;  %8599 = vrcp.f32 %v2908_v43  ;;  %v8151_v6 = vpack.c.bf16 %v3213_v18, %v3212_v0 }
 0xc81   : > { %v8414_v52 = vunpack.i.h.bf16 %v8412_v34  ;;  %v8413_v9 = vunpack.i.l.bf16 %v8412_v34 }
 0xc83   : > { %v8145_v32 = vpack.c.bf16 %v8414_v52, %v8413_v9  ;;  %v8407_v46 = vpop.permute.xlu0 %8406  ;;  %v8596_v63 = vpop.eup %8595 }
 0xc84   : > { %v8409_v35 = vunpack.i.h.bf16 %v8407_v46  ;;  %v8408_v28 = vunpack.i.l.bf16 %v8407_v46  ;;  %v2920_v38 = vmul.f32 %v8596_v63, %v9506_v21 }
 0xc85   : > { %8146 = vmatpush3.bf16.msra.mxu1 %v8145_v32 }
 0xc86   : > { %v8142_v27 = vpack.c.bf16 %v8409_v35, %v8408_v28  ;;  %7661 = vmatprep.subr.mxu1 %v8772_v62  ;;  %v8598_v1 = vpop.eup %8597 }
 0xc87   : > { %v2921_v2 = vmul.f32 %v8598_v1, %v9510_v23  ;;  %v3127_v61 = vpop.permute.xlu0 %3126 }
 0xc88   : > { %8143 = vmatpush3.bf16.msra.mxu0 %v8142_v27  ;;  %v3192_v52 = vsel %vm1205_vm3, %v9210_v41, %v3127_v61 }
 0xc89   : > { %7646 = vmatprep.subr.mxu0 %v8772_v62 }
 0xc8a   : > { %v8600_v56 = vpop.eup %8599 }
 0xc8b   : > { %v2922_v7 = vmul.f32 %v8600_v56, %v9514_v14  ;;  %v3151_v29 = vpop.permute.xlu0 %3150 }
 0xc8c   : > { %7647 = vmatpush3.msra.mxu0 %v2929_v4  ;;  %v3198_v9 = vsel %vm839_vm0, %v3192_v52, %v3151_v29 }
 0xc8d   : > { %7649 = vmatmul.mubr.msk.f32.vlgmr.msra.gmra.mrb[42].mxu0 %vm1411_vm6, %v2918_v51  ;;  %8148 = vmatprep.subr.bf16.mxu0 %v8147_v16 }
 0xc8e   : > { %7651 = vmatprep.mubr.msk.f32.mxu0 %vm8771_vm2, %v8772_v62  ;;  %8150 = vmatpush3.bf16.msra.mxu0 %v8147_v16 }
 0xc8f   : > { %8152 = vmatprep.subr.bf16.mxu0 %v8151_v6 }
 0xc91   : > { %7652 = vmatmul.mubr.msk.f32.gmra.mrb[44].mxu0 %vm1411_vm6, %v2919_v60 }
 0xc92   : > { %7654 = vmatprep.mubr.msk.f32.mxu0 %vm8771_vm2, %v8772_v62  ;;  %8154 = vmatpush3.bf16.msra.mxu0 %v8151_v6 }
 0xc95   : > { %7655 = vmatmul.mubr.msk.f32.gmra.mrb[46].mxu0 %vm1411_vm6, %v2920_v38 }
 0xcb1   : > { %v2911_v50 = vpop.xlane.xlu1 %2910 }
 0xcb2   : > { %8601 = vrcp.f32 %v2911_v50 }
 0xcb5   : > { %v3027_v47 = vpop.permute.xlu1 %3026 }
 0xcb6   : > { %7662 = vmatpush3.msra.mxu1 %v3027_v47 }
 0xcb7   : > { %7664 = vmatmul.mubr.msk.f32.vlgmr.msra.gmra.mrb[54].mxu1 %vm1411_vm6, %v2921_v2 }
 0xcb8   : > { %7666 = vmatprep.mubr.msk.f32.mxu1 %vm8771_vm2, %v8772_v62 }
 0xcb9   : > { %v3129_v3 = vpop.permute.xlu1 %3128 }
 0xcba   : > { %v3193_v28 = vsel %vm1205_vm3, %v9212_v44, %v3129_v3 }
 0xcbb   : > { %7667 = vmatmul.mubr.msk.f32.gmra.mrb[56].mxu1 %vm1411_vm6, %v2922_v7 }
 0xcbc   : > { %v8602_v10 = vpop.eup %8601  ;;  %7669 = vmatprep.mubr.msk.f32.mxu1 %vm8771_vm2, %v8772_v62 }
 0xcbd   : > { %v2923_v57 = vmul.f32 %v8602_v10, %v8590_v59  ;;  %v3153_v30 = vpop.permute.xlu1 %3152 }
 0xcbe   : > { %v3199_v27 = vsel %vm839_vm0, %v3193_v28, %v3153_v30 }
 0xcbf   : > { %7670 = vmatmul.mubr.msk.f32.gmra.mrb[58].mxu1 %vm1411_vm6, %v2923_v57 }
 0xcc1   : > { %v3133_v37 = vpop.permute.xlu1 %3132 }
 0xcc2   : > { %v3195_v44 = vsel %vm1205_vm3, %v9214_v45, %v3133_v37 }
 0xcc5   : > { %v3157_v43 = vpop.permute.xlu1 %3156 }
 0xcc6   : > { %v3201_v1 = vsel %vm839_vm0, %v3195_v44, %v3157_v43 }
 0xcc9   : > { %v3137_v32 = vpop.permute.xlu1 %3136 }
 0xcca   : > { %v3197_v45 = vsel %vm1205_vm3, %v9221_v53, %v3137_v32 }
 0xd60   : > { %v3008_v17 = vpop.f32.mrb[42].mxu0 }
 0xd61   : > { %3174 = vrot.lane.b32.xlu0 %v3008_v17, %s10548_s19  ;;  %v7650_v21 = vpop.f32.mrb[43].mxu0 }
 0xd64   : > { %v3013_v22 = vpop.f32.mrb[44].mxu0 }
 0xd65   : > { %3158 = vrot.lane.b32.xlu0 %v9482_v54, %s10550_s26  ;;  %3176 = vrot.lane.b32.xlu1 %v3013_v22, %s10548_s19  ;;  %v7653_v23 = vpop.f32.mrb[45].mxu0 }
 0xd68   : > { %v3018_v33 = vpop.f32.mrb[46].mxu0 }
 0xd69   : > { %3160 = vrot.lane.b32.xlu1 %v9485_v5, %s10550_s26  ;;  %3178 = vrot.lane.b32.xlu0 %v3018_v33, %s10548_s19  ;;  %v7656_v14 = vpop.f32.mrb[47].mxu0  ;;  %v3131_v5 = vpop.permute.xlu0 %3130  ;;  %s9671_s26 = scalar_lea.vmem %s10523_s13, %s8966_s27  ;;  %s7097_s27 = sshll.u32 %s10581_s25, 8 }
 0xd6a   : > { %v3194_v41 = vsel %vm1205_vm3, %v9216_v49, %v3131_v5  ;;  %v3444_v32 = vld [vmem:[%s9671_s26] sm:$0xff]  ;;  %s9705_s18 = scalar_lea.vmem %s10525_s15, %s7097_s27  ;;  %s9713_s27 = scalar_lea.vmem %s10521_s11, %s8979_s30 }
 0xd6d   : > { %v3155_v4 = vpop.permute.xlu0 %3154 }
 0xd6e   : > { %v3200_v60 = vsel %vm839_vm0, %v3194_v41, %v3155_v4 }
 0xd71   : > { %v3135_v34 = vpop.permute.xlu0 %3134 }
 0xd72   : > { %v3196_v49 = vsel %vm1205_vm3, %v9218_v39, %v3135_v34 }
 0xd8a   : > { %v3106_v36 = vpop.f32.mrb[54].mxu1 }
 0xd8b   : > { %3180 = vrot.lane.b32.xlu1 %v3106_v36, %s10548_s19  ;;  %v7665_v31 = vpop.f32.mrb[55].mxu1 }
 0xd8e   : > { %v3111_v55 = vpop.f32.mrb[56].mxu1 }
 0xd8f   : > { %3182 = vrot.lane.b32.xlu0 %v3111_v55, %s10548_s19  ;;  %v7668_v40 = vpop.f32.mrb[57].mxu1 }
 0xd92   : > { %v3116_v59 = vpop.f32.mrb[58].mxu1 }
 0xd93   : > { %3184 = vrot.lane.b32.xlu1 %v3116_v59, %s10548_s19  ;;  %v7671_v54 = vpop.f32.mrb[59].mxu1  ;;  %s9622_s19 = scalar_lea.vmem %s10520_s10, %s8979_s30 }
 0xd94   : > { %v6938_v39 = vld [vmem:[%s9622_s19] ss:$0 sm:$0xff] }
 0xdd3   : > { %v3175_v46 = vpop.permute.xlu0 %3174 }
 0xdd4   : > { %v3204_v35 = vsel %vm1411_vm6, %v3198_v9, %v3175_v46  ;;  %v3445_v46 = vld [vmem:[%s9671_s26 + $0x8] sm:$0xff] }
 0xdd5   : > { %7680 = vmatprep.mubr.msk.f32.mxu0 %vm968_vm1, %v3204_v35  ;;  %v8155_v28 = vpack.c.bf16 %v3445_v46, %v3444_v32 }
 0xdd7   : > { %v3159_v42 = vpop.permute.xlu0 %3158  ;;  %v3177_v51 = vpop.permute.xlu1 %3176  ;;  %8156 = vmatprep.subr.bf16.mxu1 %v8155_v28 }
 0xdd8   : > { %v3205_v58 = vsel %vm1411_vm6, %v3199_v27, %v3177_v51  ;;  %v3202_v56 = vsel %vm839_vm0, %v3196_v49, %v3159_v42  ;;  %v3446_v42 = vld [vmem:[%s9671_s26 + $0x10] sm:$0xff]  ;;  %v3447_v51 = vld [vmem:[%s9671_s26 + $0x18] sm:$0xff]  ;;  %8158 = vmatpush3.bf16.msra.mxu1 %v8155_v28 }
 0xdd9   : > { %7681 = vmatmul.mubr.msk.f32.vlgmr.msra.gmra.mrb[48].mxu0 %vm968_vm1, %v3205_v58  ;;  %v8159_v58 = vpack.c.bf16 %v3447_v51, %v3446_v42 }
 0xddb   : > { %v3179_v63 = vpop.permute.xlu0 %3178  ;;  %v3161_v50 = vpop.permute.xlu1 %3160  ;;  %8160 = vmatprep.subr.bf16.mxu1 %v8159_v58 }
 0xddc   : > { %v3206_v38 = vsel %vm1411_vm6, %v3200_v60, %v3179_v63  ;;  %v3203_v57 = vsel %vm839_vm0, %v3197_v45, %v3161_v50  ;;  %8162 = vmatpush3.bf16.msra.mxu1 %v8159_v58 }
 0xddd   : > { %7683 = vmatprep.mubr.msk.f32.mxu0 %vm968_vm1, %v3206_v38 }
 0xdfd   : > { %v3181_v2 = vpop.permute.xlu1 %3180 }
 0xdfe   : > { %v3207_v47 = vsel %vm1411_vm6, %v3201_v1, %v3181_v2 }
 0xdff   : > { %7684 = vmatmul.mubr.msk.f32.gmra.mrb[50].mxu0 %vm968_vm1, %v3207_v47 }
 0xe01   : > { %v3183_v7 = vpop.permute.xlu0 %3182 }
 0xe02   : > { %v3208_v10 = vsel %vm1411_vm6, %v3202_v56, %v3183_v7 }
 0xe03   : > { %7686 = vmatprep.mubr.msk.f32.mxu0 %vm968_vm1, %v3208_v10 }
 0xe05   : > { %v3185_v11 = vpop.permute.xlu1 %3184 }
 0xe06   : > { %v3209_v12 = vsel %vm1411_vm6, %v3203_v57, %v3185_v11 }
 0xe07   : > { %7687 = vmatmul.mubr.msk.f32.gmra.mrb[52].mxu0 %vm968_vm1, %v3209_v12 }
 0xeac   : > { %v7682_v16 = vpop.f32.mrb[48].mxu0 }
 0xead   : > { %v3311_v0 = vadd.f32 %v7682_v16, %v6938_v39  ;;  %v3305_v18 = vpop.f32.mrb[49].mxu0  ;;  %v3622_v16 = vld [vmem:[%s9705_s18] sm:$0xff] }
 0xeae   : > { %v3306_v6 = vadd.f32 %v6938_v39, %v3305_v18 }
 0xeaf   : > { %v9626_v53 = vadd.f32 %v3311_v0, %v8907_v15  ;;  %v3623_v0 = vld [vmem:[%s9705_s18 + $0x8] sm:$0xff] }
 0xeb0   : > { %v9629_v17 = vadd.f32 %v3306_v6, %v8905_v13  ;;  %v8163_v18 = vpack.c.bf16 %v3623_v0, %v3622_v16  ;;  %v3629_v16 = vld [vmem:[%s9705_s18 + $0x38] sm:$0xff] }
 0xeb1   : > { %v3345_v21 = vsel %vm968_vm1, %v9626_v53, 0.0 }
 0xeb2   : > { %3346 = vadd.xlane.f32.xlu1 %v3345_v21  ;;  %v3342_v22 = vsel %vm968_vm1, %v9629_v17, 0.0  ;;  %8164 = vmatprep.subr.bf16.mxu0 %v8163_v18 }
 0xeb3   : > { %3343 = vadd.xlane.f32.xlu0 %v3342_v22  ;;  %8166 = vmatpush3.bf16.msra.mxu0 %v8163_v18  ;;  %v3630_v18 = vld [vmem:[%s9705_s18 + $0x40] sm:$0xff] }
 0xed2   : > { %v7685_v23 = vpop.f32.mrb[50].mxu0 }
 0xed3   : > { %v3321_v33 = vadd.f32 %v7685_v23, %v6938_v39  ;;  %v3315_v14 = vpop.f32.mrb[51].mxu0 }
 0xed4   : > { %v3316_v36 = vadd.f32 %v6938_v39, %v3315_v14 }
 0xed5   : > { %v9636_v31 = vadd.f32 %v3321_v33, %v8911_v19 }
 0xed6   : > { %v9639_v15 = vadd.f32 %v3316_v36, %v8913_v20 }
 0xed7   : > { %v3351_v13 = vsel %vm968_vm1, %v9636_v31, 0.0 }
 0xed8   : > { %3352 = vadd.xlane.f32.xlu0 %v3351_v13  ;;  %v3348_v54 = vsel %vm968_vm1, %v9639_v15, 0.0  ;;  %v6945_v13 = vld [vmem:[%s9713_s27] ss:$0 sm:$0xff] }
 0xeda   : > { %v7688_v55 = vpop.f32.mrb[52].mxu0 }
 0xedb   : > { %v3331_v40 = vadd.f32 %v7688_v55, %v6938_v39  ;;  %v3325_v59 = vpop.f32.mrb[53].mxu0 }
 0xedc   : > { %v3326_v61 = vadd.f32 %v6938_v39, %v3325_v59  ;;  %3349 = vadd.xlane.f32.xlu0 %v3348_v54 }
 0xedd   : > { %v9646_v3 = vadd.f32 %v3331_v40, %v8919_v25 }
 0xede   : > { %v9649_v19 = vadd.f32 %v3326_v61, %v8921_v26  ;;  %v6946_v61 = vld [vmem:[%s9720_s5] ss:$0 sm:$0xff] }
 0xedf   : > { %v3357_v20 = vsel %vm968_vm1, %v9646_v3, 0.0 }
 0xee0   : > { %3358 = vadd.xlane.f32.xlu1 %v3357_v20  ;;  %v3354_v29 = vsel %vm968_vm1, %v9649_v19, 0.0 }
 0xee1   : > { %3355 = vadd.xlane.f32.xlu0 %v3354_v29 }
 0xf3f   : > { %v3347_v30 = vpop.xlane.xlu1 %3346 }
 0xf40   : > { %v3361_v5 = vmul.f32 0.03125, %v3347_v30  ;;  %v3344_v37 = vpop.xlane.xlu0 %3343 }
 0xf41   : > { %v3360_v4 = vmul.f32 0.03125, %v3344_v37 }
 0xf42   : > { %v9656_v43 = vsub.f32 %v9626_v53, %v3361_v5 }
 0xf43   : > { %v9659_v25 = vsub.f32 %v9629_v17, %v3360_v4 }
 0xf44   : > { %v3373_v26 = vmul.f32 %v9656_v43, %v9656_v43 }
 0xf45   : > { %v3372_v34 = vmul.f32 %v9659_v25, %v9659_v25 }
 0xf46   : > { %v3381_v52 = vsel %vm968_vm1, %v3373_v26, 0.0 }
 0xf47   : > { %3382 = vadd.xlane.f32.xlu1 %v3381_v52  ;;  %v3378_v9 = vsel %vm968_vm1, %v3372_v34, 0.0 }
 0xf48   : > { %3379 = vadd.xlane.f32.xlu0 %v3378_v9 }
 0xf65   : > { %v3353_v35 = vpop.xlane.xlu0 %3352 }
 0xf66   : > { %v3363_v27 = vmul.f32 0.03125, %v3353_v35 }
 0xf68   : > { %v9678_v41 = vsub.f32 %v9636_v31, %v3363_v27 }
 0xf69   : > { %v3350_v60 = vpop.xlane.xlu0 %3349 }
 0xf6a   : > { %v3362_v63 = vmul.f32 0.03125, %v3350_v60  ;;  %v3375_v38 = vmul.f32 %v9678_v41, %v9678_v41 }
 0xf6c   : > { %v9683_v50 = vsub.f32 %v9639_v15, %v3362_v63  ;;  %v3387_v44 = vsel %vm968_vm1, %v3375_v38, 0.0 }
 0xf6d   : > { %3388 = vadd.xlane.f32.xlu1 %v3387_v44  ;;  %v3359_v1 = vpop.xlane.xlu1 %3358 }
 0xf6e   : > { %v3365_v2 = vmul.f32 0.03125, %v3359_v1  ;;  %v3356_v47 = vpop.xlane.xlu0 %3355  ;;  %v3374_v49 = vmul.f32 %v9683_v50, %v9683_v50 }
 0xf6f   : > { %v3364_v56 = vmul.f32 0.03125, %v3356_v47 }
 0xf70   : > { %v9689_v7 = vsub.f32 %v9646_v3, %v3365_v2  ;;  %v3384_v10 = vsel %vm968_vm1, %v3374_v49, 0.0 }
 0xf71   : > { %v9693_v45 = vsub.f32 %v9649_v19, %v3364_v56  ;;  %3385 = vadd.xlane.f32.xlu0 %v3384_v10  ;;  %v3625_v10 = vld [vmem:[%s9705_s18 + $0x18] sm:$0xff] }
 0xf72   : > { %v3377_v57 = vmul.f32 %v9689_v7, %v9689_v7 }
 0xf73   : > { %v3376_v11 = vmul.f32 %v9693_v45, %v9693_v45 }
 0xf74   : > { %v3393_v12 = vsel %vm968_vm1, %v3377_v57, 0.0  ;;  %v3626_v57 = vld [vmem:[%s9705_s18 + $0x20] sm:$0xff] }
 0xf75   : > { %3394 = vadd.xlane.f32.xlu1 %v3393_v12  ;;  %v3390_v39 = vsel %vm968_vm1, %v3376_v11, 0.0  ;;  %v3627_v11 = vld [vmem:[%s9705_s18 + $0x28] sm:$0xff] }
 0xf76   : > { %3391 = vadd.xlane.f32.xlu0 %v3390_v39  ;;  %v8171_v12 = vpack.c.bf16 %v3627_v11, %v3626_v57  ;;  %v3628_v39 = vld [vmem:[%s9705_s18 + $0x30] sm:$0xff] }
 0xf77   : > { %v8175_v0 = vpack.c.bf16 %v3629_v16, %v3628_v39 }
 0xfd4   : > { %v3383_v6 = vpop.xlane.xlu1 %3382 }
 0xfd5   : > { %v3397_v21 = vmul.f32 0.03125, %v3383_v6  ;;  %v3380_v22 = vpop.xlane.xlu0 %3379  ;;  %v3631_v6 = vld [vmem:[%s9705_s18 + $0x48] sm:$0xff] }
 0xfd6   : > { %v3396_v23 = vmul.f32 0.03125, %v3380_v22  ;;  %v8179_v22 = vpack.c.bf16 %v3631_v6, %v3630_v18 }
 0xfd7   : > { %v3403_v33 = vadd.f32 1e-06, %v3397_v21  ;;  %v3632_v21 = vld [vmem:[%s9705_s18 + $0x50] sm:$0xff] }
 0xfd8   : > { %v3402_v14 = vadd.f32 1e-06, %v3396_v23  ;;  %v3633_v23 = vld [vmem:[%s9705_s18 + $0x58] sm:$0xff] }
 0xfd9   : > { %8603 = vrsqrt.f32 %v3403_v33  ;;  %v8183_v33 = vpack.c.bf16 %v3633_v23, %v3632_v21 }
 0xfda   : > { %8605 = vrsqrt.f32 %v3402_v14  ;;  %v3634_v14 = vld [vmem:[%s9705_s18 + $0x60] sm:$0xff] }
 0xfe3   : > { %v8604_v36 = vpop.eup %8603 }
 0xfe4   : > { %v8606_v55 = vpop.eup %8605  ;;  %v3415_v40 = vmul.f32 %v8604_v36, %v9656_v43  ;;  %v3635_v36 = vld [vmem:[%s9705_s18 + $0x68] sm:$0xff] }
 0xfe5   : > { %v3414_v59 = vmul.f32 %v8606_v55, %v9659_v25  ;;  %v3636_v55 = vld [vmem:[%s9705_s18 + $0x70] sm:$0xff] }
 0xfe6   : > { %v3427_v54 = vmul.f32 %v6945_v13, %v3415_v40  ;;  %v3637_v40 = vld [vmem:[%s9705_s18 + $0x78] sm:$0xff] }
 0xfe7   : > { %v3426_v20 = vmul.f32 %v6945_v13, %v3414_v59  ;;  %v8191_v59 = vpack.c.bf16 %v3637_v40, %v3636_v55 }
 0xfe8   : > { %v3439_v30 = vadd.f32 %v6946_v61, %v3427_v54  ;;  %v6947_v54 = vld [vmem:[%s9754_s21] ss:$0 sm:$0xff] }
 0xfe9   : > { %v3438_v29 = vadd.f32 %v6946_v61, %v3426_v20 }
 0xfeb   : > { %7697 = vmatprep.mubr.msk.f32.mxu1 %vm968_vm1, %v3438_v29 }
 0xfec   : > { %7698 = vmatmul.mubr.msk.f32.vlgmr.msra.gmra.mrb[60].mxu1 %vm968_vm1, %v3439_v30 }
 0xffa   : > { %v3389_v5 = vpop.xlane.xlu1 %3388 }
 0xffb   : > { %v3399_v37 = vmul.f32 0.03125, %v3389_v5 }
 0xffd   : > { %v3405_v4 = vadd.f32 1e-06, %v3399_v37 }
 0xffe   : > { %v3386_v26 = vpop.xlane.xlu0 %3385 }
 0xfff   : > { %8607 = vrsqrt.f32 %v3405_v4  ;;  %v3398_v34 = vmul.f32 0.03125, %v3386_v26 }
0x1001   : > { %v3404_v52 = vadd.f32 1e-06, %v3398_v34 }
0x1002   : > { %v3395_v9 = vpop.xlane.xlu1 %3394 }
0x1003   : > { %8609 = vrsqrt.f32 %v3404_v52  ;;  %v3401_v43 = vmul.f32 0.03125, %v3395_v9  ;;  %v3392_v25 = vpop.xlane.xlu0 %3391 }
0x1004   : > { %v3400_v32 = vmul.f32 0.03125, %v3392_v25 }
0x1005   : > { %v3407_v46 = vadd.f32 1e-06, %v3401_v43 }
0x1006   : > { %v3406_v35 = vadd.f32 1e-06, %v3400_v32 }
0x1007   : > { %8611 = vrsqrt.f32 %v3407_v46 }
0x1008   : > { %8613 = vrsqrt.f32 %v3406_v35 }
0x1009   : > { %v8608_v28 = vpop.eup %8607 }
0x100a   : > { %v3417_v27 = vmul.f32 %v8608_v28, %v9678_v41 }
0x100c   : > { %v3429_v58 = vmul.f32 %v6945_v13, %v3417_v27 }
0x100d   : > { %v8610_v42 = vpop.eup %8609 }
0x100e   : > { %v3416_v51 = vmul.f32 %v8610_v42, %v9683_v50  ;;  %v3441_v2 = vadd.f32 %v6946_v61, %v3429_v58 }
0x1010   : > { %v3428_v60 = vmul.f32 %v6945_v13, %v3416_v51 }
0x1011   : > { %v8612_v63 = vpop.eup %8611 }
0x1012   : > { %v8614_v38 = vpop.eup %8613  ;;  %v3440_v44 = vadd.f32 %v6946_v61, %v3428_v60  ;;  %v3419_v1 = vmul.f32 %v8612_v63, %v9689_v7  ;;  %v3624_v7 = vld [vmem:[%s9705_s18 + $0x10] sm:$0xff] }
0x1013   : > { %v3418_v47 = vmul.f32 %v8614_v38, %v9693_v45  ;;  %v8167_v45 = vpack.c.bf16 %v3625_v10, %v3624_v7 }
0x1014   : > { %7700 = vmatprep.mubr.msk.f32.mxu1 %vm968_vm1, %v3440_v44  ;;  %v3431_v41 = vmul.f32 %v6945_v13, %v3419_v1 }
0x1015   : > { %7701 = vmatmul.mubr.msk.f32.gmra.mrb[62].mxu1 %vm968_vm1, %v3441_v2  ;;  %v3430_v50 = vmul.f32 %v6945_v13, %v3418_v47  ;;  %8168 = vmatprep.subr.bf16.mxu0 %v8167_v45  ;;  %v8187_v13 = vpack.c.bf16 %v3635_v36, %v3634_v14 }
0x1016   : > { %v3443_v56 = vadd.f32 %v6946_v61, %v3431_v41  ;;  %8170 = vmatpush3.bf16.msra.mxu0 %v8167_v45 }
0x1017   : > { %v3442_v49 = vadd.f32 %v6946_v61, %v3430_v50  ;;  %8172 = vmatprep.subr.bf16.mxu0 %v8171_v12 }
0x1019   : > { %7703 = vmatprep.mubr.msk.f32.mxu1 %vm968_vm1, %v3442_v49 }
0x101a   : > { %7704 = vmatmul.mubr.msk.f32.gmra.mrb[64].mxu1 %vm968_vm1, %v3443_v56  ;;  %8174 = vmatpush3.bf16.msra.mxu0 %v8171_v12 }
0x101b   : > { %8176 = vmatprep.subr.bf16.mxu0 %v8175_v0 }
0x101e   : > { %8178 = vmatpush3.bf16.msra.mxu0 %v8175_v0 }
0x101f   : > { %8180 = vmatprep.subr.bf16.mxu0 %v8179_v22 }
0x1022   : > { %8182 = vmatpush3.bf16.msra.mxu0 %v8179_v22 }
0x1023   : > { %8184 = vmatprep.subr.bf16.mxu0 %v8183_v33 }
0x1026   : > { %8186 = vmatpush3.bf16.msra.mxu0 %v8183_v33 }
0x1027   : > { %8188 = vmatprep.subr.bf16.mxu0 %v8187_v13 }
0x102a   : > { %8190 = vmatpush3.bf16.msra.mxu0 %v8187_v13 }
0x102b   : > { %8192 = vmatprep.subr.bf16.mxu0 %v8191_v59 }
0x102e   : > { %8194 = vmatpush3.bf16.msra.mxu0 %v8191_v59 }
0x102f   : > { %8211 = vmatprep.subr.bf16.mxu0 %v8769_v48 }
0x10bf   : > { %v7699_v61 = vpop.f32.mrb[60].mxu1 }
0x10c0   : > { %v3545_v20 = vadd.f32 %v7699_v61, %v6947_v54  ;;  %v3539_v29 = vpop.f32.mrb[61].mxu1 }
0x10c1   : > { %v3540_v30 = vadd.f32 %v6947_v54, %v3539_v29 }
0x10c2   : > { %v3575_v5 = vmul.f32 0.044715, %v3545_v20  ;;  %v3569_v51 = vmul.f32 0.5, %v3545_v20 }
0x10c3   : > { %v3574_v37 = vmul.f32 0.044715, %v3540_v30  ;;  %v3568_v27 = vmul.f32 0.5, %v3540_v30 }
0x10c4   : > { %v3581_v4 = vmul.f32 %v3575_v5, %v3545_v20 }
0x10c5   : > { %v3580_v26 = vmul.f32 %v3574_v37, %v3540_v30 }
0x10c6   : > { %v3587_v34 = vmul.f32 %v3581_v4, %v3545_v20 }
0x10c7   : > { %v3586_v52 = vmul.f32 %v3580_v26, %v3540_v30 }
0x10c8   : > { %v3593_v9 = vadd.f32 %v3587_v34, %v3545_v20 }
0x10c9   : > { %v3592_v43 = vadd.f32 %v3586_v52, %v3540_v30 }
0x10ca   : > { %v3599_v25 = vmul.f32 0.7978846, %v3593_v9 }
0x10cb   : > { %v3598_v32 = vmul.f32 0.7978846, %v3592_v43 }
0x10cc   : > { %8615 = vtanh.f32 %v3599_v25  ;;  %v6954_v25 = vld [vmem:[%s9763_s29] ss:$0 sm:$0xff] }
0x10cd   : > { %8617 = vtanh.f32 %v3598_v32 }
0x10d6   : > { %v8616_v46 = vpop.eup %8615 }
0x10d7   : > { %v8618_v35 = vpop.eup %8617  ;;  %v3611_v28 = vadd.f32 1.0, %v8616_v46 }
0x10d8   : > { %v3610_v42 = vadd.f32 1.0, %v8618_v35 }
0x10d9   : > { %v3617_v60 = vmul.f32 %v3611_v28, %v3569_v51 }
0x10da   : > { %v3616_v58 = vmul.f32 %v3610_v42, %v3568_v27 }
0x10dc   : > { %7738 = vmatprep.mubr.f32.mxu0 %v3616_v58 }
0x10dd   : > { %7739 = vmatmul.mubr.f32.vlgmr.msra.gmra.mrb[54].mxu0 %v3617_v60 }
0x10e8   : > { %v7702_v63 = vpop.f32.mrb[62].mxu1 }
0x10e9   : > { %v3555_v38 = vadd.f32 %v7702_v63, %v6947_v54  ;;  %v3549_v44 = vpop.f32.mrb[63].mxu1 }
0x10ea   : > { %v3550_v1 = vadd.f32 %v6947_v54, %v3549_v44 }
0x10eb   : > { %v3577_v2 = vmul.f32 0.044715, %v3555_v38  ;;  %v3571_v20 = vmul.f32 0.5, %v3555_v38 }
0x10ec   : > { %v3576_v47 = vmul.f32 0.044715, %v3550_v1 }
0x10ed   : > { %v3583_v41 = vmul.f32 %v3577_v2, %v3555_v38  ;;  %v7705_v50 = vpop.f32.mrb[64].mxu1 }
0x10ee   : > { %v3582_v49 = vmul.f32 %v3576_v47, %v3550_v1  ;;  %v3565_v56 = vadd.f32 %v7705_v50, %v6947_v54  ;;  %v3559_v7 = vpop.f32.mrb[65].mxu1 }
0x10ef   : > { %v3560_v10 = vadd.f32 %v6947_v54, %v3559_v7  ;;  %v3589_v45 = vmul.f32 %v3583_v41, %v3555_v38  ;;  %v3570_v54 = vmul.f32 0.5, %v3550_v1 }
0x10f0   : > { %v3579_v57 = vmul.f32 0.044715, %v3565_v56  ;;  %v3588_v11 = vmul.f32 %v3582_v49, %v3550_v1  ;;  %v3573_v52 = vmul.f32 0.5, %v3565_v56 }
0x10f1   : > { %v3578_v12 = vmul.f32 0.044715, %v3560_v10  ;;  %v3595_v39 = vadd.f32 %v3589_v45, %v3555_v38  ;;  %v3572_v26 = vmul.f32 0.5, %v3560_v10 }
0x10f2   : > { %v3585_v16 = vmul.f32 %v3579_v57, %v3565_v56  ;;  %v3594_v0 = vadd.f32 %v3588_v11, %v3550_v1 }
0x10f3   : > { %v3584_v18 = vmul.f32 %v3578_v12, %v3560_v10  ;;  %v3601_v6 = vmul.f32 0.7978846, %v3595_v39 }
0x10f4   : > { %v3600_v21 = vmul.f32 0.7978846, %v3594_v0  ;;  %v3591_v22 = vmul.f32 %v3585_v16, %v3565_v56 }
0x10f5   : > { %8619 = vtanh.f32 %v3601_v6  ;;  %v3590_v23 = vmul.f32 %v3584_v18, %v3560_v10  ;;  %v6959_v18 = vld [vmem:[%s8972_s0 + $0x20] sm:$0xff]  ;;  %v6960_v6 = vld [vmem:[%s8972_s0 + $0x28] sm:$0xff] }
0x10f6   : > { %8621 = vtanh.f32 %v3600_v21  ;;  %v3597_v33 = vadd.f32 %v3591_v22, %v3565_v56  ;;  %v8195_v21 = vpack.c.bf16 %v6960_v6, %v6959_v18  ;;  %v6961_v22 = vld [vmem:[%s8972_s0 + $0x30] sm:$0xff] }
0x10f7   : > { %v3596_v14 = vadd.f32 %v3590_v23, %v3560_v10  ;;  %v6962_v23 = vld [vmem:[%s8972_s0 + $0x38] sm:$0xff]  ;;  %s10566_s0 = smov 96  }
0x10f8   : > { %v3603_v36 = vmul.f32 0.7978846, %v3597_v33  ;;  %8196 = vmatprep.subr.bf16.mxu1 %v8195_v21  ;;  %v8199_v33 = vpack.c.bf16 %v6962_v23, %v6961_v22 }
0x10f9   : > { %v3602_v13 = vmul.f32 0.7978846, %v3596_v14  ;;  %8198 = vmatpush3.bf16.msra.mxu1 %v8195_v21 }
0x10fa   : > { %8623 = vtanh.f32 %v3603_v36  ;;  %8200 = vmatprep.subr.bf16.mxu1 %v8199_v33 }
0x10fb   : > { %8625 = vtanh.f32 %v3602_v13 }
0x10fd   : > { %8202 = vmatpush3.bf16.msra.mxu1 %v8199_v33 }
0x10fe   : > { %8203 = vmatprep.subr.bf16.mxu1 %v8769_v48 }
0x10ff   : > { %v8620_v55 = vpop.eup %8619 }
0x1100   : > { %v8622_v40 = vpop.eup %8621  ;;  %v3613_v59 = vadd.f32 1.0, %v8620_v55 }
0x1101   : > { %v3612_v61 = vadd.f32 1.0, %v8622_v40 }
0x1102   : > { %v3619_v5 = vmul.f32 %v3613_v59, %v3571_v20 }
0x1103   : > { %v3618_v29 = vmul.f32 %v3612_v61, %v3570_v54 }
0x1104   : > { %v8624_v30 = vpop.eup %8623 }
0x1105   : > { %v8626_v37 = vpop.eup %8625  ;;  %7741 = vmatprep.mubr.f32.mxu0 %v3618_v29  ;;  %v3615_v4 = vadd.f32 1.0, %v8624_v30 }
0x1106   : > { %7742 = vmatmul.mubr.f32.gmra.mrb[56].mxu0 %v3619_v5  ;;  %v3614_v34 = vadd.f32 1.0, %v8626_v37 }
0x1107   : > { %v3621_v43 = vmul.f32 %v3615_v4, %v3573_v52 }
0x1108   : > { %v3620_v9 = vmul.f32 %v3614_v34, %v3572_v26 }
0x110a   : > { %7744 = vmatprep.mubr.f32.mxu0 %v3620_v9 }
0x110b   : > { %7745 = vmatmul.mubr.f32.gmra.mrb[58].mxu0 %v3621_v43 }
0x110c   : > { %7800 = vmatprep.mubr.msk.f32.mxu0 %vm8771_vm2, %v8772_v62 }
0x11b0   : > { %v7740_v32 = vpop.f32.mrb[54].mxu0 }
0x11b1   : > { %v3717_v46 = vadd.f32 %v7740_v32, %v6954_v25  ;;  %v3711_v35 = vpop.f32.mrb[55].mxu0 }
0x11b2   : > { %v3712_v28 = vadd.f32 %v6954_v25, %v3711_v35 }
0x11b3   : > { %v9767_v27 = vadd.f32 %v3717_v46, %v9626_v53 }
0x11b4   : > { %v9770_v42 = vadd.f32 %v3712_v28, %v9629_v17 }
0x11b5   : > { %v3753_v51 = vsel %vm968_vm1, %v9767_v27, 0.0 }
0x11b6   : > { %3754 = vadd.xlane.f32.xlu1 %v3753_v51  ;;  %v3750_v58 = vsel %vm968_vm1, %v9770_v42, 0.0 }
0x11b7   : > { %3751 = vadd.xlane.f32.xlu0 %v3750_v58 }
0x11d9   : > { %v7743_v60 = vpop.f32.mrb[56].mxu0 }
0x11da   : > { %v3727_v63 = vadd.f32 %v7743_v60, %v6954_v25  ;;  %v3721_v38 = vpop.f32.mrb[57].mxu0 }
0x11db   : > { %v3722_v44 = vadd.f32 %v6954_v25, %v3721_v38 }
0x11dc   : > { %v9777_v1 = vadd.f32 %v3727_v63, %v9636_v31  ;;  %v6957_v63 = vld [vmem:[%s8985_s1 + $0x1] ss:$0 sm:$0xff]  ;;  %s10567_s1 = smov 64  }
0x11dd   : > { %v9780_v53 = vadd.f32 %v3722_v44, %v9639_v15 }
0x11de   : > { %v7746_v17 = vpop.f32.mrb[58].mxu0  ;;  %v3759_v2 = vsel %vm968_vm1, %v9777_v1, 0.0 }
0x11df   : > { %v3737_v47 = vadd.f32 %v7746_v17, %v6954_v25  ;;  %3760 = vadd.xlane.f32.xlu1 %v3759_v2  ;;  %v3731_v41 = vpop.f32.mrb[59].mxu0  ;;  %v3756_v50 = vsel %vm968_vm1, %v9780_v53, 0.0  ;;  %v6958_v17 = vld [vmem:[%s8991_s22 + $0x1] ss:$0 sm:$0xff]  ;;  %s10568_s22 = smov 88  }
0x11e0   : > { %v3732_v49 = vadd.f32 %v6954_v25, %v3731_v41  ;;  %3757 = vadd.xlane.f32.xlu0 %v3756_v50 }
0x11e1   : > { %v9787_v56 = vadd.f32 %v3737_v47, %v9646_v3 }
0x11e2   : > { %v9790_v31 = vadd.f32 %v3732_v49, %v9649_v19 }
0x11e3   : > { %v3765_v15 = vsel %vm968_vm1, %v9787_v56, 0.0 }
0x11e4   : > { %3766 = vadd.xlane.f32.xlu1 %v3765_v15  ;;  %v3762_v7 = vsel %vm968_vm1, %v9790_v31, 0.0 }
0x11e5   : > { %3763 = vadd.xlane.f32.xlu0 %v3762_v7 }
0x1243   : > { %v3755_v10 = vpop.xlane.xlu1 %3754 }
0x1244   : > { %v3769_v45 = vmul.f32 0.03125, %v3755_v10  ;;  %v3752_v57 = vpop.xlane.xlu0 %3751 }
0x1245   : > { %v3768_v3 = vmul.f32 0.03125, %v3752_v57 }
0x1246   : > { %v3775_v11 = vsub.f32 %v9767_v27, %v3769_v45 }
0x1247   : > { %v3774_v19 = vsub.f32 %v9770_v42, %v3768_v3 }
0x1248   : > { %v3781_v12 = vmul.f32 %v3775_v11, %v3775_v11 }
0x1249   : > { %v3780_v39 = vmul.f32 %v3774_v19, %v3774_v19 }
0x124a   : > { %v3789_v16 = vsel %vm968_vm1, %v3781_v12, 0.0 }
0x124b   : > { %3790 = vadd.xlane.f32.xlu1 %v3789_v16  ;;  %v3786_v0 = vsel %vm968_vm1, %v3780_v39, 0.0 }
0x124c   : > { %3787 = vadd.xlane.f32.xlu0 %v3786_v0 }
0x126c   : > { %v3761_v14 = vpop.xlane.xlu1 %3760 }
0x126d   : > { %v3771_v36 = vmul.f32 0.03125, %v3761_v14  ;;  %v3758_v13 = vpop.xlane.xlu0 %3757 }
0x126e   : > { %v3770_v55 = vmul.f32 0.03125, %v3758_v13 }
0x126f   : > { %v3777_v40 = vsub.f32 %v9777_v1, %v3771_v36 }
0x1270   : > { %v3776_v59 = vsub.f32 %v9780_v53, %v3770_v55 }
0x1271   : > { %v3767_v54 = vpop.xlane.xlu1 %3766  ;;  %v3783_v61 = vmul.f32 %v3777_v40, %v3777_v40 }
0x1272   : > { %v3773_v20 = vmul.f32 0.03125, %v3767_v54  ;;  %v3764_v29 = vpop.xlane.xlu0 %3763  ;;  %v3782_v30 = vmul.f32 %v3776_v59, %v3776_v59 }
0x1273   : > { %v3772_v5 = vmul.f32 0.03125, %v3764_v29  ;;  %v3795_v37 = vsel %vm968_vm1, %v3783_v61, 0.0 }
0x1274   : > { %v3779_v4 = vsub.f32 %v9787_v56, %v3773_v20  ;;  %3796 = vadd.xlane.f32.xlu1 %v3795_v37  ;;  %v3792_v26 = vsel %vm968_vm1, %v3782_v30, 0.0 }
0x1275   : > { %v3778_v34 = vsub.f32 %v9790_v31, %v3772_v5  ;;  %3793 = vadd.xlane.f32.xlu0 %v3792_v26 }
0x1276   : > { %v3785_v52 = vmul.f32 %v3779_v4, %v3779_v4 }
0x1277   : > { %v3784_v9 = vmul.f32 %v3778_v34, %v3778_v34 }
0x1278   : > { %v3801_v43 = vsel %vm968_vm1, %v3785_v52, 0.0 }
0x1279   : > { %3802 = vadd.xlane.f32.xlu1 %v3801_v43  ;;  %v3798_v25 = vsel %vm968_vm1, %v3784_v9, 0.0 }
0x127a   : > { %3799 = vadd.xlane.f32.xlu0 %v3798_v25 }
0x12d8   : > { %v3791_v32 = vpop.xlane.xlu1 %3790 }
0x12d9   : > { %v3805_v46 = vmul.f32 0.03125, %v3791_v32  ;;  %v3788_v35 = vpop.xlane.xlu0 %3787 }
0x12da   : > { %v3804_v28 = vmul.f32 0.03125, %v3788_v35 }
0x12db   : > { %v3811_v51 = vadd.f32 1e-06, %v3805_v46 }
0x12dc   : > { %v3810_v58 = vadd.f32 1e-06, %v3804_v28 }
0x12dd   : > { %8627 = vrsqrt.f32 %v3811_v51 }
0x12de   : > { %8629 = vrsqrt.f32 %v3810_v58 }
0x12e7   : > { %v8628_v60 = vpop.eup %8627 }
0x12e8   : > { %v8630_v38 = vpop.eup %8629  ;;  %v3823_v44 = vmul.f32 %v8628_v60, %v3775_v11 }
0x12e9   : > { %v3822_v2 = vmul.f32 %v8630_v38, %v3774_v19 }
0x12ea   : > { %v3835_v47 = vmul.f32 %v6957_v63, %v3823_v44 }
0x12eb   : > { %v3834_v41 = vmul.f32 %v6957_v63, %v3822_v2 }
0x12ec   : > { %v3847_v50 = vadd.f32 %v6958_v17, %v3835_v47 }
0x12ed   : > { %v3846_v49 = vadd.f32 %v6958_v17, %v3834_v41 }
0x12ef   : > { %7755 = vmatprep.mubr.msk.f32.mxu1 %vm968_vm1, %v3846_v49 }
0x12f0   : > { %7756 = vmatmul.mubr.msk.f32.vlgmr.msra.gmra.mrb[66].mxu1 %vm968_vm1, %v3847_v50 }
0x1301   : > { %v3797_v15 = vpop.xlane.xlu1 %3796 }
0x1302   : > { %v3807_v7 = vmul.f32 0.03125, %v3797_v15  ;;  %v3794_v10 = vpop.xlane.xlu0 %3793 }
0x1303   : > { %v3806_v45 = vmul.f32 0.03125, %v3794_v10 }
0x1304   : > { %v3813_v57 = vadd.f32 1e-06, %v3807_v7 }
0x1305   : > { %v3812_v3 = vadd.f32 1e-06, %v3806_v45 }
0x1306   : > { %8631 = vrsqrt.f32 %v3813_v57  ;;  %v3803_v12 = vpop.xlane.xlu1 %3802 }
0x1307   : > { %8633 = vrsqrt.f32 %v3812_v3  ;;  %v3809_v11 = vmul.f32 0.03125, %v3803_v12  ;;  %v3800_v39 = vpop.xlane.xlu0 %3799 }
0x1308   : > { %v3808_v19 = vmul.f32 0.03125, %v3800_v39 }
0x1309   : > { %v3815_v16 = vadd.f32 1e-06, %v3809_v11 }
0x130a   : > { %v3814_v0 = vadd.f32 1e-06, %v3808_v19 }
0x130b   : > { %8635 = vrsqrt.f32 %v3815_v16 }
0x130c   : > { %8637 = vrsqrt.f32 %v3814_v0 }
0x1310   : > { %v8632_v18 = vpop.eup %8631 }
0x1311   : > { %v8634_v6 = vpop.eup %8633  ;;  %v3825_v21 = vmul.f32 %v8632_v18, %v3777_v40  ;;  %v6964_v40 = vld [vmem:[%s9011_s28 + $0x1] ss:$0 sm:$0xff]  ;;  %s10569_s28 = smov 120  }
0x1312   : > { %v3824_v22 = vmul.f32 %v8634_v6, %v3776_v59 }
0x1313   : > { %v3837_v23 = vmul.f32 %v6957_v63, %v3825_v21 }
0x1314   : > { %v3836_v33 = vmul.f32 %v6957_v63, %v3824_v22 }
0x1315   : > { %v8636_v14 = vpop.eup %8635  ;;  %v3849_v36 = vadd.f32 %v6958_v17, %v3837_v23 }
0x1316   : > { %v8638_v13 = vpop.eup %8637  ;;  %v3848_v55 = vadd.f32 %v6958_v17, %v3836_v33  ;;  %v3827_v54 = vmul.f32 %v8636_v14, %v3779_v4 }
0x1317   : > { %v3826_v61 = vmul.f32 %v8638_v13, %v3778_v34 }
0x1318   : > { %7758 = vmatprep.mubr.msk.f32.mxu1 %vm968_vm1, %v3848_v55  ;;  %v3839_v20 = vmul.f32 %v6957_v63, %v3827_v54 }
0x1319   : > { %7759 = vmatmul.mubr.msk.f32.gmra.mrb[68].mxu1 %vm968_vm1, %v3849_v36  ;;  %v3838_v29 = vmul.f32 %v6957_v63, %v3826_v61 }
0x131a   : > { %v3851_v30 = vadd.f32 %v6958_v17, %v3839_v20 }
0x131b   : > { %v3850_v5 = vadd.f32 %v6958_v17, %v3838_v29 }
0x131d   : > { %7761 = vmatprep.mubr.msk.f32.mxu1 %vm968_vm1, %v3850_v5 }
0x131e   : > { %7762 = vmatmul.mubr.msk.f32.gmra.mrb[70].mxu1 %vm968_vm1, %v3851_v30 }
0x131f   : > { %7770 = vmatprep.mubr.msk.f32.mxu1 %vm8771_vm2, %v8772_v62 }
0x13c3   : > { %v7757_v59 = vpop.f32.mrb[66].mxu1 }
0x13c4   : > { %v9824_v37 = vadd.f32 %v7757_v59, %v6964_v40  ;;  %v3949_v4 = vpop.f32.mrb[67].mxu1 }
0x13c5   : > { %v9826_v26 = vadd.f32 %v6964_v40, %v3949_v4 }
0x13c7   : > { %v9830_v34 = vpack.i.bf16 %v9824_v37, %v9826_v26 }
0x13c9   : > { %8416 = vrot.lane.b32.xlu0 %v9830_v34, %s10566_s0 }
0x13ec   : > { %v7760_v52 = vpop.f32.mrb[68].mxu1 }
0x13ed   : > { %v3959_v9 = vpop.f32.mrb[69].mxu1  ;;  %v9838_v46 = vadd.f32 %v7760_v52, %v6964_v40 }
0x13ee   : > { %v9834_v43 = vadd.f32 %v6964_v40, %v3959_v9 }
0x13f0   : > { %3985 = vrot.lane.b32.xlu1 %v9834_v43, %s10566_s0 }
0x13f1   : > { %v7763_v25 = vpop.f32.mrb[70].mxu1 }
0x13f2   : > { %v3969_v32 = vpop.f32.mrb[71].mxu1  ;;  %v9848_v51 = vadd.f32 %v7763_v25, %v6964_v40 }
0x13f3   : > { %v9840_v35 = vadd.f32 %v6964_v40, %v3969_v32 }
0x13f5   : > { %v9844_v28 = vpack.i.bf16 %v9840_v35, %v9838_v46 }
0x13f7   : > { %8421 = vrot.lane.b32.xlu1 %v9844_v28, %s10566_s0 }
0x13fb   : > { %4086 = vrot.lane.b32.xlu1 %v9848_v51, %s10566_s0  ;;  %s10572_s0 = smov 112  }
0x143b   : > { %v8417_v58 = vpop.permute.xlu0 %8416 }
0x143c   : > { %v8419_v60 = vunpack.i.h.bf16 %v8417_v58  ;;  %v8418_v63 = vunpack.i.l.bf16 %v8417_v58 }
0x143e   : > { %v8204_v38 = vpack.c.bf16 %v8419_v60, %v8418_v63 }
0x1440   : > { %8206 = vmatpush3.bf16.xpose.msk.msra.mxu1 %vm9050_vm4, %v8204_v38 }
0x1441   : > { %7768 = vmatprep.subr.mxu1 %v8772_v62 }
0x1462   : > { %v3986_v44 = vpop.permute.xlu1 %3985 }
0x1463   : > { %7769 = vmatpush3.xpose.msk.msra.mxu1 %vm1205_vm3, %v3986_v44 }
0x1464   : > { %8207 = vmatprep.subr.bf16.mxu1 %v8769_v48 }
0x1466   : > { %7771 = vmatmul.mubr.msk.f32.vlgmr.msra.gmra.mrb[72].mxu1 %vm1205_vm3, %v9826_v26 }
0x1467   : > { %7773 = vmatprep.mubr.msk.f32.mxu1 %vm8771_vm2, %v8772_v62 }
0x1469   : > { %v8422_v17 = vpop.permute.xlu1 %8421 }
0x146a   : > { %v8424_v2 = vunpack.i.h.bf16 %v8422_v17  ;;  %v8423_v47 = vunpack.i.l.bf16 %v8422_v17  ;;  %7774 = vmatmul.mubr.msk.f32.gmra.mrb[74].mxu1 %vm1205_vm3, %v9824_v37 }
0x146b   : > { %7776 = vmatprep.mubr.msk.f32.mxu1 %vm8771_vm2, %v8772_v62 }
0x146c   : > { %v8208_v41 = vpack.c.bf16 %v8424_v2, %v8423_v47 }
0x146d   : > { %v4087_v50 = vpop.permute.xlu1 %4086 }
0x146e   : > { %7777 = vmatmul.mubr.msk.f32.gmra.mrb[76].mxu1 %vm1205_vm3, %v9834_v43 }
0x146f   : > { %8210 = vmatpush3.bf16.xpose.msk.msra.mxu1 %vm9050_vm4, %v8208_v41  ;;  %7785 = vmatprep.mubr.msk.f32.mxu1 %vm8771_vm2, %v8772_v62 }
0x1470   : > { %7783 = vmatprep.subr.mxu1 %v8772_v62 }
0x1477   : > { %7784 = vmatpush3.xpose.msk.msra.mxu1 %vm1205_vm3, %v4087_v50 }
0x1478   : > { %8214 = vmatprep.subr.bf16.mxu1 %v8769_v48 }
0x147a   : > { %7786 = vmatmul.mubr.msk.f32.vlgmr.msra.gmra.mrb[78].mxu1 %vm1205_vm3, %v9838_v46 }
0x147b   : > { %7788 = vmatprep.mubr.msk.f32.mxu1 %vm8771_vm2, %v8772_v62 }
0x147e   : > { %7789 = vmatmul.mubr.msk.f32.gmra.mrb[80].mxu1 %vm1205_vm3, %v9840_v35 }
0x147f   : > { %7791 = vmatprep.mubr.msk.f32.mxu1 %vm8771_vm2, %v8772_v62 }
0x1482   : > { %7792 = vmatmul.mubr.msk.f32.gmra.mrb[82].mxu1 %vm1205_vm3, %v9848_v51 }
0x1483   : > { %7815 = vmatprep.mubr.msk.f32.mxu1 %vm8771_vm2, %v8772_v62 }
0x1539   : > { %v4065_v49 = vpop.f32.mrb[72].mxu1 }
0x153a   : > { %v4180_v15 = vmul.f32 0.35355338, %v4065_v49  ;;  %v7772_v7 = vpop.f32.mrb[73].mxu1 }
0x153c   : > { %v4186_v10 = vadd.f32 %v4180_v15, %v9088_v24 }
0x153d   : > { %v4070_v45 = vpop.f32.mrb[74].mxu1 }
0x153e   : > { %v4181_v57 = vmul.f32 0.35355338, %v4070_v45  ;;  %v7775_v3 = vpop.f32.mrb[75].mxu1  ;;  %v4192_v12 = vsel %vm1411_vm6, %v4186_v10, -inf }
0x153f   : > { %4193 = vmax.xlane.f32.xlu0 %v4192_v12 }
0x1540   : > { %v4187_v11 = vadd.f32 %v4181_v57, %v9088_v24 }
0x1541   : > { %v4075_v39 = vpop.f32.mrb[76].mxu1 }
0x1542   : > { %v4182_v19 = vmul.f32 0.35355338, %v4075_v39  ;;  %v7778_v16 = vpop.f32.mrb[77].mxu1  ;;  %v4195_v0 = vsel %vm1411_vm6, %v4187_v11, -inf }
0x1543   : > { %4196 = vmax.xlane.f32.xlu1 %v4195_v0 }
0x1544   : > { %v9891_v18 = vadd.f32 %v4182_v19, %v9088_v24 }
0x1546   : > { %v4198_v6 = vsel %vm1411_vm6, %v9891_v18, -inf }
0x1547   : > { %4199 = vmax.xlane.f32.xlu0 %v4198_v6 }
0x154d   : > { %v4166_v21 = vpop.f32.mrb[78].mxu1 }
0x154e   : > { %v4183_v22 = vmul.f32 0.35355338, %v4166_v21  ;;  %v7787_v23 = vpop.f32.mrb[79].mxu1 }
0x1550   : > { %v4189_v33 = vadd.f32 %v4183_v22, %v9088_v24 }
0x1551   : > { %v4171_v14 = vpop.f32.mrb[80].mxu1 }
0x1552   : > { %v4184_v36 = vmul.f32 0.35355338, %v4171_v14  ;;  %v7790_v13 = vpop.f32.mrb[81].mxu1  ;;  %v4201_v55 = vsel %vm1411_vm6, %v4189_v33, -inf }
0x1553   : > { %4202 = vmax.xlane.f32.xlu0 %v4201_v55 }
0x1554   : > { %v9898_v54 = vadd.f32 %v4184_v36, %v9088_v24 }
0x1555   : > { %v4176_v61 = vpop.f32.mrb[82].mxu1 }
0x1556   : > { %v4185_v20 = vmul.f32 0.35355338, %v4176_v61  ;;  %v7793_v29 = vpop.f32.mrb[83].mxu1  ;;  %v4204_v30 = vsel %vm1411_vm6, %v9898_v54, -inf }
0x1557   : > { %4205 = vmax.xlane.f32.xlu0 %v4204_v30 }
0x1558   : > { %v9903_v5 = vadd.f32 %v4185_v20, %v9088_v24 }
0x155a   : > { %v4207_v40 = vsel %vm1411_vm6, %v9903_v5, -inf }
0x155b   : > { %4208 = vmax.xlane.f32.xlu1 %v4207_v40 }
0x156c   : > { %8426 = vrot.lane.b32.xlu1 %v9830_v34, %s10567_s1 }
0x156d   : > { %4262 = vrot.lane.b32.xlu0 %v9834_v43, %s10567_s1 }
0x1570   : > { %8431 = vrot.lane.b32.xlu1 %v9844_v28, %s10567_s1 }
0x1571   : > { %4464 = vrot.lane.b32.xlu0 %v9834_v43, %s10568_s22 }
0x1574   : > { %8436 = vrot.lane.b32.xlu1 %v9830_v34, %s10568_s22 }
0x1578   : > { %4360 = vrot.lane.b32.xlu1 %v9848_v51, %s10567_s1  ;;  %s10573_s1 = smov 48  }
0x157c   : > { %8441 = vrot.lane.b32.xlu1 %v9844_v28, %s10568_s22 }
0x1580   : > { %4454 = vrot.lane.b32.xlu1 %v9826_v26, %s10569_s28 }
0x15cc   : > { %v4194_v59 = vpop.xlane.xlu0 %4193 }
0x15cd   : > { %v4210_v4 = vsub.f32 %v4186_v10, %v4194_v59 }
0x15cf   : > { %v4216_v52 = vmul.f32 1.442695, %v4210_v4 }
0x15d0   : > { %v4197_v9 = vpop.xlane.xlu1 %4196 }
0x15d1   : > { %8639 = vpow2.f32 %v4216_v52  ;;  %v4211_v25 = vsub.f32 %v4187_v11, %v4197_v9 }
0x15d3   : > { %v4218_v32 = vmul.f32 1.442695, %v4211_v25 }
0x15d4   : > { %v4200_v60 = vpop.xlane.xlu0 %4199 }
0x15d5   : > { %8641 = vpow2.f32 %v4218_v32  ;;  %v4212_v6 = vsub.f32 %v9891_v18, %v4200_v60 }
0x15d7   : > { %v4220_v21 = vmul.f32 1.442695, %v4212_v6 }
0x15db   : > { %v9923_v58 = vpop.eup %8639 }
0x15dc   : > { %v4228_v63 = vsel %vm1411_vm6, %v9923_v58, 0.0 }
0x15dd   : > { %4229 = vadd.xlane.f32.xlu0 %v4228_v63 }
0x15df   : > { %v9927_v38 = vpop.eup %8641 }
0x15e0   : > { %v4203_v44 = vpop.xlane.xlu0 %4202  ;;  %v4231_v17 = vsel %vm1411_vm6, %v9927_v38, 0.0 }
0x15e1   : > { %v4213_v2 = vsub.f32 %v4189_v33, %v4203_v44  ;;  %4232 = vadd.xlane.f32.xlu1 %v4231_v17 }
0x15e3   : > { %v4222_v47 = vmul.f32 1.442695, %v4213_v2 }
0x15e4   : > { %v4206_v7 = vpop.xlane.xlu0 %4205 }
0x15e5   : > { %8643 = vpow2.f32 %v4222_v47  ;;  %v4214_v22 = vsub.f32 %v9898_v54, %v4206_v7 }
0x15e6   : > { %8645 = vpow2.f32 %v4220_v21 }
0x15e7   : > { %v4224_v23 = vmul.f32 1.442695, %v4214_v22 }
0x15e8   : > { %v4209_v41 = vpop.xlane.xlu1 %4208  ;;  %v4263_v19 = vpop.permute.xlu0 %4262 }
0x15e9   : > { %v4215_v33 = vsub.f32 %v9903_v5, %v4209_v41  ;;  %8647 = vpow2.f32 %v4224_v23 }
0x15eb   : > { %v4226_v14 = vmul.f32 1.442695, %v4215_v33 }
0x15ec   : > { %v8427_v50 = vpop.permute.xlu1 %8426  ;;  %v4465_v29 = vpop.permute.xlu0 %4464 }
0x15ed   : > { %v8429_v49 = vunpack.i.h.bf16 %v8427_v50  ;;  %v8428_v15 = vunpack.i.l.bf16 %v8427_v50  ;;  %8649 = vpow2.f32 %v4226_v14 }
0x15ef   : > { %v9931_v10 = vpop.eup %8643  ;;  %v8212_v45 = vpack.c.bf16 %v8429_v49, %v8428_v15 }
0x15f0   : > { %v8432_v57 = vpop.permute.xlu1 %8431  ;;  %v4237_v3 = vsel %vm1411_vm6, %v9931_v10, 0.0  ;;  %v8646_v18 = vpop.eup %8645 }
0x15f1   : > { %v8434_v12 = vunpack.i.h.bf16 %v8432_v57  ;;  %v8433_v11 = vunpack.i.l.bf16 %v8432_v57  ;;  %4238 = vadd.xlane.f32.xlu1 %v4237_v3  ;;  %8213 = vmatpush3.bf16.msra.mxu0 %v8212_v45  ;;  %v4234_v36 = vsel %vm1411_vm6, %v8646_v18, 0.0 }
0x15f2   : > { %7798 = vmatprep.subr.mxu0 %v8772_v62 }
0x15f3   : > { %v8215_v39 = vpack.c.bf16 %v8434_v12, %v8433_v11  ;;  %4456 = vrot.lane.b32.xlu0 %v9824_v37, %s10569_s28  ;;  %v8648_v13 = vpop.eup %8647 }
0x15f4   : > { %v8437_v16 = vpop.permute.xlu1 %8436  ;;  %v4240_v55 = vsel %vm1411_vm6, %v8648_v13, 0.0 }
0x15f5   : > { %7799 = vmatpush3.msra.mxu0 %v4263_v19  ;;  %8216 = vmatpush3.bf16.msra.mxu1 %v8215_v39  ;;  %v8439_v59 = vunpack.i.h.bf16 %v8437_v16  ;;  %v8438_v4 = vunpack.i.l.bf16 %v8437_v16 }
0x15f6   : > { %7813 = vmatprep.subr.mxu1 %v8772_v62  ;;  %8217 = vmatprep.subr.bf16.mxu0 %v8769_v48 }
0x15f7   : > { %v8650_v54 = vpop.eup %8649  ;;  %v8218_v25 = vpack.c.bf16 %v8439_v59, %v8438_v4 }
0x15f8   : > { %v4361_v0 = vpop.permute.xlu1 %4360  ;;  %v4243_v61 = vsel %vm1411_vm6, %v8650_v54, 0.0 }
0x15f9   : > { %7814 = vmatpush3.msra.mxu1 %v4361_v0 }
0x15fa   : > { %8221 = vmatprep.subr.bf16.mxu1 %v8769_v48 }
0x15fc   : > { %v8442_v20 = vpop.permute.xlu1 %8441 }
0x15fd   : > { %v8444_v63 = vunpack.i.h.bf16 %v8442_v20  ;;  %v8443_v44 = vunpack.i.l.bf16 %v8442_v20 }
0x15ff   : > { %v8222_v47 = vpack.c.bf16 %v8444_v63, %v8443_v44 }
0x1600   : > { %v4455_v30 = vpop.permute.xlu1 %4454 }
0x1602   : > { %4568 = vrot.lane.b32.xlu1 %v9848_v51, %s10568_s22  ;;  %s10574_s22 = smov 72  }
0x1606   : > { %4558 = vrot.lane.b32.xlu1 %v9838_v46, %s10569_s28 }
0x160a   : > { %4562 = vrot.lane.b32.xlu1 %v9848_v51, %s10569_s28 }
0x1612   : > { %4235 = vadd.xlane.f32.xlu0 %v4234_v36 }
0x1616   : > { %4241 = vadd.xlane.f32.xlu0 %v4240_v55 }
0x161a   : > { %4244 = vadd.xlane.f32.xlu0 %v4243_v61 }
0x1630   : > { %4458 = vrot.lane.b32.xlu0 %v9834_v43, %s10569_s28 }
0x1634   : > { %4560 = vrot.lane.b32.xlu0 %v9840_v35, %s10569_s28  ;;  %s10575_s28 = smov 104  }
0x166a   : > { %v4230_v5 = vpop.xlane.xlu0 %4229 }
0x166b   : > { %8651 = vrcp.f32 %v4230_v5 }
0x166e   : > { %v4233_v40 = vpop.xlane.xlu1 %4232  ;;  %v4457_v41 = vpop.permute.xlu0 %4456 }
0x166f   : > { %8653 = vrcp.f32 %v4233_v40 }
0x1675   : > { %v8652_v52 = vpop.eup %8651 }
0x1676   : > { %v4252_v9 = vmul.f32 %v8652_v52, %v9923_v58 }
0x1678   : > { %7801 = vmatmul.mubr.msk.f32.vlgmr.msra.gmra.mrb[60].mxu0 %vm1411_vm6, %v4252_v9 }
0x1679   : > { %v8654_v32 = vpop.eup %8653  ;;  %8220 = vmatpush3.bf16.xpose.msk.msra.mxu0 %vm9050_vm4, %v8218_v25  ;;  %7803 = vmatprep.mubr.msk.f32.mxu0 %vm8771_vm2, %v8772_v62 }
0x167a   : > { %v4253_v60 = vmul.f32 %v8654_v32, %v9927_v38  ;;  %7828 = vmatprep.subr.mxu0 %v8772_v62 }
0x167c   : > { %7804 = vmatmul.mubr.msk.f32.gmra.mrb[62].mxu0 %vm1411_vm6, %v4253_v60 }
0x167d   : > { %7806 = vmatprep.mubr.msk.f32.mxu0 %vm8771_vm2, %v8772_v62 }
0x167e   : > { %v4239_v58 = vpop.xlane.xlu1 %4238 }
0x167f   : > { %8655 = vrcp.f32 %v4239_v58 }
0x1681   : > { %7829 = vmatpush3.xpose.msk.msra.mxu0 %vm1205_vm3, %v4465_v29 }
0x1682   : > { %8225 = vmatprep.subr.bf16.mxu0 %v8769_v48  ;;  %v4569_v38 = vpop.permute.xlu1 %4568 }
0x1686   : > { %v4559_v39 = vpop.permute.xlu1 %4558 }
0x1689   : > { %v8656_v17 = vpop.eup %8655 }
0x168a   : > { %v4255_v2 = vmul.f32 %v8656_v17, %v9931_v10  ;;  %v4563_v16 = vpop.permute.xlu1 %4562 }
0x168c   : > { %7816 = vmatmul.mubr.msk.f32.vlgmr.msra.gmra.mrb[84].mxu1 %vm1411_vm6, %v4255_v2 }
0x168d   : > { %8224 = vmatpush3.bf16.xpose.msk.msra.mxu1 %vm9050_vm4, %v8222_v47  ;;  %7818 = vmatprep.mubr.msk.f32.mxu1 %vm8771_vm2, %v8772_v62 }
0x168e   : > { %7843 = vmatprep.subr.mxu1 %v8772_v62 }
0x1695   : > { %7844 = vmatpush3.xpose.msk.msra.mxu1 %vm1205_vm3, %v4569_v38 }
0x1696   : > { %8228 = vmatprep.subr.bf16.mxu1 %v8769_v48 }
0x169f   : > { %v4236_v50 = vpop.xlane.xlu0 %4235 }
0x16a0   : > { %8657 = vrcp.f32 %v4236_v50 }
0x16a3   : > { %v4242_v49 = vpop.xlane.xlu0 %4241 }
0x16a4   : > { %8659 = vrcp.f32 %v4242_v49 }
0x16a7   : > { %v4245_v15 = vpop.xlane.xlu0 %4244 }
0x16a8   : > { %8661 = vrcp.f32 %v4245_v15 }
0x16aa   : > { %v8658_v7 = vpop.eup %8657 }
0x16ab   : > { %v4254_v10 = vmul.f32 %v8658_v7, %v8646_v18  ;;  %v4459_v11 = vpop.permute.xlu0 %4458 }
0x16ad   : > { %7807 = vmatmul.mubr.msk.f32.gmra.mrb[64].mxu0 %vm1411_vm6, %v4254_v10 }
0x16ae   : > { %v8660_v45 = vpop.eup %8659  ;;  %7830 = vmatprep.mubr.msk.f32.mxu0 %vm8771_vm2, %v8772_v62 }
0x16af   : > { %v4256_v57 = vmul.f32 %v8660_v45, %v8648_v13  ;;  %v4561_v19 = vpop.permute.xlu0 %4560 }
0x16b1   : > { %7819 = vmatmul.mubr.msk.f32.gmra.mrb[86].mxu1 %vm1411_vm6, %v4256_v57  ;;  %7831 = vmatmul.mubr.msk.f32.vlgmr.msra.gmra.mrb[66].mxu0 %vm1205_vm3, %v4455_v30 }
0x16b2   : > { %v8662_v3 = vpop.eup %8661  ;;  %7821 = vmatprep.mubr.msk.f32.mxu1 %vm8771_vm2, %v8772_v62  ;;  %7833 = vmatprep.mubr.msk.f32.mxu0 %vm8771_vm2, %v8772_v62 }
0x16b3   : > { %v4257_v12 = vmul.f32 %v8662_v3, %v8650_v54 }
0x16b5   : > { %7822 = vmatmul.mubr.msk.f32.gmra.mrb[88].mxu1 %vm1411_vm6, %v4257_v12  ;;  %7834 = vmatmul.mubr.msk.f32.gmra.mrb[68].mxu0 %vm1205_vm3, %v4457_v41 }
0x16b6   : > { %7836 = vmatprep.mubr.msk.f32.mxu0 %vm8771_vm2, %v8772_v62  ;;  %7845 = vmatprep.mubr.msk.f32.mxu1 %vm8771_vm2, %v8772_v62 }
0x16b9   : > { %7837 = vmatmul.mubr.msk.f32.gmra.mrb[70].mxu0 %vm1205_vm3, %v4459_v11  ;;  %7846 = vmatmul.mubr.msk.f32.vlgmr.msra.gmra.mrb[90].mxu1 %vm1205_vm3, %v4559_v39 }
0x16ba   : > { %7848 = vmatprep.mubr.msk.f32.mxu1 %vm8771_vm2, %v8772_v62  ;;  %7860 = vmatprep.mubr.msk.f32.mxu0 %vm8771_vm2, %v8772_v62 }
0x16bd   : > { %7849 = vmatmul.mubr.msk.f32.gmra.mrb[92].mxu1 %vm1205_vm3, %v4561_v19 }
0x16be   : > { %7851 = vmatprep.mubr.msk.f32.mxu1 %vm8771_vm2, %v8772_v62 }
0x16c1   : > { %7852 = vmatmul.mubr.msk.f32.gmra.mrb[94].mxu1 %vm1205_vm3, %v4563_v16 }
0x16c2   : > { %7875 = vmatprep.mubr.msk.f32.mxu1 %vm8771_vm2, %v8772_v62 }
0x174b   : > { %v10006_v0 = vpop.f32.mrb[60].mxu0 }
0x174c   : > { %v7802_v6 = vpop.f32.mrb[61].mxu0 }
0x174f   : > { %v10008_v21 = vpop.f32.mrb[62].mxu0 }
0x1750   : > { %v7805_v22 = vpop.f32.mrb[63].mxu0 }
0x175f   : > { %v10010_v23 = vpop.f32.mrb[84].mxu1 }
0x1760   : > { %v7817_v33 = vpop.f32.mrb[85].mxu1 }
0x1780   : > { %v10012_v14 = vpop.f32.mrb[64].mxu0 }
0x1781   : > { %v7808_v18 = vpop.f32.mrb[65].mxu0 }
0x1784   : > { %v10014_v36 = vpop.f32.mrb[86].mxu1  ;;  %v4544_v13 = vpop.f32.mrb[66].mxu0 }
0x1785   : > { %v4662_v55 = vmul.f32 0.35355338, %v4544_v13  ;;  %v7820_v54 = vpop.f32.mrb[87].mxu1  ;;  %v7832_v61 = vpop.f32.mrb[67].mxu0 }
0x1787   : > { %v4668_v20 = vadd.f32 %v4662_v55, %v9088_v24 }
0x1788   : > { %v10017_v29 = vpop.f32.mrb[88].mxu1  ;;  %v4549_v30 = vpop.f32.mrb[68].mxu0 }
0x1789   : > { %v4663_v5 = vmul.f32 0.35355338, %v4549_v30  ;;  %v7823_v40 = vpop.f32.mrb[89].mxu1  ;;  %v7835_v59 = vpop.f32.mrb[69].mxu0  ;;  %v4674_v4 = vsel %vm1411_vm6, %v4668_v20, -inf }
0x178a   : > { %4675 = vmax.xlane.f32.xlu0 %v4674_v4 }
0x178b   : > { %v4669_v52 = vadd.f32 %v4663_v5, %v9088_v24 }
0x178c   : > { %v4554_v9 = vpop.f32.mrb[70].mxu0  ;;  %v4648_v25 = vpop.f32.mrb[90].mxu1 }
0x178d   : > { %v4664_v32 = vmul.f32 0.35355338, %v4554_v9  ;;  %v4665_v60 = vmul.f32 0.35355338, %v4648_v25  ;;  %v7838_v58 = vpop.f32.mrb[71].mxu0  ;;  %v7847_v63 = vpop.f32.mrb[91].mxu1 }
0x178e   : > { %v4677_v44 = vsel %vm1411_vm6, %v4669_v52, -inf }
0x178f   : > { %v10023_v17 = vadd.f32 %v4664_v32, %v9088_v24  ;;  %4678 = vmax.xlane.f32.xlu1 %v4677_v44  ;;  %v4671_v47 = vadd.f32 %v4665_v60, %v9088_v24 }
0x1790   : > { %v4653_v2 = vpop.f32.mrb[92].mxu1 }
0x1791   : > { %v4666_v38 = vmul.f32 0.35355338, %v4653_v2  ;;  %v7850_v41 = vpop.f32.mrb[93].mxu1  ;;  %v4680_v50 = vsel %vm1411_vm6, %v10023_v17, -inf  ;;  %v4683_v45 = vsel %vm1411_vm6, %v4671_v47, -inf }
0x1792   : > { %4681 = vmax.xlane.f32.xlu0 %v4680_v50 }
0x1793   : > { %v10029_v15 = vadd.f32 %v4666_v38, %v9088_v24 }
0x1794   : > { %v4658_v49 = vpop.f32.mrb[94].mxu1 }
0x1795   : > { %v4667_v7 = vmul.f32 0.35355338, %v4658_v49  ;;  %v7853_v10 = vpop.f32.mrb[95].mxu1  ;;  %v4686_v3 = vsel %vm1411_vm6, %v10029_v15, -inf }
0x1796   : > { %4684 = vmax.xlane.f32.xlu0 %v4683_v45 }
0x1797   : > { %v10033_v57 = vadd.f32 %v4667_v7, %v9088_v24 }
0x1799   : > { %v4689_v12 = vsel %vm1411_vm6, %v10033_v57, -inf }
0x179a   : > { %4687 = vmax.xlane.f32.xlu0 %v4686_v3  ;;  %4690 = vmax.xlane.f32.xlu1 %v4689_v12 }
0x17ab   : > { %8446 = vrot.lane.b32.xlu1 %v9830_v34, %s10570_s23 }
0x17af   : > { %8451 = vrot.lane.b32.xlu1 %v9844_v28, %s10570_s23 }
0x17b0   : > { %4744 = vrot.lane.b32.xlu0 %v9834_v43, %s10570_s23 }
0x17b3   : > { %8456 = vrot.lane.b32.xlu1 %v9830_v34, %s10571_s2 }
0x17b4   : > { %4946 = vrot.lane.b32.xlu0 %v9834_v43, %s10571_s2 }
0x17b7   : > { %4842 = vrot.lane.b32.xlu1 %v9848_v51, %s10570_s23  ;;  %s10576_s23 = smov 40  }
0x17bb   : > { %8461 = vrot.lane.b32.xlu1 %v9844_v28, %s10571_s2 }
0x17bf   : > { %4936 = vrot.lane.b32.xlu1 %v9826_v26, %s10572_s0 }
0x1817   : > { %v4676_v11 = vpop.xlane.xlu0 %4675 }
0x1818   : > { %v4692_v39 = vsub.f32 %v4668_v20, %v4676_v11 }
0x181a   : > { %v4698_v19 = vmul.f32 1.442695, %v4692_v39 }
0x181c   : > { %8663 = vpow2.f32 %v4698_v19  ;;  %v4679_v16 = vpop.xlane.xlu1 %4678 }
0x181d   : > { %v4693_v6 = vsub.f32 %v4669_v52, %v4679_v16 }
0x181f   : > { %v4700_v22 = vmul.f32 1.442695, %v4693_v6  ;;  %v4682_v33 = vpop.xlane.xlu0 %4681 }
0x1820   : > { %v4694_v41 = vsub.f32 %v10023_v17, %v4682_v33 }
0x1821   : > { %8665 = vpow2.f32 %v4700_v22 }
0x1822   : > { %v4702_v50 = vmul.f32 1.442695, %v4694_v41 }
0x1823   : > { %v4685_v18 = vpop.xlane.xlu0 %4684 }
0x1824   : > { %v4695_v13 = vsub.f32 %v4671_v47, %v4685_v18 }
0x1826   : > { %v10055_v55 = vpop.eup %8663  ;;  %v4704_v54 = vmul.f32 1.442695, %v4695_v13 }
0x1827   : > { %v4691_v61 = vpop.xlane.xlu1 %4690  ;;  %v4710_v30 = vsel %vm1411_vm6, %v10055_v55, 0.0  ;;  %v4688_v52 = vpop.xlane.xlu0 %4687 }
0x1828   : > { %8667 = vpow2.f32 %v4704_v54  ;;  %4711 = vadd.xlane.f32.xlu0 %v4710_v30  ;;  %v4696_v49 = vsub.f32 %v10029_v15, %v4688_v52  ;;  %v4697_v10 = vsub.f32 %v10033_v57, %v4691_v61 }
0x1829   : > { %8669 = vpow2.f32 %v4702_v50 }
0x182a   : > { %v4706_v7 = vmul.f32 1.442695, %v4696_v49  ;;  %v4708_v45 = vmul.f32 1.442695, %v4697_v10 }
0x182b   : > { %v10059_v5 = vpop.eup %8665  ;;  %v8447_v20 = vpop.permute.xlu1 %8446 }
0x182c   : > { %v8449_v40 = vunpack.i.h.bf16 %v8447_v20  ;;  %v8448_v59 = vunpack.i.l.bf16 %v8447_v20  ;;  %v4713_v4 = vsel %vm1411_vm6, %v10059_v5, 0.0  ;;  %v4745_v44 = vpop.permute.xlu0 %4744  ;;  %8671 = vpow2.f32 %v4706_v7 }
0x182d   : > { %4714 = vadd.xlane.f32.xlu1 %v4713_v4  ;;  %8673 = vpow2.f32 %v4708_v45 }
0x182e   : > { %v8226_v9 = vpack.c.bf16 %v8449_v40, %v8448_v59 }
0x182f   : > { %v8452_v25 = vpop.permute.xlu1 %8451 }
0x1830   : > { %v8454_v32 = vunpack.i.h.bf16 %v8452_v25  ;;  %v8453_v60 = vunpack.i.l.bf16 %v8452_v25  ;;  %8227 = vmatpush3.bf16.msra.mxu0 %v8226_v9  ;;  %v4947_v19 = vpop.permute.xlu0 %4946 }
0x1831   : > { %7858 = vmatprep.subr.mxu0 %v8772_v62 }
0x1832   : > { %v10064_v58 = vpop.eup %8667  ;;  %v8229_v63 = vpack.c.bf16 %v8454_v32, %v8453_v60 }
0x1833   : > { %v8457_v2 = vpop.permute.xlu1 %8456  ;;  %v4719_v47 = vsel %vm1411_vm6, %v10064_v58, 0.0  ;;  %v8670_v3 = vpop.eup %8669 }
0x1834   : > { %4720 = vadd.xlane.f32.xlu1 %v4719_v47  ;;  %7859 = vmatpush3.msra.mxu0 %v4745_v44  ;;  %v4716_v12 = vsel %vm1411_vm6, %v8670_v3, 0.0  ;;  %v8459_v33 = vunpack.i.h.bf16 %v8457_v2  ;;  %v8458_v18 = vunpack.i.l.bf16 %v8457_v2 }
0x1835   : > { %8230 = vmatpush3.bf16.msra.mxu1 %v8229_v63  ;;  %8231 = vmatprep.subr.bf16.mxu0 %v8769_v48 }
0x1836   : > { %7873 = vmatprep.subr.mxu1 %v8772_v62  ;;  %v8672_v17 = vpop.eup %8671  ;;  %v8232_v30 = vpack.c.bf16 %v8459_v33, %v8458_v18 }
0x1837   : > { %v4843_v38 = vpop.permute.xlu1 %4842  ;;  %v4722_v11 = vsel %vm1411_vm6, %v8672_v17, 0.0  ;;  %v8674_v39 = vpop.eup %8673 }
0x1838   : > { %v4725_v15 = vsel %vm1411_vm6, %v8674_v39, 0.0 }
0x1839   : > { %7874 = vmatpush3.msra.mxu1 %v4843_v38 }
0x183a   : > { %8235 = vmatprep.subr.bf16.mxu1 %v8769_v48 }
0x183b   : > { %v8462_v57 = vpop.permute.xlu1 %8461 }
0x183c   : > { %v8463_v59 = vunpack.i.l.bf16 %v8462_v57 }
0x183e   : > { %4938 = vrot.lane.b32.xlu0 %v9824_v37, %s10572_s0 }
0x183f   : > { %v4937_v6 = vpop.permute.xlu1 %4936 }
0x1845   : > { %5050 = vrot.lane.b32.xlu1 %v9848_v51, %s10571_s2  ;;  %s10577_s2 = smov 8  }
0x1849   : > { %5040 = vrot.lane.b32.xlu1 %v9838_v46, %s10572_s0 }
0x184d   : > { %5044 = vrot.lane.b32.xlu1 %v9848_v51, %s10572_s0 }
0x185d   : > { %4717 = vadd.xlane.f32.xlu0 %v4716_v12 }
0x1861   : > { %4723 = vadd.xlane.f32.xlu0 %v4722_v11 }
0x1865   : > { %4726 = vadd.xlane.f32.xlu0 %v4725_v15 }
0x187b   : > { %4940 = vrot.lane.b32.xlu0 %v9834_v43, %s10572_s0 }
0x187f   : > { %5042 = vrot.lane.b32.xlu0 %v9840_v35, %s10572_s0  ;;  %s10578_s0 = smov 16  }
0x18b5   : > { %v4712_v16 = vpop.xlane.xlu0 %4711 }
0x18b6   : > { %8675 = vrcp.f32 %v4712_v16 }
0x18b9   : > { %v4939_v25 = vpop.permute.xlu0 %4938 }
0x18ba   : > { %v4715_v22 = vpop.xlane.xlu1 %4714 }
0x18bb   : > { %8677 = vrcp.f32 %v4715_v22 }
0x18c0   : > { %v8676_v13 = vpop.eup %8675 }
0x18c1   : > { %v4734_v54 = vmul.f32 %v8676_v13, %v10055_v55  ;;  %v4721_v61 = vpop.xlane.xlu1 %4720  ;;  %v8464_v55 = vunpack.i.h.bf16 %v8462_v57 }
0x18c2   : > { %8679 = vrcp.f32 %v4721_v61 }
0x18c3   : > { %7861 = vmatmul.mubr.msk.f32.vlgmr.msra.gmra.mrb[72].mxu0 %vm1411_vm6, %v4734_v54  ;;  %v8236_v9 = vpack.c.bf16 %v8464_v55, %v8463_v59 }
0x18c4   : > { %8234 = vmatpush3.bf16.xpose.msk.msra.mxu0 %vm9050_vm4, %v8232_v30  ;;  %7863 = vmatprep.mubr.msk.f32.mxu0 %vm8771_vm2, %v8772_v62 }
0x18c5   : > { %v8678_v20 = vpop.eup %8677  ;;  %7888 = vmatprep.subr.mxu0 %v8772_v62 }
0x18c6   : > { %v4735_v40 = vmul.f32 %v8678_v20, %v10059_v5  ;;  %v5051_v5 = vpop.permute.xlu1 %5050 }
0x18c8   : > { %7864 = vmatmul.mubr.msk.f32.gmra.mrb[74].mxu0 %vm1411_vm6, %v4735_v40 }
0x18c9   : > { %7866 = vmatprep.mubr.msk.f32.mxu0 %vm8771_vm2, %v8772_v62 }
0x18ca   : > { %v5041_v49 = vpop.permute.xlu1 %5040 }
0x18cc   : > { %v8680_v4 = vpop.eup %8679  ;;  %7889 = vmatpush3.xpose.msk.msra.mxu0 %vm1205_vm3, %v4947_v19 }
0x18cd   : > { %v4737_v52 = vmul.f32 %v8680_v4, %v10064_v58  ;;  %8239 = vmatprep.subr.bf16.mxu0 %v8769_v48 }
0x18ce   : > { %v5045_v10 = vpop.permute.xlu1 %5044 }
0x18cf   : > { %7876 = vmatmul.mubr.msk.f32.vlgmr.msra.gmra.mrb[96].mxu1 %vm1411_vm6, %v4737_v52 }
0x18d0   : > { %8238 = vmatpush3.bf16.xpose.msk.msra.mxu1 %vm9050_vm4, %v8236_v9  ;;  %7878 = vmatprep.mubr.msk.f32.mxu1 %vm8771_vm2, %v8772_v62 }
0x18d1   : > { %7903 = vmatprep.subr.mxu1 %v8772_v62 }
0x18d8   : > { %7904 = vmatpush3.xpose.msk.msra.mxu1 %vm1205_vm3, %v5051_v5 }
0x18d9   : > { %8242 = vmatprep.subr.bf16.mxu1 %v8769_v48 }
0x18ea   : > { %v4718_v32 = vpop.xlane.xlu0 %4717 }
0x18eb   : > { %8681 = vrcp.f32 %v4718_v32 }
0x18ee   : > { %v4724_v60 = vpop.xlane.xlu0 %4723 }
0x18ef   : > { %8683 = vrcp.f32 %v4724_v60 }
0x18f2   : > { %v4727_v58 = vpop.xlane.xlu0 %4726 }
0x18f3   : > { %8685 = vrcp.f32 %v4727_v58 }
0x18f5   : > { %v8682_v63 = vpop.eup %8681 }
0x18f6   : > { %v4736_v44 = vmul.f32 %v8682_v63, %v8670_v3  ;;  %v4941_v50 = vpop.permute.xlu0 %4940 }
0x18f8   : > { %7867 = vmatmul.mubr.msk.f32.gmra.mrb[76].mxu0 %vm1411_vm6, %v4736_v44 }
0x18f9   : > { %v8684_v2 = vpop.eup %8683  ;;  %7890 = vmatprep.mubr.msk.f32.mxu0 %vm8771_vm2, %v8772_v62 }
0x18fa   : > { %v4738_v47 = vmul.f32 %v8684_v2, %v8672_v17  ;;  %v5043_v7 = vpop.permute.xlu0 %5042 }
0x18fc   : > { %7879 = vmatmul.mubr.msk.f32.gmra.mrb[98].mxu1 %vm1411_vm6, %v4738_v47  ;;  %7891 = vmatmul.mubr.msk.f32.vlgmr.msra.gmra.mrb[78].mxu0 %vm1205_vm3, %v4937_v6 }
0x18fd   : > { %v8686_v38 = vpop.eup %8685  ;;  %7881 = vmatprep.mubr.msk.f32.mxu1 %vm8771_vm2, %v8772_v62  ;;  %7893 = vmatprep.mubr.msk.f32.mxu0 %vm8771_vm2, %v8772_v62 }
0x18fe   : > { %v4739_v41 = vmul.f32 %v8686_v38, %v8674_v39 }
0x1900   : > { %7882 = vmatmul.mubr.msk.f32.gmra.mrb[100].mxu1 %vm1411_vm6, %v4739_v41  ;;  %7894 = vmatmul.mubr.msk.f32.gmra.mrb[80].mxu0 %vm1205_vm3, %v4939_v25 }
0x1901   : > { %7896 = vmatprep.mubr.msk.f32.mxu0 %vm8771_vm2, %v8772_v62  ;;  %7905 = vmatprep.mubr.msk.f32.mxu1 %vm8771_vm2, %v8772_v62 }
0x1904   : > { %7897 = vmatmul.mubr.msk.f32.gmra.mrb[82].mxu0 %vm1205_vm3, %v4941_v50  ;;  %7906 = vmatmul.mubr.msk.f32.vlgmr.msra.gmra.mrb[102].mxu1 %vm1205_vm3, %v5041_v49 }
0x1905   : > { %7908 = vmatprep.mubr.msk.f32.mxu1 %vm8771_vm2, %v8772_v62  ;;  %7920 = vmatprep.mubr.msk.f32.mxu0 %vm8771_vm2, %v8772_v62 }
0x1908   : > { %7909 = vmatmul.mubr.msk.f32.gmra.mrb[104].mxu1 %vm1205_vm3, %v5043_v7 }
0x1909   : > { %7911 = vmatprep.mubr.msk.f32.mxu1 %vm8771_vm2, %v8772_v62 }
0x190c   : > { %7912 = vmatmul.mubr.msk.f32.gmra.mrb[106].mxu1 %vm1205_vm3, %v5045_v10 }
0x190d   : > { %7935 = vmatprep.mubr.msk.f32.mxu1 %vm8771_vm2, %v8772_v62 }
0x1996   : > { %v10138_v45 = vpop.f32.mrb[72].mxu0 }
0x1997   : > { %v7862_v3 = vpop.f32.mrb[73].mxu0 }
0x199b   : > { %v10140_v12 = vpop.f32.mrb[74].mxu0 }
0x199c   : > { %v7865_v17 = vpop.f32.mrb[75].mxu0 }
0x19a2   : > { %v10142_v11 = vpop.f32.mrb[96].mxu1 }
0x19a3   : > { %v7877_v39 = vpop.f32.mrb[97].mxu1 }
0x19cb   : > { %v10144_v15 = vpop.f32.mrb[76].mxu0 }
0x19cc   : > { %v7868_v57 = vpop.f32.mrb[77].mxu0 }
0x19cf   : > { %v10146_v19 = vpop.f32.mrb[98].mxu1  ;;  %v5026_v16 = vpop.f32.mrb[78].mxu0 }
0x19d0   : > { %v5144_v6 = vmul.f32 0.35355338, %v5026_v16  ;;  %v7880_v22 = vpop.f32.mrb[99].mxu1  ;;  %v7892_v33 = vpop.f32.mrb[79].mxu0 }
0x19d2   : > { %v5150_v18 = vadd.f32 %v5144_v6, %v9088_v24 }
0x19d3   : > { %v10149_v13 = vpop.f32.mrb[100].mxu1  ;;  %v5031_v54 = vpop.f32.mrb[80].mxu0 }
0x19d4   : > { %v5145_v61 = vmul.f32 0.35355338, %v5031_v54  ;;  %v7883_v30 = vpop.f32.mrb[101].mxu1  ;;  %v7895_v20 = vpop.f32.mrb[81].mxu0  ;;  %v5156_v40 = vsel %vm1411_vm6, %v5150_v18, -inf }
0x19d5   : > { %5157 = vmax.xlane.f32.xlu0 %v5156_v40 }
0x19d6   : > { %v5151_v55 = vadd.f32 %v5145_v61, %v9088_v24 }
0x19d7   : > { %v5036_v59 = vpop.f32.mrb[82].mxu0  ;;  %v5130_v4 = vpop.f32.mrb[102].mxu1 }
0x19d8   : > { %v5146_v52 = vmul.f32 0.35355338, %v5036_v59  ;;  %v5147_v9 = vmul.f32 0.35355338, %v5130_v4  ;;  %v7898_v5 = vpop.f32.mrb[83].mxu0  ;;  %v7907_v25 = vpop.f32.mrb[103].mxu1 }
0x19d9   : > { %v5159_v32 = vsel %vm1411_vm6, %v5151_v55, -inf }
0x19da   : > { %v10155_v60 = vadd.f32 %v5146_v52, %v9088_v24  ;;  %5160 = vmax.xlane.f32.xlu1 %v5159_v32  ;;  %v5153_v63 = vadd.f32 %v5147_v9, %v9088_v24 }
0x19db   : > { %v5135_v58 = vpop.f32.mrb[104].mxu1 }
0x19dc   : > { %v5148_v44 = vmul.f32 0.35355338, %v5135_v58  ;;  %v7910_v2 = vpop.f32.mrb[105].mxu1  ;;  %v5162_v47 = vsel %vm1411_vm6, %v10155_v60, -inf  ;;  %v5165_v7 = vsel %vm1411_vm6, %v5153_v63, -inf }
0x19dd   : > { %5163 = vmax.xlane.f32.xlu0 %v5162_v47 }
0x19de   : > { %v10161_v41 = vadd.f32 %v5148_v44, %v9088_v24 }
0x19df   : > { %v5140_v38 = vpop.f32.mrb[106].mxu1 }
0x19e0   : > { %v5149_v50 = vmul.f32 0.35355338, %v5140_v38  ;;  %v7913_v49 = vpop.f32.mrb[107].mxu1  ;;  %v5168_v3 = vsel %vm1411_vm6, %v10161_v41, -inf }
0x19e1   : > { %5166 = vmax.xlane.f32.xlu0 %v5165_v7 }
0x19e2   : > { %v10165_v10 = vadd.f32 %v5149_v50, %v9088_v24 }
0x19e4   : > { %v5171_v17 = vsel %vm1411_vm6, %v10165_v10, -inf }
0x19e5   : > { %5169 = vmax.xlane.f32.xlu0 %v5168_v3  ;;  %5172 = vmax.xlane.f32.xlu1 %v5171_v17 }
0x19f6   : > { %8466 = vrot.lane.b32.xlu1 %v9830_v34, %s10573_s1 }
0x19fa   : > { %8471 = vrot.lane.b32.xlu1 %v9844_v28, %s10573_s1 }
0x19fb   : > { %5226 = vrot.lane.b32.xlu0 %v9834_v43, %s10573_s1 }
0x19fe   : > { %8476 = vrot.lane.b32.xlu1 %v9830_v34, %s10574_s22 }
0x19ff   : > { %5428 = vrot.lane.b32.xlu0 %v9834_v43, %s10574_s22 }
0x1a02   : > { %5324 = vrot.lane.b32.xlu1 %v9848_v51, %s10573_s1  ;;  %s10579_s1 = smov 24  }
0x1a06   : > { %8481 = vrot.lane.b32.xlu1 %v9844_v28, %s10574_s22 }
0x1a0a   : > { %5418 = vrot.lane.b32.xlu1 %v9826_v26, %s10575_s28 }
0x1a62   : > { %v5158_v39 = vpop.xlane.xlu0 %5157 }
0x1a63   : > { %v5174_v57 = vsub.f32 %v5150_v18, %v5158_v39 }
0x1a65   : > { %v5180_v16 = vmul.f32 1.442695, %v5174_v57 }
0x1a67   : > { %8687 = vpow2.f32 %v5180_v16  ;;  %v5161_v6 = vpop.xlane.xlu1 %5160 }
0x1a68   : > { %v5175_v22 = vsub.f32 %v5151_v55, %v5161_v6 }
0x1a6a   : > { %v5182_v33 = vmul.f32 1.442695, %v5175_v22  ;;  %v5164_v54 = vpop.xlane.xlu0 %5163 }
0x1a6b   : > { %v5176_v7 = vsub.f32 %v10155_v60, %v5164_v54 }
0x1a6c   : > { %8689 = vpow2.f32 %v5182_v33 }
0x1a6d   : > { %v5184_v3 = vmul.f32 1.442695, %v5176_v7 }
0x1a6e   : > { %v5167_v61 = vpop.xlane.xlu0 %5166 }
0x1a6f   : > { %v5177_v30 = vsub.f32 %v5153_v63, %v5167_v61 }
0x1a71   : > { %v10187_v20 = vpop.eup %8687  ;;  %v5186_v40 = vmul.f32 1.442695, %v5177_v30 }
0x1a72   : > { %v5173_v59 = vpop.xlane.xlu1 %5172  ;;  %v5192_v4 = vsel %vm1411_vm6, %v10187_v20, 0.0  ;;  %v5170_v5 = vpop.xlane.xlu0 %5169 }
0x1a73   : > { %8691 = vpow2.f32 %v5186_v40  ;;  %5193 = vadd.xlane.f32.xlu0 %v5192_v4  ;;  %v5178_v17 = vsub.f32 %v10161_v41, %v5170_v5  ;;  %v5179_v57 = vsub.f32 %v10165_v10, %v5173_v59 }
0x1a74   : > { %8693 = vpow2.f32 %v5184_v3 }
0x1a75   : > { %v5188_v39 = vmul.f32 1.442695, %v5178_v17 }
0x1a76   : > { %v10191_v26 = vpop.eup %8689  ;;  %v8467_v18 = vpop.permute.xlu1 %8466 }
0x1a77   : > { %v8469_v52 = vunpack.i.h.bf16 %v8467_v18  ;;  %v8468_v9 = vunpack.i.l.bf16 %v8467_v18  ;;  %v5195_v55 = vsel %vm1411_vm6, %v10191_v26, 0.0  ;;  %v5227_v47 = vpop.permute.xlu0 %5226  ;;  %8695 = vpow2.f32 %v5188_v39 }
0x1a78   : > { %5196 = vadd.xlane.f32.xlu1 %v5195_v55 }
0x1a79   : > { %v8240_v25 = vpack.c.bf16 %v8469_v52, %v8468_v9 }
0x1a7a   : > { %v8472_v32 = vpop.permute.xlu1 %8471 }
0x1a7b   : > { %v8474_v58 = vunpack.i.h.bf16 %v8472_v32  ;;  %v8473_v63 = vunpack.i.l.bf16 %v8472_v32  ;;  %8241 = vmatpush3.bf16.msra.mxu0 %v8240_v25  ;;  %v5429_v33 = vpop.permute.xlu0 %5428 }
0x1a7c   : > { %7918 = vmatprep.subr.mxu0 %v8772_v62 }
0x1a7d   : > { %v10196_v44 = vpop.eup %8691  ;;  %v8243_v2 = vpack.c.bf16 %v8474_v58, %v8473_v63 }
0x1a7e   : > { %v8477_v38 = vpop.permute.xlu1 %8476  ;;  %v5201_v50 = vsel %vm1411_vm6, %v10196_v44, 0.0  ;;  %v8694_v16 = vpop.eup %8693 }
0x1a7f   : > { %5202 = vadd.xlane.f32.xlu1 %v5201_v50  ;;  %7919 = vmatpush3.msra.mxu0 %v5227_v47  ;;  %v5198_v6 = vsel %vm1411_vm6, %v8694_v16, 0.0  ;;  %v8479_v40 = vunpack.i.h.bf16 %v8477_v38  ;;  %v8478_v59 = vunpack.i.l.bf16 %v8477_v38 }
0x1a80   : > { %8244 = vmatpush3.bf16.msra.mxu1 %v8243_v2  ;;  %8245 = vmatprep.subr.bf16.mxu0 %v8769_v48 }
0x1a81   : > { %7933 = vmatprep.subr.mxu1 %v8772_v62  ;;  %v8696_v60 = vpop.eup %8695  ;;  %v8246_v9 = vpack.c.bf16 %v8479_v40, %v8478_v59 }
0x1a82   : > { %v5325_v49 = vpop.permute.xlu1 %5324 }
0x1a84   : > { %7934 = vmatpush3.msra.mxu1 %v5325_v49 }
0x1a85   : > { %8249 = vmatprep.subr.bf16.mxu1 %v8769_v48 }
0x1a86   : > { %v8482_v10 = vpop.permute.xlu1 %8481 }
0x1a87   : > { %v8483_v5 = vunpack.i.l.bf16 %v8482_v10 }
0x1a89   : > { %5420 = vrot.lane.b32.xlu0 %v9824_v37, %s10575_s28  ;;  %v5190_v37 = vmul.f32 1.442695, %v5179_v57 }
0x1a8a   : > { %v5419_v61 = vpop.permute.xlu1 %5418 }
0x1a8b   : > { %8697 = vpow2.f32 %v5190_v37 }
0x1a90   : > { %5532 = vrot.lane.b32.xlu1 %v9848_v51, %s10574_s22  ;;  %s830_s22 = scalar_lea.vmem %s10527_s17, %s8979_s30 }
0x1a94   : > { %5522 = vrot.lane.b32.xlu1 %v9838_v46, %s10575_s28  ;;  %v5204_v46 = vsel %vm1411_vm6, %v8696_v60, 0.0 }
0x1a95   : > { %v8698_v22 = vpop.eup %8697 }
0x1a96   : > { %v5207_v41 = vsel %vm1411_vm6, %v8698_v22, 0.0 }
0x1a98   : > { %5526 = vrot.lane.b32.xlu1 %v9848_v51, %s10575_s28 }
0x1aa8   : > { %5199 = vadd.xlane.f32.xlu0 %v5198_v6 }
0x1aac   : > { %5205 = vadd.xlane.f32.xlu0 %v5204_v46 }
0x1ab0   : > { %5208 = vadd.xlane.f32.xlu0 %v5207_v41 }
0x1ac6   : > { %5422 = vrot.lane.b32.xlu0 %v9834_v43, %s10575_s28 }
0x1aca   : > { %5524 = vrot.lane.b32.xlu0 %v9840_v35, %s10575_s28 }
0x1b00   : > { %v5194_v54 = vpop.xlane.xlu0 %5193 }
0x1b01   : > { %8699 = vrcp.f32 %v5194_v54 }
0x1b04   : > { %v5421_v63 = vpop.permute.xlu0 %5420 }
0x1b05   : > { %v5197_v30 = vpop.xlane.xlu1 %5196 }
0x1b06   : > { %8701 = vrcp.f32 %v5197_v30 }
0x1b0b   : > { %v8700_v4 = vpop.eup %8699 }
0x1b0c   : > { %v5216_v18 = vmul.f32 %v8700_v4, %v10187_v20  ;;  %v5203_v52 = vpop.xlane.xlu1 %5202  ;;  %v8484_v20 = vunpack.i.h.bf16 %v8482_v10 }
0x1b0d   : > { %8703 = vrcp.f32 %v5203_v52 }
0x1b0e   : > { %7921 = vmatmul.mubr.msk.f32.vlgmr.msra.gmra.mrb[84].mxu0 %vm1411_vm6, %v5216_v18  ;;  %v8250_v58 = vpack.c.bf16 %v8484_v20, %v8483_v5 }
0x1b0f   : > { %8248 = vmatpush3.bf16.xpose.msk.msra.mxu0 %vm9050_vm4, %v8246_v9  ;;  %7923 = vmatprep.mubr.msk.f32.mxu0 %vm8771_vm2, %v8772_v62 }
0x1b10   : > { %v8702_v35 = vpop.eup %8701  ;;  %7948 = vmatprep.subr.mxu0 %v8772_v62 }
0x1b11   : > { %v5217_v55 = vmul.f32 %v8702_v35, %v10191_v26  ;;  %v5533_v26 = vpop.permute.xlu1 %5532 }
0x1b13   : > { %7924 = vmatmul.mubr.msk.f32.gmra.mrb[86].mxu0 %vm1411_vm6, %v5217_v55 }
0x1b14   : > { %7926 = vmatprep.mubr.msk.f32.mxu0 %vm8771_vm2, %v8772_v62 }
0x1b15   : > { %v5523_v17 = vpop.permute.xlu1 %5522 }
0x1b17   : > { %v8704_v25 = vpop.eup %8703  ;;  %7949 = vmatpush3.xpose.msk.msra.mxu0 %vm1205_vm3, %v5429_v33 }
0x1b18   : > { %v5219_v32 = vmul.f32 %v8704_v25, %v10196_v44  ;;  %8253 = vmatprep.subr.bf16.mxu0 %v8769_v48 }
0x1b19   : > { %v5527_v57 = vpop.permute.xlu1 %5526 }
0x1b1a   : > { %7936 = vmatmul.mubr.msk.f32.vlgmr.msra.gmra.mrb[108].mxu1 %vm1411_vm6, %v5219_v32 }
0x1b1b   : > { %8252 = vmatpush3.bf16.xpose.msk.msra.mxu1 %vm9050_vm4, %v8250_v58  ;;  %7938 = vmatprep.mubr.msk.f32.mxu1 %vm8771_vm2, %v8772_v62 }
0x1b1c   : > { %7963 = vmatprep.subr.mxu1 %v8772_v62 }
0x1b23   : > { %7964 = vmatpush3.xpose.msk.msra.mxu1 %vm1205_vm3, %v5533_v26 }
0x1b24   : > { %8256 = vmatprep.subr.bf16.mxu1 %v8769_v48 }
0x1b35   : > { %v5200_v44 = vpop.xlane.xlu0 %5199 }
0x1b36   : > { %8705 = vrcp.f32 %v5200_v44 }
0x1b39   : > { %v5206_v2 = vpop.xlane.xlu0 %5205 }
0x1b3a   : > { %8707 = vrcp.f32 %v5206_v2 }
0x1b3d   : > { %v5209_v47 = vpop.xlane.xlu0 %5208 }
0x1b3e   : > { %8709 = vrcp.f32 %v5209_v47 }
0x1b40   : > { %v8706_v38 = vpop.eup %8705 }
0x1b41   : > { %v5218_v8 = vmul.f32 %v8706_v38, %v8694_v16  ;;  %v5423_v3 = vpop.permute.xlu0 %5422 }
0x1b43   : > { %7927 = vmatmul.mubr.msk.f32.gmra.mrb[88].mxu0 %vm1411_vm6, %v5218_v8 }
0x1b44   : > { %v8708_v50 = vpop.eup %8707  ;;  %7950 = vmatprep.mubr.msk.f32.mxu0 %vm8771_vm2, %v8772_v62 }
0x1b45   : > { %v5220_v49 = vmul.f32 %v8708_v50, %v8696_v60  ;;  %v5525_v39 = vpop.permute.xlu0 %5524 }
0x1b47   : > { %7939 = vmatmul.mubr.msk.f32.gmra.mrb[110].mxu1 %vm1411_vm6, %v5220_v49  ;;  %7951 = vmatmul.mubr.msk.f32.vlgmr.msra.gmra.mrb[90].mxu0 %vm1205_vm3, %v5419_v61 }
0x1b48   : > { %v8710_v48 = vpop.eup %8709  ;;  %7941 = vmatprep.mubr.msk.f32.mxu1 %vm8771_vm2, %v8772_v62  ;;  %7953 = vmatprep.mubr.msk.f32.mxu0 %vm8771_vm2, %v8772_v62 }
0x1b49   : > { %v5221_v7 = vmul.f32 %v8710_v48, %v8698_v22 }
0x1b4b   : > { %7942 = vmatmul.mubr.msk.f32.gmra.mrb[112].mxu1 %vm1411_vm6, %v5221_v7  ;;  %7954 = vmatmul.mubr.msk.f32.gmra.mrb[92].mxu0 %vm1205_vm3, %v5421_v63 }
0x1b4c   : > { %7956 = vmatprep.mubr.msk.f32.mxu0 %vm8771_vm2, %v8772_v62  ;;  %7965 = vmatprep.mubr.msk.f32.mxu1 %vm8771_vm2, %v8772_v62 }
0x1b4f   : > { %7957 = vmatmul.mubr.msk.f32.gmra.mrb[94].mxu0 %vm1205_vm3, %v5423_v3  ;;  %7966 = vmatmul.mubr.msk.f32.vlgmr.msra.gmra.mrb[114].mxu1 %vm1205_vm3, %v5523_v17 }
0x1b50   : > { %7968 = vmatprep.mubr.msk.f32.mxu1 %vm8771_vm2, %v8772_v62  ;;  %7980 = vmatprep.mubr.msk.f32.mxu0 %vm8771_vm2, %v8772_v62 }
0x1b53   : > { %7969 = vmatmul.mubr.msk.f32.gmra.mrb[116].mxu1 %vm1205_vm3, %v5525_v39 }
0x1b54   : > { %7971 = vmatprep.mubr.msk.f32.mxu1 %vm8771_vm2, %v8772_v62 }
0x1b57   : > { %7972 = vmatmul.mubr.msk.f32.gmra.mrb[118].mxu1 %vm1205_vm3, %v5527_v57 }
0x1b58   : > { %7995 = vmatprep.mubr.msk.f32.mxu1 %vm8771_vm2, %v8772_v62 }
0x1be1   : > { %v10270_v37 = vpop.f32.mrb[84].mxu0 }
0x1be2   : > { %v7922_v16 = vpop.f32.mrb[85].mxu0 }
0x1be6   : > { %v10272_v6 = vpop.f32.mrb[86].mxu0 }
0x1be7   : > { %v7925_v60 = vpop.f32.mrb[87].mxu0 }
0x1bed   : > { %v10274_v46 = vpop.f32.mrb[108].mxu1 }
0x1bee   : > { %v7937_v22 = vpop.f32.mrb[109].mxu1 }
0x1c16   : > { %v10276_v41 = vpop.f32.mrb[88].mxu0 }
0x1c17   : > { %v7928_v10 = vpop.f32.mrb[89].mxu0 }
0x1c1a   : > { %v10278_v33 = vpop.f32.mrb[110].mxu1  ;;  %v5508_v54 = vpop.f32.mrb[90].mxu0 }
0x1c1b   : > { %v5626_v61 = vmul.f32 0.35355338, %v5508_v54  ;;  %v7940_v30 = vpop.f32.mrb[111].mxu1  ;;  %v7952_v40 = vpop.f32.mrb[91].mxu0 }
0x1c1d   : > { %v5632_v59 = vadd.f32 %v5626_v61, %v9088_v24 }
0x1c1e   : > { %v10281_v4 = vpop.f32.mrb[112].mxu1  ;;  %v5513_v18 = vpop.f32.mrb[92].mxu0 }
0x1c1f   : > { %v5627_v52 = vmul.f32 0.35355338, %v5513_v18  ;;  %v7943_v9 = vpop.f32.mrb[113].mxu1  ;;  %v7955_v35 = vpop.f32.mrb[93].mxu0  ;;  %v5638_v55 = vsel %vm1411_vm6, %v5632_v59, -inf }
0x1c20   : > { %5639 = vmax.xlane.f32.xlu0 %v5638_v55 }
0x1c21   : > { %v5633_v20 = vadd.f32 %v5627_v52, %v9088_v24 }
0x1c22   : > { %v5518_v5 = vpop.f32.mrb[94].mxu0  ;;  %v5612_v25 = vpop.f32.mrb[114].mxu1 }
0x1c23   : > { %v5628_v32 = vmul.f32 0.35355338, %v5518_v5  ;;  %v5629_v58 = vmul.f32 0.35355338, %v5612_v25  ;;  %v7958_v26 = vpop.f32.mrb[95].mxu0  ;;  %v7967_v63 = vpop.f32.mrb[115].mxu1 }
0x1c24   : > { %v5641_v44 = vsel %vm1411_vm6, %v5633_v20, -inf }
0x1c25   : > { %v5634_v2 = vadd.f32 %v5628_v32, %v9088_v24  ;;  %5642 = vmax.xlane.f32.xlu1 %v5641_v44  ;;  %v5635_v38 = vadd.f32 %v5629_v58, %v9088_v24 }
0x1c26   : > { %v5617_v47 = vpop.f32.mrb[116].mxu1 }
0x1c27   : > { %v7970_v8 = vpop.f32.mrb[117].mxu1  ;;  %v5644_v50 = vsel %vm1411_vm6, %v5634_v2, -inf  ;;  %v5647_v7 = vsel %vm1411_vm6, %v5635_v38, -inf }
0x1c28   : > { %5645 = vmax.xlane.f32.xlu0 %v5644_v50 }
0x1c2a   : > { %v5622_v49 = vpop.f32.mrb[118].mxu1 }
0x1c2b   : > { %v7973_v48 = vpop.f32.mrb[119].mxu1 }
0x1c2c   : > { %5648 = vmax.xlane.f32.xlu0 %v5647_v7 }
0x1cad   : > { %v5640_v3 = vpop.xlane.xlu0 %5639 }
0x1cae   : > { %v5656_v17 = vsub.f32 %v5632_v59, %v5640_v3 }
0x1cb0   : > { %v5662_v39 = vmul.f32 1.442695, %v5656_v17 }
0x1cb2   : > { %8711 = vpow2.f32 %v5662_v39  ;;  %v5643_v57 = vpop.xlane.xlu1 %5642 }
0x1cb3   : > { %v5657_v16 = vsub.f32 %v5633_v20, %v5643_v57  ;;  %v5630_v20 = vmul.f32 0.35355338, %v5617_v47 }
0x1cb5   : > { %v5664_v60 = vmul.f32 1.442695, %v5657_v16  ;;  %v5646_v22 = vpop.xlane.xlu0 %5645  ;;  %v5636_v5 = vadd.f32 %v5630_v20, %v9088_v24  ;;  %v7045_v20 = vld [vmem:[%s9572_s20 + $0x30] sm:$0xff] }
0x1cb6   : > { %v5658_v10 = vsub.f32 %v5634_v2, %v5646_v22 }
0x1cb7   : > { %8713 = vpow2.f32 %v5664_v60  ;;  %v5650_v32 = vsel %vm1411_vm6, %v5636_v5, -inf }
0x1cb8   : > { %v5666_v54 = vmul.f32 1.442695, %v5658_v10 }
0x1cb9   : > { %v5649_v9 = vpop.xlane.xlu0 %5648 }
0x1cba   : > { %8715 = vpow2.f32 %v5666_v54  ;;  %v5659_v35 = vsub.f32 %v5635_v38, %v5649_v9  ;;  %v7044_v9 = vld [vmem:[%s9572_s20 + $0x28] sm:$0xff] }
0x1cbc   : > { %v8712_v61 = vpop.eup %8711  ;;  %v5668_v55 = vmul.f32 1.442695, %v5659_v35 }
0x1cbd   : > { %v5674_v30 = vsel %vm1411_vm6, %v8712_v61, 0.0 }
0x1cbe   : > { %5675 = vadd.xlane.f32.xlu0 %v5674_v30  ;;  %8717 = vpow2.f32 %v5668_v55 }
0x1cc1   : > { %v8714_v40 = vpop.eup %8713 }
0x1cc2   : > { %v5677_v18 = vsel %vm1411_vm6, %v8714_v40, 0.0 }
0x1cc3   : > { %5678 = vadd.xlane.f32.xlu1 %v5677_v18 }
0x1cc4   : > { %v8716_v52 = vpop.eup %8715 }
0x1cc5   : > { %v5680_v59 = vsel %vm1411_vm6, %v8716_v52, 0.0 }
0x1cc6   : > { %5681 = vadd.xlane.f32.xlu0 %v5680_v59  ;;  %v7043_v59 = vld [vmem:[%s9572_s20 + $0x20] sm:$0xff] }
0x1cc7   : > { %v8259_v35 = vpack.c.bf16 %v7044_v9, %v7043_v59 }
0x1cc8   : > { %v8718_v25 = vpop.eup %8717 }
0x1cc9   : > { %v5683_v58 = vsel %vm1411_vm6, %v8718_v25, 0.0 }
0x1cd4   : > { %5708 = vrot.lane.b32.xlu1 %v9834_v43, %s10576_s23  ;;  %v5631_v43 = vmul.f32 0.35355338, %v5622_v49 }
0x1cd8   : > { %8491 = vrot.lane.b32.xlu1 %v9844_v28, %s10576_s23 }
0x1cdc   : > { %8486 = vrot.lane.b32.xlu0 %v9830_v34, %s10576_s23  ;;  %v5637_v34 = vadd.f32 %v5631_v43, %v9088_v24 }
0x1cde   : > { %v5653_v28 = vsel %vm1411_vm6, %v5637_v34, -inf }
0x1cfb   : > { %5651 = vmax.xlane.f32.xlu0 %v5650_v32 }
0x1cfc   : > { %5684 = vadd.xlane.f32.xlu1 %v5683_v58 }
0x1d0d   : > { %5806 = vrot.lane.b32.xlu1 %v9848_v51, %s10576_s23 }
0x1d31   : > { %5654 = vmax.xlane.f32.xlu1 %v5653_v28 }
0x1d42   : > { %5908 = vrot.lane.b32.xlu1 %v10140_v12, %s10577_s2 }
0x1d46   : > { %5930 = vrot.lane.b32.xlu1 %v10270_v37, %s10578_s0 }
0x1d4a   : > { %5932 = vrot.lane.b32.xlu1 %v10272_v6, %s10578_s0 }
0x1d4b   : > { %v5676_v26 = vpop.xlane.xlu0 %5675 }
0x1d4c   : > { %8719 = vrcp.f32 %v5676_v26 }
0x1d4e   : > { %5912 = vrot.lane.b32.xlu1 %v10142_v11, %s10577_s2 }
0x1d50   : > { %v5679_v51 = vpop.xlane.xlu1 %5678 }
0x1d51   : > { %8721 = vrcp.f32 %v5679_v51 }
0x1d52   : > { %5936 = vrot.lane.b32.xlu1 %v10274_v46, %s10578_s0 }
0x1d53   : > { %v5682_v24 = vpop.xlane.xlu0 %5681 }
0x1d54   : > { %v5709_v63 = vpop.permute.xlu1 %5708  ;;  %8723 = vrcp.f32 %v5682_v24 }
0x1d56   : > { %v8720_v50 = vpop.eup %8719 }
0x1d57   : > { %v8487_v44 = vpop.permute.xlu0 %8486  ;;  %v5698_v11 = vmul.f32 %v8720_v50, %v8712_v61 }
0x1d58   : > { %v8492_v12 = vpop.permute.xlu1 %8491  ;;  %v8489_v2 = vunpack.i.h.bf16 %v8487_v44  ;;  %v8488_v47 = vunpack.i.l.bf16 %v8487_v44 }
0x1d59   : > { %v8494_v37 = vunpack.i.h.bf16 %v8492_v12  ;;  %v8493_v38 = vunpack.i.l.bf16 %v8492_v12 }
0x1d5a   : > { %v8254_v6 = vpack.c.bf16 %v8489_v2, %v8488_v47 }
0x1d5b   : > { %v8257_v8 = vpack.c.bf16 %v8494_v37, %v8493_v38  ;;  %v8722_v46 = vpop.eup %8721 }
0x1d5c   : > { %8255 = vmatpush3.bf16.msra.mxu0 %v8254_v6  ;;  %v5699_v49 = vmul.f32 %v8722_v46, %v8714_v40 }
0x1d5d   : > { %8258 = vmatpush3.bf16.msra.mxu1 %v8257_v8  ;;  %7978 = vmatprep.subr.mxu0 %v8772_v62 }
0x1d5e   : > { %7993 = vmatprep.subr.mxu1 %v8772_v62  ;;  %v8724_v48 = vpop.eup %8723 }
0x1d5f   : > { %v5700_v7 = vmul.f32 %v8724_v48, %v8716_v52 }
0x1d60   : > { %7979 = vmatpush3.msra.mxu0 %v5709_v63 }
0x1d61   : > { %7981 = vmatmul.mubr.msk.f32.vlgmr.msra.gmra.mrb[96].mxu0 %vm1411_vm6, %v5698_v11  ;;  %8260 = vmatprep.subr.bf16.mxu0 %v8259_v35 }
0x1d62   : > { %7983 = vmatprep.mubr.msk.f32.mxu0 %vm8771_vm2, %v8772_v62  ;;  %8262 = vmatpush3.bf16.msra.mxu0 %v8259_v35 }
0x1d65   : > { %7984 = vmatmul.mubr.msk.f32.gmra.mrb[98].mxu0 %vm1411_vm6, %v5699_v49 }
0x1d66   : > { %7986 = vmatprep.mubr.msk.f32.mxu0 %vm8771_vm2, %v8772_v62 }
0x1d69   : > { %7987 = vmatmul.mubr.msk.f32.gmra.mrb[100].mxu0 %vm1411_vm6, %v5700_v7 }
0x1d88   : > { %v5652_v3 = vpop.xlane.xlu0 %5651 }
0x1d89   : > { %v5685_v17 = vpop.xlane.xlu1 %5684  ;;  %v5660_v39 = vsub.f32 %v5636_v5, %v5652_v3  ;;  %v7046_v5 = vld [vmem:[%s9572_s20 + $0x38] sm:$0xff] }
0x1d8a   : > { %8725 = vrcp.f32 %v5685_v17 }
0x1d8b   : > { %v5670_v57 = vmul.f32 1.442695, %v5660_v39 }
0x1d8d   : > { %8727 = vpow2.f32 %v5670_v57  ;;  %v5807_v16 = vpop.permute.xlu1 %5806 }
0x1d8e   : > { %7994 = vmatpush3.msra.mxu1 %v5807_v16 }
0x1d94   : > { %v8726_v60 = vpop.eup %8725 }
0x1d95   : > { %v5701_v22 = vmul.f32 %v8726_v60, %v8718_v25  ;;  %v8263_v25 = vpack.c.bf16 %v7046_v5, %v7045_v20 }
0x1d97   : > { %v8728_v10 = vpop.eup %8727  ;;  %7996 = vmatmul.mubr.msk.f32.vlgmr.msra.gmra.mrb[120].mxu1 %vm1411_vm6, %v5701_v22  ;;  %8264 = vmatprep.subr.bf16.mxu0 %v8263_v25 }
0x1d98   : > { %v5686_v54 = vsel %vm1411_vm6, %v8728_v10, 0.0  ;;  %7998 = vmatprep.mubr.msk.f32.mxu1 %vm8771_vm2, %v8772_v62  ;;  %8266 = vmatpush3.bf16.msra.mxu0 %v8263_v25 }
0x1d99   : > { %5687 = vadd.xlane.f32.xlu0 %v5686_v54 }
0x1dbe   : > { %v5655_v61 = vpop.xlane.xlu1 %5654 }
0x1dbf   : > { %v5661_v30 = vsub.f32 %v5637_v34, %v5655_v61 }
0x1dc1   : > { %v5672_v40 = vmul.f32 1.442695, %v5661_v30 }
0x1dc3   : > { %8729 = vpow2.f32 %v5672_v40 }
0x1dcd   : > { %v8730_v18 = vpop.eup %8729 }
0x1dce   : > { %v5689_v52 = vsel %vm1411_vm6, %v8730_v18, 0.0 }
0x1dcf   : > { %5690 = vadd.xlane.f32.xlu0 %v5689_v52 }
0x1de5   : > { %5906 = vrot.lane.b32.xlu0 %v10138_v45, %s10577_s2 }
0x1de9   : > { %5910 = vrot.lane.b32.xlu0 %v10144_v15, %s10577_s2 }
0x1ded   : > { %5934 = vrot.lane.b32.xlu0 %v10276_v41, %s10578_s0 }
0x1e26   : > { %v5688_v55 = vpop.xlane.xlu0 %5687 }
0x1e27   : > { %8731 = vrcp.f32 %v5688_v55 }
0x1e31   : > { %v8732_v32 = vpop.eup %8731 }
0x1e32   : > { %v5702_v45 = vmul.f32 %v8732_v32, %v8728_v10 }
0x1e34   : > { %v5788_v58 = vpop.f32.mrb[96].mxu0  ;;  %7999 = vmatmul.mubr.msk.f32.gmra.mrb[122].mxu1 %vm1411_vm6, %v5702_v45 }
0x1e35   : > { %v7982_v15 = vpop.f32.mrb[97].mxu0  ;;  %5954 = vrot.lane.b32.xlu0 %v5788_v58, %s10579_s1  ;;  %8001 = vmatprep.mubr.msk.f32.mxu1 %vm8771_vm2, %v8772_v62 }
0x1e38   : > { %v5793_v41 = vpop.f32.mrb[98].mxu0 }
0x1e39   : > { %v7985_v43 = vpop.f32.mrb[99].mxu0  ;;  %5956 = vrot.lane.b32.xlu1 %v5793_v41, %s10579_s1 }
0x1e3c   : > { %v5798_v34 = vpop.f32.mrb[100].mxu0 }
0x1e3d   : > { %v7988_v28 = vpop.f32.mrb[101].mxu0  ;;  %5958 = vrot.lane.b32.xlu0 %v5798_v34, %s10579_s1 }
0x1e41   : > { %5914 = vrot.lane.b32.xlu0 %v10146_v19, %s10577_s2  ;;  %v5909_v19 = vpop.permute.xlu1 %5908 }
0x1e45   : > { %5938 = vrot.lane.b32.xlu0 %v10278_v33, %s10578_s0  ;;  %v5931_v44 = vpop.permute.xlu1 %5930 }
0x1e49   : > { %v5933_v33 = vpop.permute.xlu1 %5932 }
0x1e4d   : > { %v5913_v47 = vpop.permute.xlu1 %5912 }
0x1e51   : > { %v5937_v6 = vpop.permute.xlu1 %5936 }
0x1e5c   : > { %v5691_v26 = vpop.xlane.xlu0 %5690 }
0x1e5d   : > { %8733 = vrcp.f32 %v5691_v26 }
0x1e60   : > { %v5907_v12 = vpop.permute.xlu0 %5906 }
0x1e61   : > { %v5972_v38 = vsel %vm1205_vm3, %v10006_v0, %v5907_v12 }
0x1e62   : > { %v5978_v50 = vsel %vm839_vm0, %v5972_v38, %v5931_v44 }
0x1e64   : > { %v5911_v2 = vpop.permute.xlu0 %5910 }
0x1e65   : > { %v5974_v0 = vsel %vm1205_vm3, %v10012_v14, %v5911_v2 }
0x1e67   : > { %v8734_v51 = vpop.eup %8733 }
0x1e68   : > { %v5703_v24 = vmul.f32 %v8734_v51, %v8730_v18  ;;  %v5935_v37 = vpop.permute.xlu0 %5934  ;;  %v10384_v18 = vld [vmem:[%s9622_s19 + $0x1] ss:$0 sm:$0xff]  ;;  %s771_s19 = scalar_lea.vmem %s10513_s3, %s10581_s25 }
0x1e69   : > { %v5980_v48 = vsel %vm839_vm0, %v5974_v0, %v5935_v37  ;;  %v7060_v37 = vld [vmem:[%s9671_s26 + $0x28] sm:$0xff] }
0x1e6a   : > { %v5886_v63 = vpop.f32.mrb[120].mxu1  ;;  %8002 = vmatmul.mubr.msk.f32.gmra.mrb[124].mxu1 %vm1411_vm6, %v5703_v24 }
0x1e6b   : > { %5960 = vrot.lane.b32.xlu1 %v5886_v63, %s10579_s1  ;;  %v7997_v62 = vpop.f32.mrb[121].mxu1 }
0x1e6f   : > { %5916 = vrot.lane.b32.xlu1 %v10149_v13, %s10577_s2  ;;  %v5973_v13 = vsel %vm1205_vm3, %v10008_v21, %v5909_v19  ;;  %v5975_v21 = vsel %vm1205_vm3, %v10010_v23, %v5913_v47  ;;  %v7059_v47 = vld [vmem:[%s9671_s26 + $0x20] sm:$0xff] }
0x1e70   : > { %v5981_v17 = vsel %vm839_vm0, %v5975_v21, %v5937_v6  ;;  %v8267_v38 = vpack.c.bf16 %v7060_v37, %v7059_v47  ;;  %v7061_v6 = vld [vmem:[%s9671_s26 + $0x30] sm:$0xff]  ;;  %v7076_v47 = vld [vmem:[%s9705_s18 + $0xa8] sm:$0xff] }
0x1e72   : > { %8268 = vmatprep.subr.bf16.mxu1 %v8267_v38 }
0x1e73   : > { %5940 = vrot.lane.b32.xlu1 %v10281_v4, %s10578_s0  ;;  %v5979_v4 = vsel %vm839_vm0, %v5973_v13, %v5933_v33  ;;  %8270 = vmatpush3.bf16.msra.mxu1 %v8267_v38 }
0x1ea7   : > { %v5955_v8 = vpop.permute.xlu0 %5954 }
0x1ea8   : > { %v5984_v11 = vsel %vm1411_vm6, %v5978_v50, %v5955_v8  ;;  %v7062_v8 = vld [vmem:[%s9671_s26 + $0x38] sm:$0xff] }
0x1ea9   : > { %8012 = vmatprep.mubr.msk.f32.mxu0 %vm968_vm1, %v5984_v11  ;;  %v8271_v50 = vpack.c.bf16 %v7062_v8, %v7061_v6 }
0x1eab   : > { %v5957_v46 = vpop.permute.xlu1 %5956  ;;  %8272 = vmatprep.subr.bf16.mxu1 %v8271_v50 }
0x1eac   : > { %v5985_v49 = vsel %vm1411_vm6, %v5979_v4, %v5957_v46  ;;  %8274 = vmatpush3.bf16.msra.mxu1 %v8271_v50 }
0x1ead   : > { %8013 = vmatmul.mubr.msk.f32.vlgmr.msra.gmra.mrb[102].mxu0 %vm968_vm1, %v5985_v49 }
0x1eaf   : > { %v5959_v7 = vpop.permute.xlu0 %5958 }
0x1eb0   : > { %v5986_v3 = vsel %vm1411_vm6, %v5980_v48, %v5959_v7 }
0x1eb1   : > { %8015 = vmatprep.mubr.msk.f32.mxu0 %vm968_vm1, %v5986_v3 }
0x1eb3   : > { %v5915_v10 = vpop.permute.xlu0 %5914 }
0x1eb4   : > { %v5976_v23 = vsel %vm1205_vm3, %v10014_v36, %v5915_v10 }
0x1eb7   : > { %v5939_v54 = vpop.permute.xlu0 %5938 }
0x1eb8   : > { %v5982_v61 = vsel %vm839_vm0, %v5976_v23, %v5939_v54  ;;  %v7071_v54 = vld [vmem:[%s9705_s18 + $0x80] sm:$0xff]  ;;  %v7072_v23 = vld [vmem:[%s9705_s18 + $0x88] sm:$0xff] }
0x1edd   : > { %v5961_v39 = vpop.permute.xlu1 %5960 }
0x1ede   : > { %v5987_v57 = vsel %vm1411_vm6, %v5981_v17, %v5961_v39 }
0x1edf   : > { %8016 = vmatmul.mubr.msk.f32.gmra.mrb[104].mxu0 %vm968_vm1, %v5987_v57 }
0x1ee1   : > { %v5917_v25 = vpop.permute.xlu1 %5916 }
0x1ee2   : > { %v5977_v45 = vsel %vm1205_vm3, %v10017_v29, %v5917_v25 }
0x1ee5   : > { %v5941_v32 = vpop.permute.xlu1 %5940 }
0x1ee6   : > { %v5983_v58 = vsel %vm839_vm0, %v5977_v45, %v5941_v32 }
0x1f07   : > { %v5891_v16 = vpop.f32.mrb[122].mxu1 }
0x1f08   : > { %5962 = vrot.lane.b32.xlu0 %v5891_v16, %s10579_s1  ;;  %v8000_v14 = vpop.f32.mrb[123].mxu1 }
0x1f3d   : > { %v5896_v60 = vpop.f32.mrb[124].mxu1 }
0x1f3e   : > { %5964 = vrot.lane.b32.xlu1 %v5896_v60, %s10579_s1  ;;  %v8003_v22 = vpop.f32.mrb[125].mxu1 }
0x1f7a   : > { %v5963_v30 = vpop.permute.xlu0 %5962 }
0x1f7b   : > { %v5988_v40 = vsel %vm1411_vm6, %v5982_v61, %v5963_v30  ;;  %v8275_v61 = vpack.c.bf16 %v7072_v23, %v7071_v54  ;;  %v7086_v54 = vld [vmem:[%s9705_s18 + $0xf8] sm:$0xff] }
0x1f7c   : > { %8018 = vmatprep.mubr.msk.f32.mxu0 %vm968_vm1, %v5988_v40 }
0x1f7d   : > { %8276 = vmatprep.subr.bf16.mxu0 %v8275_v61 }
0x1f7e   : > { %8278 = vmatpush3.bf16.msra.mxu0 %v8275_v61  ;;  %v10470_v61 = vld [vmem:[%s9754_s21 + $0x1] ss:$0 sm:$0xff] }
0x1f80   : > { %v8014_v52 = vpop.f32.mrb[102].mxu0 }
0x1f81   : > { %v6093_v59 = vadd.f32 %v8014_v52, %v10384_v18  ;;  %v6087_v9 = vpop.f32.mrb[103].mxu0 }
0x1f82   : > { %v6088_v35 = vadd.f32 %v10384_v18, %v6087_v9  ;;  %v10428_v9 = vld [vmem:[%s9713_s27 + $0x1] ss:$0 sm:$0xff]  ;;  %s774_s27 = scalar_lea.vmem %s10514_s4, %s10581_s25 }
0x1f83   : > { %v6117_v55 = vadd.f32 %v6093_v59, %v9767_v27 }
0x1f84   : > { %v10390_v20 = vadd.f32 %v6088_v35, %v9770_v42 }
0x1f85   : > { %v6129_v36 = vsel %vm968_vm1, %v6117_v55, 0.0 }
0x1f86   : > { %6130 = vadd.xlane.f32.xlu1 %v6129_v36  ;;  %v6126_v5 = vsel %vm968_vm1, %v10390_v20, 0.0 }
0x1f87   : > { %6127 = vadd.xlane.f32.xlu0 %v6126_v5  ;;  %v10431_v5 = vld [vmem:[%s9720_s5 + $0x1] ss:$0 sm:$0xff] }
0x1fb0   : > { %v5965_v15 = vpop.permute.xlu1 %5964 }
0x1fb1   : > { %v5989_v27 = vsel %vm1411_vm6, %v5983_v58, %v5965_v15 }
0x1fb2   : > { %v8017_v41 = vpop.f32.mrb[104].mxu0  ;;  %8019 = vmatmul.mubr.msk.f32.gmra.mrb[106].mxu0 %vm968_vm1, %v5989_v27 }
0x1fb3   : > { %v6097_v42 = vpop.f32.mrb[105].mxu0  ;;  %v6103_v43 = vadd.f32 %v8017_v41, %v10384_v18 }
0x1fb4   : > { %v6098_v34 = vadd.f32 %v10384_v18, %v6097_v42 }
0x1fb5   : > { %v10404_v26 = vadd.f32 %v6103_v43, %v9777_v1 }
0x1fb6   : > { %v6118_v28 = vadd.f32 %v6098_v34, %v9780_v53 }
0x1fb7   : > { %v6135_v51 = vsel %vm968_vm1, %v10404_v26, 0.0 }
0x1fb8   : > { %v6132_v29 = vsel %vm968_vm1, %v6118_v28, 0.0 }
0x1fb9   : > { %6133 = vadd.xlane.f32.xlu0 %v6132_v29 }
0x1fbd   : > { %6136 = vadd.xlane.f32.xlu0 %v6135_v51 }
0x2013   : > { %v6131_v24 = vpop.xlane.xlu1 %6130 }
0x2014   : > { %v6145_v63 = vmul.f32 0.03125, %v6131_v24  ;;  %v6128_v62 = vpop.xlane.xlu0 %6127 }
0x2015   : > { %v6144_v19 = vmul.f32 0.03125, %v6128_v62 }
0x2016   : > { %v6151_v44 = vsub.f32 %v6117_v55, %v6145_v63 }
0x2017   : > { %v6150_v53 = vsub.f32 %v10390_v20, %v6144_v19 }
0x2018   : > { %v6157_v1 = vmul.f32 %v6151_v44, %v6151_v44 }
0x2019   : > { %v6156_v12 = vmul.f32 %v6150_v53, %v6150_v53 }
0x201a   : > { %v6165_v33 = vsel %vm968_vm1, %v6157_v1, 0.0  ;;  %v7074_v1 = vld [vmem:[%s9705_s18 + $0x98] sm:$0xff] }
0x201b   : > { %6166 = vadd.xlane.f32.xlu1 %v6165_v33  ;;  %v6162_v2 = vsel %vm968_vm1, %v6156_v12, 0.0 }
0x201c   : > { %6163 = vadd.xlane.f32.xlu0 %v6162_v2  ;;  %v7075_v2 = vld [vmem:[%s9705_s18 + $0xa0] sm:$0xff] }
0x201d   : > { %v8283_v6 = vpack.c.bf16 %v7076_v47, %v7075_v2 }
0x2046   : > { %v6134_v11 = vpop.xlane.xlu0 %6133 }
0x2047   : > { %v6146_v13 = vmul.f32 0.03125, %v6134_v11 }
0x2049   : > { %v6152_v4 = vsub.f32 %v6118_v28, %v6146_v13  ;;  %v7077_v13 = vld [vmem:[%s9705_s18 + $0xb0] sm:$0xff] }
0x204a   : > { %v6137_v46 = vpop.xlane.xlu0 %6136 }
0x204b   : > { %v6147_v49 = vmul.f32 0.03125, %v6137_v46  ;;  %v6158_v0 = vmul.f32 %v6152_v4, %v6152_v4 }
0x204d   : > { %v6153_v48 = vsub.f32 %v10404_v26, %v6147_v49  ;;  %v6168_v7 = vsel %vm968_vm1, %v6158_v0, 0.0 }
0x204e   : > { %6169 = vadd.xlane.f32.xlu0 %v6168_v7 }
0x204f   : > { %v6159_v3 = vmul.f32 %v6153_v48, %v6153_v48 }
0x2051   : > { %v6171_v21 = vsel %vm968_vm1, %v6159_v3, 0.0  ;;  %v7079_v3 = vld [vmem:[%s9705_s18 + $0xc0] sm:$0xff] }
0x2052   : > { %6172 = vadd.xlane.f32.xlu1 %v6171_v21  ;;  %v7080_v21 = vld [vmem:[%s9705_s18 + $0xc8] sm:$0xff] }
0x2085   : > { %v8020_v17 = vpop.f32.mrb[106].mxu0 }
0x2086   : > { %v6113_v39 = vadd.f32 %v8020_v17, %v10384_v18  ;;  %v6107_v57 = vpop.f32.mrb[107].mxu0  ;;  %v7081_v17 = vld [vmem:[%s9705_s18 + $0xd0] sm:$0xff] }
0x2087   : > { %v6108_v16 = vadd.f32 %v10384_v18, %v6107_v57  ;;  %v7082_v57 = vld [vmem:[%s9705_s18 + $0xd8] sm:$0xff] }
0x2088   : > { %v6121_v14 = vadd.f32 %v6113_v39, %v9787_v56  ;;  %v8291_v39 = vpack.c.bf16 %v7080_v21, %v7079_v3 }
0x2089   : > { %v6120_v60 = vadd.f32 %v6108_v16, %v9790_v31  ;;  %v8295_v16 = vpack.c.bf16 %v7082_v57, %v7081_v17 }
0x208a   : > { %v6141_v22 = vsel %vm968_vm1, %v6121_v14, 0.0 }
0x208b   : > { %6142 = vadd.xlane.f32.xlu1 %v6141_v22  ;;  %v6138_v10 = vsel %vm968_vm1, %v6120_v60, 0.0 }
0x208c   : > { %6139 = vadd.xlane.f32.xlu0 %v6138_v10  ;;  %v7085_v10 = vld [vmem:[%s9705_s18 + $0xf0] sm:$0xff] }
0x208d   : > { %v8303_v23 = vpack.c.bf16 %v7086_v54, %v7085_v10 }
0x20a8   : > { %v6167_v30 = vpop.xlane.xlu1 %6166 }
0x20a9   : > { %v6181_v40 = vmul.f32 0.03125, %v6167_v30  ;;  %v6164_v18 = vpop.xlane.xlu0 %6163 }
0x20aa   : > { %v6180_v52 = vmul.f32 0.03125, %v6164_v18 }
0x20ab   : > { %v6187_v56 = vadd.f32 1e-06, %v6181_v40 }
0x20ac   : > { %v6186_v59 = vadd.f32 1e-06, %v6180_v52 }
0x20ad   : > { %8735 = vrsqrt.f32 %v6187_v56 }
0x20ae   : > { %8737 = vrsqrt.f32 %v6186_v59 }
0x20b7   : > { %v8736_v31 = vpop.eup %8735 }
0x20b8   : > { %v8738_v35 = vpop.eup %8737  ;;  %v6199_v55 = vmul.f32 %v8736_v31, %v6151_v44 }
0x20b9   : > { %v6198_v36 = vmul.f32 %v8738_v35, %v6150_v53  ;;  %v7073_v53 = vld [vmem:[%s9705_s18 + $0x90] sm:$0xff] }
0x20ba   : > { %v6211_v25 = vmul.f32 %v10428_v9, %v6199_v55  ;;  %v8279_v12 = vpack.c.bf16 %v7074_v1, %v7073_v53 }
0x20bb   : > { %v6210_v32 = vmul.f32 %v10428_v9, %v6198_v36 }
0x20bc   : > { %v6223_v58 = vadd.f32 %v10431_v5, %v6211_v25  ;;  %8280 = vmatprep.subr.bf16.mxu0 %v8279_v12 }
0x20bd   : > { %v6222_v45 = vadd.f32 %v10431_v5, %v6210_v32  ;;  %8282 = vmatpush3.bf16.msra.mxu0 %v8279_v12 }
0x20be   : > { %8284 = vmatprep.subr.bf16.mxu0 %v8283_v6 }
0x20bf   : > { %8029 = vmatprep.mubr.msk.f32.mxu1 %vm968_vm1, %v6222_v45 }
0x20c0   : > { %8030 = vmatmul.mubr.msk.f32.vlgmr.msra.gmra.mrb[126].mxu1 %vm968_vm1, %v6223_v58 }
0x20c1   : > { %8286 = vmatpush3.bf16.msra.mxu0 %v8283_v6 }
0x20db   : > { %v6170_v15 = vpop.xlane.xlu0 %6169 }
0x20dc   : > { %v6182_v27 = vmul.f32 0.03125, %v6170_v15 }
0x20de   : > { %v6188_v41 = vadd.f32 1e-06, %v6182_v27 }
0x20df   : > { %v6173_v42 = vpop.xlane.xlu1 %6172 }
0x20e0   : > { %8739 = vrsqrt.f32 %v6188_v41  ;;  %v6183_v43 = vmul.f32 0.03125, %v6173_v42 }
0x20e2   : > { %v6189_v34 = vadd.f32 1e-06, %v6183_v43 }
0x20e4   : > { %8741 = vrsqrt.f32 %v6189_v34 }
0x20ea   : > { %v8740_v28 = vpop.eup %8739 }
0x20eb   : > { %v6200_v29 = vmul.f32 %v8740_v28, %v6152_v4  ;;  %v7078_v4 = vld [vmem:[%s9705_s18 + $0xb8] sm:$0xff] }
0x20ec   : > { %v8287_v49 = vpack.c.bf16 %v7078_v4, %v7077_v13 }
0x20ed   : > { %v6212_v51 = vmul.f32 %v10428_v9, %v6200_v29 }
0x20ee   : > { %v8742_v24 = vpop.eup %8741  ;;  %8288 = vmatprep.subr.bf16.mxu0 %v8287_v49 }
0x20ef   : > { %v6224_v63 = vadd.f32 %v10431_v5, %v6212_v51  ;;  %v6201_v62 = vmul.f32 %v8742_v24, %v6153_v48  ;;  %8290 = vmatpush3.bf16.msra.mxu0 %v8287_v49 }
0x20f0   : > { %8292 = vmatprep.subr.bf16.mxu0 %v8291_v39 }
0x20f1   : > { %8032 = vmatprep.mubr.msk.f32.mxu1 %vm968_vm1, %v6224_v63  ;;  %v6213_v19 = vmul.f32 %v10428_v9, %v6201_v62 }
0x20f3   : > { %v6225_v44 = vadd.f32 %v10431_v5, %v6213_v19  ;;  %8294 = vmatpush3.bf16.msra.mxu0 %v8291_v39 }
0x20f4   : > { %8296 = vmatprep.subr.bf16.mxu0 %v8295_v16 }
0x20f5   : > { %8033 = vmatmul.mubr.msk.f32.gmra.mrb[128].mxu1 %vm968_vm1, %v6225_v44 }
0x20f7   : > { %8298 = vmatpush3.bf16.msra.mxu0 %v8295_v16 }
0x2118   : > { %v6143_v33 = vpop.xlane.xlu1 %6142 }
0x2119   : > { %v6149_v37 = vmul.f32 0.03125, %v6143_v33  ;;  %v6140_v38 = vpop.xlane.xlu0 %6139 }
0x211a   : > { %v6148_v8 = vmul.f32 0.03125, %v6140_v38 }
0x211b   : > { %v10449_v50 = vsub.f32 %v6121_v14, %v6149_v37  ;;  %v7083_v14 = vld [vmem:[%s9705_s18 + $0xe0] sm:$0xff] }
0x211c   : > { %v10451_v11 = vsub.f32 %v6120_v60, %v6148_v8  ;;  %v7084_v60 = vld [vmem:[%s9705_s18 + $0xe8] sm:$0xff] }
0x211d   : > { %v6161_v46 = vmul.f32 %v10449_v50, %v10449_v50  ;;  %v8299_v22 = vpack.c.bf16 %v7084_v60, %v7083_v14 }
0x211e   : > { %v6160_v0 = vmul.f32 %v10451_v11, %v10451_v11 }
0x211f   : > { %v6177_v48 = vsel %vm968_vm1, %v6161_v46, 0.0  ;;  %8300 = vmatprep.subr.bf16.mxu0 %v8299_v22 }
0x2120   : > { %6178 = vadd.xlane.f32.xlu1 %v6177_v48  ;;  %v6174_v7 = vsel %vm968_vm1, %v6160_v0, 0.0  ;;  %8302 = vmatpush3.bf16.msra.mxu0 %v8299_v22 }
0x2121   : > { %6175 = vadd.xlane.f32.xlu0 %v6174_v7  ;;  %8304 = vmatprep.subr.bf16.mxu0 %v8303_v23 }
0x2124   : > { %8306 = vmatpush3.bf16.msra.mxu0 %v8303_v23 }
0x2193   : > { %v8031_v30 = vpop.f32.mrb[126].mxu1 }
0x2194   : > { %v6331_v40 = vadd.f32 %v8031_v30, %v10470_v61  ;;  %v6325_v18 = vpop.f32.mrb[127].mxu1 }
0x2195   : > { %v6326_v52 = vadd.f32 %v10470_v61, %v6325_v18 }
0x2196   : > { %v6361_v56 = vmul.f32 0.044715, %v6331_v40  ;;  %v6355_v34 = vmul.f32 0.5, %v6331_v40 }
0x2197   : > { %v6360_v59 = vmul.f32 0.044715, %v6326_v52  ;;  %v6354_v42 = vmul.f32 0.5, %v6326_v52 }
0x2198   : > { %v6367_v31 = vmul.f32 %v6361_v56, %v6331_v40 }
0x2199   : > { %v6366_v35 = vmul.f32 %v6360_v59, %v6326_v52 }
0x219a   : > { %v6373_v55 = vmul.f32 %v6367_v31, %v6331_v40 }
0x219b   : > { %v6372_v36 = vmul.f32 %v6366_v35, %v6326_v52 }
0x219c   : > { %v6379_v25 = vadd.f32 %v6373_v55, %v6331_v40 }
0x219d   : > { %v6378_v32 = vadd.f32 %v6372_v36, %v6326_v52 }
0x219e   : > { %v6385_v45 = vmul.f32 0.7978846, %v6379_v25 }
0x219f   : > { %v6384_v58 = vmul.f32 0.7978846, %v6378_v32 }
0x21a0   : > { %8743 = vtanh.f32 %v6385_v45 }
0x21a1   : > { %8745 = vtanh.f32 %v6384_v58 }
0x21aa   : > { %v8744_v15 = vpop.eup %8743 }
0x21ab   : > { %v8746_v27 = vpop.eup %8745  ;;  %v6397_v41 = vadd.f32 1.0, %v8744_v15 }
0x21ac   : > { %v6396_v43 = vadd.f32 1.0, %v8746_v27 }
0x21ad   : > { %v6179_v28 = vpop.xlane.xlu1 %6178  ;;  %v6403_v62 = vmul.f32 %v6397_v41, %v6355_v34 }
0x21ae   : > { %v6185_v29 = vmul.f32 0.03125, %v6179_v28  ;;  %v6176_v51 = vpop.xlane.xlu0 %6175  ;;  %v6402_v24 = vmul.f32 %v6396_v43, %v6354_v42  ;;  %v7088_v28 = vld [vmem:[%s9763_s29 + $0x1] ss:$0 sm:$0xff] }
0x21af   : > { %v6184_v63 = vmul.f32 0.03125, %v6176_v51 }
0x21b0   : > { %v6191_v19 = vadd.f32 1e-06, %v6185_v29  ;;  %8070 = vmatprep.mubr.f32.mxu0 %v6402_v24 }
0x21b1   : > { %v6190_v44 = vadd.f32 1e-06, %v6184_v63  ;;  %8071 = vmatmul.mubr.f32.vlgmr.msra.gmra.mrb[108].mxu0 %v6403_v62 }
0x21b2   : > { %8747 = vrsqrt.f32 %v6191_v19 }
0x21b3   : > { %8749 = vrsqrt.f32 %v6190_v44 }
0x21bc   : > { %v8748_v53 = vpop.eup %8747 }
0x21bd   : > { %v8750_v1 = vpop.eup %8749  ;;  %v6203_v12 = vmul.f32 %v8748_v53, %v10449_v50 }
0x21be   : > { %v6202_v33 = vmul.f32 %v8750_v1, %v10451_v11 }
0x21bf   : > { %v6215_v2 = vmul.f32 %v10428_v9, %v6203_v12 }
0x21c0   : > { %v6214_v47 = vmul.f32 %v10428_v9, %v6202_v33 }
0x21c1   : > { %v6227_v38 = vadd.f32 %v10431_v5, %v6215_v2 }
0x21c2   : > { %v6226_v37 = vadd.f32 %v10431_v5, %v6214_v47 }
0x21c4   : > { %8035 = vmatprep.mubr.msk.f32.mxu1 %vm968_vm1, %v6226_v37 }
0x21c5   : > { %8036 = vmatmul.mubr.msk.f32.gmra.mrb[130].mxu1 %vm968_vm1, %v6227_v38 }
0x21c8   : > { %v8034_v6 = vpop.f32.mrb[128].mxu1 }
0x21c9   : > { %v6341_v8 = vadd.f32 %v8034_v6, %v10470_v61  ;;  %v6335_v13 = vpop.f32.mrb[129].mxu1 }
0x21ca   : > { %v6336_v50 = vadd.f32 %v10470_v61, %v6335_v13 }
0x21cb   : > { %v6363_v4 = vmul.f32 0.044715, %v6341_v8  ;;  %v6357_v14 = vmul.f32 0.5, %v6341_v8 }
0x21cc   : > { %v6362_v11 = vmul.f32 0.044715, %v6336_v50  ;;  %v6356_v57 = vmul.f32 0.5, %v6336_v50 }
0x21cd   : > { %v6369_v46 = vmul.f32 %v6363_v4, %v6341_v8 }
0x21ce   : > { %v6368_v49 = vmul.f32 %v6362_v11, %v6336_v50 }
0x21cf   : > { %v6375_v0 = vmul.f32 %v6369_v46, %v6341_v8 }
0x21d0   : > { %v6374_v9 = vmul.f32 %v6368_v49, %v6336_v50 }
0x21d1   : > { %v6381_v48 = vadd.f32 %v6375_v0, %v6341_v8 }
0x21d2   : > { %v6380_v7 = vadd.f32 %v6374_v9, %v6336_v50 }
0x21d3   : > { %v6387_v3 = vmul.f32 0.7978846, %v6381_v48  ;;  %v7089_v48 = vld [vmem:[%s771_s19] ss:$0 sm:$0xff] }
0x21d4   : > { %v6386_v5 = vmul.f32 0.7978846, %v6380_v7 }
0x21d5   : > { %8751 = vtanh.f32 %v6387_v3 }
0x21d6   : > { %8753 = vtanh.f32 %v6386_v5 }
0x21df   : > { %v8752_v21 = vpop.eup %8751 }
0x21e0   : > { %v8754_v17 = vpop.eup %8753  ;;  %v6399_v39 = vadd.f32 1.0, %v8752_v21  ;;  %v7090_v21 = vld [vmem:[%s774_s27] ss:$0 sm:$0xff] }
0x21e1   : > { %v6398_v16 = vadd.f32 1.0, %v8754_v17 }
0x21e2   : > { %v6405_v22 = vmul.f32 %v6399_v39, %v6357_v14 }
0x21e3   : > { %v6404_v60 = vmul.f32 %v6398_v16, %v6356_v57 }
0x21e5   : > { %8073 = vmatprep.mubr.f32.mxu0 %v6404_v60 }
0x21e6   : > { %8074 = vmatmul.mubr.f32.gmra.mrb[110].mxu0 %v6405_v22 }
0x2284   : > { %v8072_v10 = vpop.f32.mrb[108].mxu0 }
0x2285   : > { %v6499_v54 = vpop.f32.mrb[109].mxu0 }
0x2286   : > { %v6500_v51 = vadd.f32 %v7088_v28, %v6499_v54 }
0x2288   : > { %v6524_v19 = vadd.f32 %v6500_v51, %v10390_v20 }
0x2298   : > { %v8037_v23 = vpop.f32.mrb[130].mxu1 }
0x2299   : > { %v6351_v30 = vadd.f32 %v8037_v23, %v10470_v61  ;;  %v6345_v40 = vpop.f32.mrb[131].mxu1 }
0x229a   : > { %v6346_v18 = vadd.f32 %v10470_v61, %v6345_v40 }
0x229b   : > { %v6365_v52 = vmul.f32 0.044715, %v6351_v30  ;;  %v6359_v43 = vmul.f32 0.5, %v6351_v30 }
0x229c   : > { %v6364_v56 = vmul.f32 0.044715, %v6346_v18  ;;  %v6358_v41 = vmul.f32 0.5, %v6346_v18 }
0x229d   : > { %v6371_v59 = vmul.f32 %v6365_v52, %v6351_v30 }
0x229e   : > { %v6370_v31 = vmul.f32 %v6364_v56, %v6346_v18 }
0x229f   : > { %v6377_v35 = vmul.f32 %v6371_v59, %v6351_v30 }
0x22a0   : > { %v6376_v55 = vmul.f32 %v6370_v31, %v6346_v18 }
0x22a1   : > { %v6383_v36 = vadd.f32 %v6377_v35, %v6351_v30 }
0x22a2   : > { %v6382_v25 = vadd.f32 %v6376_v55, %v6346_v18 }
0x22a3   : > { %v6389_v32 = vmul.f32 0.7978846, %v6383_v36 }
0x22a4   : > { %v6388_v45 = vmul.f32 0.7978846, %v6382_v25 }
0x22a5   : > { %8755 = vtanh.f32 %v6389_v32 }
0x22a6   : > { %8757 = vtanh.f32 %v6388_v45 }
0x22af   : > { %v8756_v58 = vpop.eup %8755 }
0x22b0   : > { %v8758_v15 = vpop.eup %8757  ;;  %v6401_v27 = vadd.f32 1.0, %v8756_v58 }
0x22b1   : > { %v6400_v42 = vadd.f32 1.0, %v8758_v15 }
0x22b2   : > { %v6407_v34 = vmul.f32 %v6401_v27, %v6359_v43 }
0x22b3   : > { %v6406_v61 = vmul.f32 %v6400_v42, %v6358_v41 }
0x22b5   : > { %8076 = vmatprep.mubr.f32.mxu0 %v6406_v61 }
0x22b6   : > { %8077 = vmatmul.mubr.f32.gmra.mrb[112].mxu0 %v6407_v34 }
0x22b9   : > { %v8075_v29 = vpop.f32.mrb[110].mxu0 }
0x22ba   : > { %v6513_v24 = vadd.f32 %v8075_v29, %v7088_v28  ;;  %v6508_v63 = vpop.f32.mrb[111].mxu0 }
0x22bc   : > { %v6525_v62 = vadd.f32 %v6513_v24, %v10404_v26 }
0x22be   : > { %v6530_v44 = vrot.slane %v6525_v62, 7 }
0x22c0   : > { %v6532_v53 = vsel %vm6531_vm7, %v6530_v44, %v6524_v19 }
0x22c1   : > { %v6535_v1 = vsel %vm6534_vm8, %v6532_v53, 0.0 }
0x22c2   : > { %6536 = vadd.xlane.f32.xlu0 %v6535_v1 }
0x234f   : > { %v6537_v12 = vpop.xlane.xlu0 %6536 }
0x2350   : > { %v6538_v33 = vmul.f32 0.03125, %v6537_v12 }
0x2352   : > { %v6540_v2 = vrot.slane %v6538_v33, 1  ;;  %v6543_v47 = vsub.f32 %v6524_v19, %v6538_v33 }
0x2354   : > { %v6544_v37 = vsub.f32 %v6525_v62, %v6540_v2  ;;  %v6545_v6 = vmul.f32 %v6543_v47, %v6543_v47 }
0x2356   : > { %v6546_v38 = vmul.f32 %v6544_v37, %v6544_v37 }
0x2358   : > { %v6549_v26 = vrot.slane %v6546_v38, 7 }
0x235a   : > { %v6550_v8 = vsel %vm6531_vm7, %v6549_v26, %v6545_v6 }
0x235b   : > { %v6552_v20 = vsel %vm6534_vm8, %v6550_v8, 0.0 }
0x235c   : > { %6553 = vadd.xlane.f32.xlu1 %v6552_v20 }
0x2389   : > { %v8078_v13 = vpop.f32.mrb[112].mxu0 }
0x238a   : > { %v6517_v50 = vpop.f32.mrb[113].mxu0 }
0x23e9   : > { %v6554_v4 = vpop.xlane.xlu1 %6553 }
0x23ea   : > { %v6555_v11 = vmul.f32 0.03125, %v6554_v4 }
0x23ec   : > { %v6556_v46 = vadd.f32 1e-06, %v6555_v11 }
0x23ee   : > { %8759 = vrsqrt.f32 %v6556_v46 }
0x23f8   : > { %v8760_v49 = vpop.eup %8759 }
0x23f9   : > { %v6559_v0 = vrot.slane %v8760_v49, 1  ;;  %v6562_v9 = vmul.f32 %v8760_v49, %v6543_v47 }
0x23fb   : > { %v6563_v7 = vmul.f32 %v6559_v0, %v6544_v37  ;;  %v6570_v3 = vmul.f32 %v7089_v48, %v6562_v9 }
0x23fd   : > { %v6571_v5 = vmul.f32 %v7089_v48, %v6563_v7  ;;  %v6578_v39 = vadd.f32 %v7090_v21, %v6570_v3 }
0x23ff   : > { %v6579_v17 = vadd.f32 %v7090_v21, %v6571_v5 }
0x2401   : > { %v6582_v57 = vrot.slane %v6579_v17, 7 }
0x2403   : > { %v6583_v16 = vsel %vm6531_vm7, %v6582_v57, %v6578_v39 }
0x2404   : > { %6585 = vst.msk [vmem:[%s830_s22] sm:$0x3] %vm6534_vm8, %v6583_v16 }
0x2405 PF: > { %s27_s24 = sadd.s32 1, %s8767_s24  }
0x2406   : > { %p24_p4 = scmp.ge.s32.totalorder %s27_s24, 6  }
0x2408   :  { %26 = sbr.rel (!%p24_p4) target bundleno = 5 (0x5), region = 178 }

</bundles_post_ra>
